<compile_context>
chip_gen: v5e
topology: v5e:2x2
jax: 0.10.0
libtpu: 0.0.40
codegen_flags: <defaults>
</compile_context>

<pallas_src>
import functools

import jax
import jax.numpy as jnp
from jax.experimental import pallas as pl
from jax.experimental.pallas import tpu as pltpu


def _pick_block(n, candidates):
    for c in candidates:
        if n % c == 0:
            return c
    return n


def _round_up(n, m):
    return ((n + m - 1) // m) * m


# ----------------------------------------------------------------------------
# Fused kernel.  Per grid step (batch block b, time chunk t):
#   1) xp = x_chunk @ W_ih0               (one MXU matmul for all TT*bt rows)
#   2) TT statically unrolled LSTM steps  (2 layers, PyTorch gate order i,f,g,o)
#   3) fused FC head, lane-dense logits stores
# Hidden / cell state persists in VMEM scratch across time chunks.
# ----------------------------------------------------------------------------
def _char_rnn_kernel(
    x_ref,       # (TT, bt, Vp)  time-major padded one-hot chunk   (streamed)
    h0_ref,      # (L, bt, H)    initial hidden state              (resident)
    c0_ref,      # (L, bt, H)    initial cell state                (resident)
    wih0_ref,    # (Vp, 4H)                                        (resident)
    whh0_ref,    # (H, 4H)                                         (resident)
    b0_ref,      # (1, 4H)       b_ih0 + b_hh0                     (resident)
    wih1_ref,    # (H, 4H)                                         (resident)
    whh1_ref,    # (H, 4H)                                         (resident)
    b1_ref,      # (1, 4H)       b_ih1 + b_hh1                     (resident)
    fcw_ref,     # (H, Vp)                                         (resident)
    fcb_ref,     # (1, Vp)                                         (resident)
    logits_ref,  # (TT, bt, Vp)  logits chunk                      (streamed)
    hN_ref,      # (L, bt, H)    final hidden state (resident over time axis)
    cN_ref,      # (L, bt, H)    final cell state
    h_s,         # scratch (L, bt, H) f32 — persists across time chunks
    c_s,         # scratch (L, bt, H) f32
    *,
    hidden: int,
    tt_chunk: int,
):
    t = pl.program_id(1)
    H = hidden
    TT = tt_chunk
    bt = h0_ref.shape[1]
    Vp = fcw_ref.shape[1]

    @pl.when(t == 0)
    def _():
        h_s[...] = h0_ref[...]
        c_s[...] = c0_ref[...]

    # Hoist weight loads and bias broadcasts out of the unrolled time loop.
    whh0 = whh0_ref[...]
    wih1 = wih1_ref[...]
    whh1 = whh1_ref[...]
    fcw = fcw_ref[...]
    b0b = jnp.broadcast_to(b0_ref[...], (bt, 4 * H))
    b1b = jnp.broadcast_to(b1_ref[...], (bt, 4 * H))
    fcbb = jnp.broadcast_to(fcb_ref[...], (bt, Vp))

    # Fused layer-0 input projection for the whole chunk: one big MXU matmul
    # (good M-rows) instead of TT tiny per-step matmuls, and no (T,B,4H)
    # intermediate ever touches HBM.
    x2 = x_ref[...].reshape(TT * bt, Vp)
    xp = jnp.dot(x2, wih0_ref[...], preferred_element_type=jnp.float32)  # (TT*bt, 4H)

    # Carry state in registers across the chunk; touch scratch once per chunk.
    h0p = h_s[0]
    c0p = c_s[0]
    h1p = h_s[1]
    c1p = c_s[1]

    def act(gates, c_prev):
        # PyTorch LSTM gate order: i, f, g, o.
        i = jax.nn.sigmoid(gates[:, 0 * H:1 * H])
        f = jax.nn.sigmoid(gates[:, 1 * H:2 * H])
        g = jnp.tanh(gates[:, 2 * H:3 * H])
        o = jax.nn.sigmoid(gates[:, 3 * H:4 * H])
        c_new = f * c_prev + i * g
        return o * jnp.tanh(c_new), c_new

    # Statically unrolled over the chunk (the recurrence is serial; the unroll
    # amortizes the ~0.35us/grid-step overhead and gives the scheduler full
    # visibility).  TT is kept modest to avoid vreg spills.
    # TODO(synk): for larger TT sweep and/or switch to lax.fori_loop(unroll=k)
    #             to bound live ranges.
    for tt in range(TT):
        # Layer 0: precomputed chunk projection + recurrent matmul.
        gates0 = (xp[tt * bt:(tt + 1) * bt] + b0b
                  + jnp.dot(h0p, whh0, preferred_element_type=jnp.float32))
        h0p, c0p = act(gates0, c0p)

        # Inter-layer dropout is identity in eval mode.
        # Layer 1: two accumulated matmuls — no per-step lane-axis concat copy.
        gates1 = (jnp.dot(h0p, wih1, preferred_element_type=jnp.float32)
                  + jnp.dot(h1p, whh1, preferred_element_type=jnp.float32)
                  + b1b)
        h1p, c1p = act(gates1, c1p)

        # Fused FC head: lane-dense (Vp multiple of 128) contiguous store.
        logit = jnp.dot(h1p, fcw, preferred_element_type=jnp.float32) + fcbb
        logits_ref[tt] = logit.astype(logits_ref.dtype)

    h_s[0] = h0p
    c_s[0] = c0p
    h_s[1] = h1p
    c_s[1] = c1p

    # Final states materialized only on the last time chunk.
    @pl.when(t == pl.num_programs(1) - 1)
    def _():
        hN_ref[...] = h_s[...].astype(hN_ref.dtype)
        cN_ref[...] = c_s[...].astype(cN_ref.dtype)


def lstm_fc_forward(x_tbv, h0, c0, wih0, whh0, b0, wih1, whh1, b1, fcw, fcb,
                    *, time_chunk=None, batch_block=None):
    """x_tbv: (T, Bp, Vp) padded, time-major one-hot input.
    Returns logits (T, Bp, Vp), hN (L, Bp, H), cN (L, Bp, H)."""
    T, Bp, Vp = x_tbv.shape
    L, _, H = h0.shape
    assert L == 2
    assert Bp % 8 == 0 and Vp % 128 == 0

    # Time chunk: large enough to amortize per-grid-step overhead, small enough
    # to stay within v7x's 64 MiB VMEM and out of vreg-spill territory.
    TT = time_chunk if time_chunk is not None else _pick_block(T, (16, 8, 4, 2, 1))
    assert T % TT == 0
    # Per-core batch block (multiple of 8).  Pass batch_block=Bp//2 on v7x so
    # the "parallel" batch axis actually splits across its two TensorCores.
    bt = batch_block if batch_block is not None else Bp
    assert Bp % bt == 0 and bt % 8 == 0

    x_map = lambda b, t: (t, b, 0)
    state_map = lambda b, t: (0, b, 0)
    weight_map = lambda b, t: (0, 0)

    # Explicit VMEM budget (review): streamed blocks x2 buffers + resident
    # weights/state + scratch, x2 headroom, clamped to be safe on v5e..v7x.
    f32 = 4
    streamed = 2 * (TT * bt * Vp) * f32 * 2                       # x in + logits out
    resident = (Vp * 4 * H + 3 * H * 4 * H + 2 * 4 * H + H * Vp + Vp) * f32
    state = 6 * L * bt * H * f32                                  # h0/c0/hN/cN/scratch
    vmem_bytes = int(min(max(2 * (streamed + resident + state) + (2 << 20),
                             4 << 20), 32 << 20))

    out_shape = (
        jax.ShapeDtypeStruct((T, Bp, Vp), jnp.float32),
        jax.ShapeDtypeStruct((L, Bp, H), jnp.float32),
        jax.ShapeDtypeStruct((L, Bp, H), jnp.float32),
    )

    def build(single_buffer_resident):
        def rspec(shape, index_map):
            # Constant-index blocks: 1 VMEM buffer instead of the default 2.
            if single_buffer_resident:
                return pl.BlockSpec(shape, index_map, pipeline_mode=pl.Buffered(1))
            return pl.BlockSpec(shape, index_map)

        return pl.pallas_call(
            functools.partial(_char_rnn_kernel, hidden=H, tt_chunk=TT),
            out_shape=out_shape,
            grid_spec=pltpu.PrefetchScalarGridSpec(
                num_scalar_prefetch=0,
                grid=(Bp // bt, T // TT),
                in_specs=[
                    pl.BlockSpec((TT, bt, Vp), x_map),        # x chunk (streamed)
                    rspec((L, bt, H), state_map),             # h0
                    rspec((L, bt, H), state_map),             # c0
                    rspec((Vp, 4 * H), weight_map),           # wih0
                    rspec((H, 4 * H), weight_map),            # whh0
                    rspec((1, 4 * H), weight_map),            # b0
                    rspec((H, 4 * H), weight_map),            # wih1
                    rspec((H, 4 * H), weight_map),            # whh1
                    rspec((1, 4 * H), weight_map),            # b1
                    rspec((H, Vp), weight_map),               # fc_w
                    rspec((1, Vp), weight_map),               # fc_b
                ],
                out_specs=[
                    pl.BlockSpec((TT, bt, Vp), x_map),        # logits chunk
                    pl.BlockSpec((L, bt, H), state_map),      # final h (resident)
                    pl.BlockSpec((L, bt, H), state_map),      # final c (resident)
                ],
                scratch_shapes=[
                    pltpu.VMEM((L, bt, H), jnp.float32),
                    pltpu.VMEM((L, bt, H), jnp.float32),
                ],
            ),
            compiler_params=pltpu.CompilerParams(
                dimension_semantics=("parallel", "arbitrary"),
                vmem_limit_bytes=vmem_bytes,
            ),
        )

    args = (x_tbv, h0, c0, wih0, whh0, b0, wih1, whh1, b1, fcw, fcb)
    try:
        out = build(True)(*args)
        jax.block_until_ready(out)
        return out
    except Exception:
        # pipeline_mode=pl.Buffered(1) not supported on this jax build/backend;
        # fall back to default double-buffering (identical numerics).
        return build(False)(*args)


# ----------------------------------------------------------------------------
# CharRNN forward (eval mode): pad lanes/sublanes -> fused LSTM+FC kernel.
# ----------------------------------------------------------------------------
def char_rnn_forward(x, hidden, params, n_hidden):
    """x: (B, T, V) one-hot float input; hidden = (h0, c0), each (L, B, H).
    Returns (logits (B*T, V), (hN, cN)) with eval-mode (identity) dropout."""
    h0, c0 = hidden
    B, T, V = x.shape
    H = n_hidden

    Vp = _round_up(V, 128)     # lane-dense logits / fc / one-hot input
    Bp = _round_up(B, 8)       # full sublane occupancy

    x_p = jnp.pad(x, ((0, Bp - B), (0, 0), (0, Vp - V)))
    x_tbv = jnp.transpose(x_p, (1, 0, 2))                         # (T, Bp, Vp)
    h0_p = jnp.pad(h0, ((0, 0), (0, Bp - B), (0, 0)))
    c0_p = jnp.pad(c0, ((0, 0), (0, Bp - B), (0, 0)))

    wih0 = jnp.pad(params["wih0"], ((0, Vp - V), (0, 0)))         # zero rows
    fcw = jnp.pad(params["fc_w"], ((0, 0), (0, Vp - V)))          # zero cols
    fcb = jnp.pad(params["fc_b"], ((0, 0), (0, Vp - V)))

    logits_p, hN_p, cN_p = lstm_fc_forward(
        x_tbv, h0_p, c0_p,
        wih0, params["whh0"], params["b0"],
        params["wih1"], params["whh1"], params["b1"],
        fcw, fcb)

    # dropout is identity in eval mode; fc is already fused into the kernel.
    # Slice the pads off first so the (T,B) swap only touches the real logits.
    logits = jnp.transpose(logits_p[:, :B, :V], (1, 0, 2)).reshape(B * T, V)
    hN = hN_p[:, :B, :]
    cN = cN_p[:, :B, :]
    return logits, (hN, cN)


def init_params(key, vocab, n_hidden):
    H, V = n_hidden, vocab
    ks = jax.random.split(key, 10)
    s = 1.0 / jnp.sqrt(H)
    u = lambda k, shape: jax.random.uniform(k, shape, jnp.float32, -s, s)
    return {
        # stored pre-transposed to (in_dim, 4H); PyTorch gate order i,f,g,o.
        "wih0": u(ks[0], (V, 4 * H)),
        "whh0": u(ks[1], (H, 4 * H)),
        "b0":   u(ks[2], (1, 4 * H)) + u(ks[3], (1, 4 * H)),     # b_ih0 + b_hh0
        "wih1": u(ks[4], (H, 4 * H)),
        "whh1": u(ks[5], (H, 4 * H)),
        "b1":   u(ks[6], (1, 4 * H)) + u(ks[7], (1, 4 * H)),     # b_ih1 + b_hh1
        "fc_w": u(ks[8], (H, V)),
        "fc_b": u(ks[9], (1, V)),
    }


# Pure-JAX reference (eval-mode 2-layer LSTM + Linear) for correctness check.
def _reference_forward(x, h0, c0, params, n_hidden):
    H = n_hidden
    wih0, whh0, b0 = params["wih0"], params["whh0"], params["b0"]
    wih1, whh1, b1 = params["wih1"], params["whh1"], params["b1"]

    def cell(inp, h, c, wih, whh, b):
        g = inp @ wih + h @ whh + b
        i = jax.nn.sigmoid(g[:, :H])
        f = jax.nn.sigmoid(g[:, H:2 * H])
        gg = jnp.tanh(g[:, 2 * H:3 * H])
        o = jax.nn.sigmoid(g[:, 3 * H:])
        c = f * c + i * gg
        return o * jnp.tanh(c), c

    def step(carry, x_t):
        h0_, c0_, h1_, c1_ = carry
        h0n, c0n = cell(x_t, h0_, c0_, wih0, whh0, b0)
        h1n, c1n = cell(h0n, h1_, c1_, wih1, whh1, b1)
        return (h0n, c0n, h1n, c1n), h1n

    carry, hs = jax.lax.scan(step, (h0[0], c0[0], h0[1], c0[1]),
                             jnp.transpose(x, (1, 0, 2)))
    out = jnp.transpose(hs, (1, 0, 2)).reshape(-1, H)
    logits = out @ params["fc_w"] + params["fc_b"]
    hN = jnp.stack([carry[0], carry[2]])
    cN = jnp.stack([carry[1], carry[3]])
    return logits, hN, cN


if __name__ == "__main__":
    B, T, H, V, L = 2, 8, 32, 16, 2  # batch, seq, n_hidden, vocab, n_layers

    key = jax.random.PRNGKey(0)
    k_x, k_p = jax.random.split(key)

    # one-hot character inputs (B, T, V), like the PyTorch module expects
    ids = jax.random.randint(k_x, (B, T), 0, V)
    x = jax.nn.one_hot(ids, V, dtype=jnp.float32)

    # init_hidden(batch_size): zeros of shape (n_layers, B, H)
    h0 = jnp.zeros((L, B, H), jnp.float32)
    c0 = jnp.zeros((L, B, H), jnp.float32)

    params = init_params(k_p, V, H)

    logits, (hN, cN) = char_rnn_forward(x, (h0, c0), params, H)
    jax.block_until_ready((logits, hN, cN))

    assert logits.shape == (B * T, V)
    assert hN.shape == (L, B, H) and cN.shape == (L, B, H)

    # numerical parity with the pure-JAX reference
    ref_logits, ref_hN, ref_cN = _reference_forward(x, h0, c0, params, H)
    assert jnp.allclose(logits, ref_logits, atol=1e-4, rtol=1e-4)
    assert jnp.allclose(hN, ref_hN, atol=1e-4, rtol=1e-4)
    assert jnp.allclose(cN, ref_cN, atol=1e-4, rtol=1e-4)

    print("KERNEL_OK")
</pallas_src>

<mosaic_0001>
module attributes {stable_mosaic.version = 11 : i64} {
  func.func @_char_rnn_kernel(%arg0: i32, %arg1: i32, %arg2: memref<8x8x128xf32, #tpu.memory_space<vmem>>, %arg3: memref<2x8x32xf32, #tpu.memory_space<vmem>>, %arg4: memref<2x8x32xf32, #tpu.memory_space<vmem>>, %arg5: memref<128x128xf32, #tpu.memory_space<vmem>>, %arg6: memref<32x128xf32, #tpu.memory_space<vmem>>, %arg7: memref<1x128xf32, #tpu.memory_space<vmem>>, %arg8: memref<32x128xf32, #tpu.memory_space<vmem>>, %arg9: memref<32x128xf32, #tpu.memory_space<vmem>>, %arg10: memref<1x128xf32, #tpu.memory_space<vmem>>, %arg11: memref<32x128xf32, #tpu.memory_space<vmem>>, %arg12: memref<1x128xf32, #tpu.memory_space<vmem>>, %arg13: memref<8x8x128xf32, #tpu.memory_space<vmem>>, %arg14: memref<2x8x32xf32, #tpu.memory_space<vmem>>, %arg15: memref<2x8x32xf32, #tpu.memory_space<vmem>>, %arg16: memref<2x8x32xf32, #tpu.memory_space<vmem>>, %arg17: memref<2x8x32xf32, #tpu.memory_space<vmem>>) attributes {dimension_semantics = [#tpu.dimension_semantics<parallel>, #tpu.dimension_semantics<arbitrary>], iteration_bounds = array<i64: 1, 1>, scalar_prefetch = 0 : i64, scratch_operands = 2 : i64, tpu.core_type = #tpu.core_type<tc>, window_params = [{transform_indices = @transform_0, window_bounds = array<i64: 8, 8, 128>}, {pipeline_mode = #tpu.pipeline_mode<synchronous>, transform_indices = @transform_1, window_bounds = array<i64: 2, 8, 32>}, {pipeline_mode = #tpu.pipeline_mode<synchronous>, transform_indices = @transform_2, window_bounds = array<i64: 2, 8, 32>}, {pipeline_mode = #tpu.pipeline_mode<synchronous>, transform_indices = @transform_3, window_bounds = array<i64: 128, 128>}, {pipeline_mode = #tpu.pipeline_mode<synchronous>, transform_indices = @transform_4, window_bounds = array<i64: 32, 128>}, {pipeline_mode = #tpu.pipeline_mode<synchronous>, transform_indices = @transform_5, window_bounds = array<i64: 1, 128>}, {pipeline_mode = #tpu.pipeline_mode<synchronous>, transform_indices = @transform_6, window_bounds = array<i64: 32, 128>}, {pipeline_mode = #tpu.pipeline_mode<synchronous>, transform_indices = @transform_7, window_bounds = array<i64: 32, 128>}, {pipeline_mode = #tpu.pipeline_mode<synchronous>, transform_indices = @transform_8, window_bounds = array<i64: 1, 128>}, {pipeline_mode = #tpu.pipeline_mode<synchronous>, transform_indices = @transform_9, window_bounds = array<i64: 32, 128>}, {pipeline_mode = #tpu.pipeline_mode<synchronous>, transform_indices = @transform_10, window_bounds = array<i64: 1, 128>}, {transform_indices = @transform_11, window_bounds = array<i64: 8, 8, 128>}, {transform_indices = @transform_12, window_bounds = array<i64: 2, 8, 32>}, {transform_indices = @transform_13, window_bounds = array<i64: 2, 8, 32>}]} {
    %c0_i32 = arith.constant 0 : i32
    %0 = arith.cmpi eq, %arg1, %c0_i32 : i32
    %1 = arith.extui %0 : i1 to i32
    %c0_i32_0 = arith.constant 0 : i32
    %2 = arith.cmpi ne, %1, %c0_i32_0 : i32
    scf.if %2 {
      %c0_142 = arith.constant 0 : index
      %c0_143 = arith.constant 0 : index
      %c0_144 = arith.constant 0 : index
      %547 = vector.load %arg3[%c0_142, %c0_143, %c0_144] : memref<2x8x32xf32, #tpu.memory_space<vmem>>, vector<2x8x32xf32>
      %c0_145 = arith.constant 0 : index
      %c0_146 = arith.constant 0 : index
      %c0_147 = arith.constant 0 : index
      %548 = vector.load %arg16[%c0_145, %c0_146, %c0_147] : memref<2x8x32xf32, #tpu.memory_space<vmem>>, vector<2x8x32xf32>
      tpu.vector_store %arg16[%c0_145, %c0_146, %c0_147], %547 {strides = array<i32>} : memref<2x8x32xf32, #tpu.memory_space<vmem>>, vector<2x8x32xf32>,
      %c0_148 = arith.constant 0 : index
      %c0_149 = arith.constant 0 : index
      %c0_150 = arith.constant 0 : index
      %549 = vector.load %arg4[%c0_148, %c0_149, %c0_150] : memref<2x8x32xf32, #tpu.memory_space<vmem>>, vector<2x8x32xf32>
      %c0_151 = arith.constant 0 : index
      %c0_152 = arith.constant 0 : index
      %c0_153 = arith.constant 0 : index
      %550 = vector.load %arg17[%c0_151, %c0_152, %c0_153] : memref<2x8x32xf32, #tpu.memory_space<vmem>>, vector<2x8x32xf32>
      tpu.vector_store %arg17[%c0_151, %c0_152, %c0_153], %549 {strides = array<i32>} : memref<2x8x32xf32, #tpu.memory_space<vmem>>, vector<2x8x32xf32>,
    } else {
    }
    %c0 = arith.constant 0 : index
    %c0_1 = arith.constant 0 : index
    %3 = vector.load %arg6[%c0, %c0_1] : memref<32x128xf32, #tpu.memory_space<vmem>>, vector<32x128xf32>
    %c0_2 = arith.constant 0 : index
    %c0_3 = arith.constant 0 : index
    %4 = vector.load %arg8[%c0_2, %c0_3] : memref<32x128xf32, #tpu.memory_space<vmem>>, vector<32x128xf32>
    %c0_4 = arith.constant 0 : index
    %c0_5 = arith.constant 0 : index
    %5 = vector.load %arg9[%c0_4, %c0_5] : memref<32x128xf32, #tpu.memory_space<vmem>>, vector<32x128xf32>
    %c0_6 = arith.constant 0 : index
    %c0_7 = arith.constant 0 : index
    %6 = vector.load %arg11[%c0_6, %c0_7] : memref<32x128xf32, #tpu.memory_space<vmem>>, vector<32x128xf32>
    %c0_8 = arith.constant 0 : index
    %c0_9 = arith.constant 0 : index
    %7 = vector.load %arg7[%c0_8, %c0_9] : memref<1x128xf32, #tpu.memory_space<vmem>>, vector<1x128xf32>
    %8 = vector.shape_cast %7 : vector<1x128xf32> to vector<1x128xf32>
    %9 = vector.broadcast %8 : vector<1x128xf32> to vector<8x128xf32>
    %c0_10 = arith.constant 0 : index
    %c0_11 = arith.constant 0 : index
    %10 = vector.load %arg10[%c0_10, %c0_11] : memref<1x128xf32, #tpu.memory_space<vmem>>, vector<1x128xf32>
    %11 = vector.shape_cast %10 : vector<1x128xf32> to vector<1x128xf32>
    %12 = vector.broadcast %11 : vector<1x128xf32> to vector<8x128xf32>
    %c0_12 = arith.constant 0 : index
    %c0_13 = arith.constant 0 : index
    %13 = vector.load %arg12[%c0_12, %c0_13] : memref<1x128xf32, #tpu.memory_space<vmem>>, vector<1x128xf32>
    %14 = vector.shape_cast %13 : vector<1x128xf32> to vector<1x128xf32>
    %15 = vector.broadcast %14 : vector<1x128xf32> to vector<8x128xf32>
    %c0_14 = arith.constant 0 : index
    %c0_15 = arith.constant 0 : index
    %c0_16 = arith.constant 0 : index
    %16 = vector.load %arg2[%c0_14, %c0_15, %c0_16] : memref<8x8x128xf32, #tpu.memory_space<vmem>>, vector<8x8x128xf32>
    %17 = vector.shape_cast %16 : vector<8x8x128xf32> to vector<64x128xf32>
    %c0_17 = arith.constant 0 : index
    %c0_18 = arith.constant 0 : index
    %18 = vector.load %arg5[%c0_17, %c0_18] : memref<128x128xf32, #tpu.memory_space<vmem>>, vector<128x128xf32>
    %cst = arith.constant dense<0.000000e+00> : vector<64x128xf32>
    %19 = tpu.matmul %17, %18, %cst {dimension_numbers = #tpu.dot_dimension_numbers<[1], [0], [0], [1], [0, 0, 1, 1], [], []>} : vector<64x128xf32>, vector<128x128xf32>, vector<64x128xf32> -> vector<64x128xf32>
    %c0_19 = arith.constant 0 : index
    %c0_20 = arith.constant 0 : index
    %c0_21 = arith.constant 0 : index
    %20 = vector.load %arg16[%c0_19, %c0_20, %c0_21] : memref<2x8x32xf32, #tpu.memory_space<vmem>>, vector<1x8x32xf32>
    %21 = vector.shape_cast %20 : vector<1x8x32xf32> to vector<8x32xf32>
    %c0_22 = arith.constant 0 : index
    %c0_23 = arith.constant 0 : index
    %c0_24 = arith.constant 0 : index
    %22 = vector.load %arg17[%c0_22, %c0_23, %c0_24] : memref<2x8x32xf32, #tpu.memory_space<vmem>>, vector<1x8x32xf32>
    %23 = vector.shape_cast %22 : vector<1x8x32xf32> to vector<8x32xf32>
    %c1 = arith.constant 1 : index
    %c0_25 = arith.constant 0 : index
    %c0_26 = arith.constant 0 : index
    %24 = vector.load %arg16[%c1, %c0_25, %c0_26] : memref<2x8x32xf32, #tpu.memory_space<vmem>>, vector<1x8x32xf32>
    %25 = vector.shape_cast %24 : vector<1x8x32xf32> to vector<8x32xf32>
    %c1_27 = arith.constant 1 : index
    %c0_28 = arith.constant 0 : index
    %c0_29 = arith.constant 0 : index
    %26 = vector.load %arg17[%c1_27, %c0_28, %c0_29] : memref<2x8x32xf32, #tpu.memory_space<vmem>>, vector<1x8x32xf32>
    %27 = vector.shape_cast %26 : vector<1x8x32xf32> to vector<8x32xf32>
    %28 = vector.extract_strided_slice %19 {offsets = [0, 0], sizes = [8, 128], strides = [1, 1]} : vector<64x128xf32> to vector<8x128xf32>
    %29 = arith.addf %28, %9 : vector<8x128xf32>
    %cst_30 = arith.constant dense<0.000000e+00> : vector<8x128xf32>
    %30 = tpu.matmul %21, %3, %cst_30 {dimension_numbers = #tpu.dot_dimension_numbers<[1], [0], [0], [1], [0, 0, 1, 1], [], []>} : vector<8x32xf32>, vector<32x128xf32>, vector<8x128xf32> -> vector<8x128xf32>
    %31 = arith.addf %29, %30 : vector<8x128xf32>
    %32 = vector.extract_strided_slice %31 {offsets = [0, 0], sizes = [8, 32], strides = [1, 1]} : vector<8x128xf32> to vector<8x32xf32>
    %33 = arith.negf %32 : vector<8x32xf32>
    %34 = math.exp %33 : vector<8x32xf32>
    %cst_31 = arith.constant 1.000000e+00 : f32
    %35 = vector.broadcast %cst_31 : f32 to vector<8x32xf32>
    %36 = arith.addf %35, %34 : vector<8x32xf32>
    %37 = arith.divf %35, %36 : vector<8x32xf32>
    %38 = vector.extract_strided_slice %31 {offsets = [0, 32], sizes = [8, 32], strides = [1, 1]} : vector<8x128xf32> to vector<8x32xf32>
    %39 = arith.negf %38 : vector<8x32xf32>
    %40 = math.exp %39 : vector<8x32xf32>
    %cst_32 = arith.constant 1.000000e+00 : f32
    %41 = vector.broadcast %cst_32 : f32 to vector<8x32xf32>
    %42 = arith.addf %41, %40 : vector<8x32xf32>
    %43 = arith.divf %41, %42 : vector<8x32xf32>
    %44 = vector.extract_strided_slice %31 {offsets = [0, 64], sizes = [8, 32], strides = [1, 1]} : vector<8x128xf32> to vector<8x32xf32>
    %45 = math.tanh %44 : vector<8x32xf32>
    %46 = vector.extract_strided_slice %31 {offsets = [0, 96], sizes = [8, 32], strides = [1, 1]} : vector<8x128xf32> to vector<8x32xf32>
    %47 = arith.negf %46 : vector<8x32xf32>
    %48 = math.exp %47 : vector<8x32xf32>
    %cst_33 = arith.constant 1.000000e+00 : f32
    %49 = vector.broadcast %cst_33 : f32 to vector<8x32xf32>
    %50 = arith.addf %49, %48 : vector<8x32xf32>
    %51 = arith.divf %49, %50 : vector<8x32xf32>
    %52 = arith.mulf %43, %23 : vector<8x32xf32>
    %53 = arith.mulf %37, %45 : vector<8x32xf32>
    %54 = arith.addf %52, %53 : vector<8x32xf32>
    %55 = math.tanh %54 : vector<8x32xf32>
    %56 = arith.mulf %51, %55 : vector<8x32xf32>
    %cst_34 = arith.constant dense<0.000000e+00> : vector<8x128xf32>
    %57 = tpu.matmul %56, %4, %cst_34 {dimension_numbers = #tpu.dot_dimension_numbers<[1], [0], [0], [1], [0, 0, 1, 1], [], []>} : vector<8x32xf32>, vector<32x128xf32>, vector<8x128xf32> -> vector<8x128xf32>
    %cst_35 = arith.constant dense<0.000000e+00> : vector<8x128xf32>
    %58 = tpu.matmul %25, %5, %cst_35 {dimension_numbers = #tpu.dot_dimension_numbers<[1], [0], [0], [1], [0, 0, 1, 1], [], []>} : vector<8x32xf32>, vector<32x128xf32>, vector<8x128xf32> -> vector<8x128xf32>
    %59 = arith.addf %57, %58 : vector<8x128xf32>
    %60 = arith.addf %59, %12 : vector<8x128xf32>
    %61 = vector.extract_strided_slice %60 {offsets = [0, 0], sizes = [8, 32], strides = [1, 1]} : vector<8x128xf32> to vector<8x32xf32>
    %62 = arith.negf %61 : vector<8x32xf32>
    %63 = math.exp %62 : vector<8x32xf32>
    %cst_36 = arith.constant 1.000000e+00 : f32
    %64 = vector.broadcast %cst_36 : f32 to vector<8x32xf32>
    %65 = arith.addf %64, %63 : vector<8x32xf32>
    %66 = arith.divf %64, %65 : vector<8x32xf32>
    %67 = vector.extract_strided_slice %60 {offsets = [0, 32], sizes = [8, 32], strides = [1, 1]} : vector<8x128xf32> to vector<8x32xf32>
    %68 = arith.negf %67 : vector<8x32xf32>
    %69 = math.exp %68 : vector<8x32xf32>
    %cst_37 = arith.constant 1.000000e+00 : f32
    %70 = vector.broadcast %cst_37 : f32 to vector<8x32xf32>
    %71 = arith.addf %70, %69 : vector<8x32xf32>
    %72 = arith.divf %70, %71 : vector<8x32xf32>
    %73 = vector.extract_strided_slice %60 {offsets = [0, 64], sizes = [8, 32], strides = [1, 1]} : vector<8x128xf32> to vector<8x32xf32>
    %74 = math.tanh %73 : vector<8x32xf32>
    %75 = vector.extract_strided_slice %60 {offsets = [0, 96], sizes = [8, 32], strides = [1, 1]} : vector<8x128xf32> to vector<8x32xf32>
    %76 = arith.negf %75 : vector<8x32xf32>
    %77 = math.exp %76 : vector<8x32xf32>
    %cst_38 = arith.constant 1.000000e+00 : f32
    %78 = vector.broadcast %cst_38 : f32 to vector<8x32xf32>
    %79 = arith.addf %78, %77 : vector<8x32xf32>
    %80 = arith.divf %78, %79 : vector<8x32xf32>
    %81 = arith.mulf %72, %27 : vector<8x32xf32>
    %82 = arith.mulf %66, %74 : vector<8x32xf32>
    %83 = arith.addf %81, %82 : vector<8x32xf32>
    %84 = math.tanh %83 : vector<8x32xf32>
    %85 = arith.mulf %80, %84 : vector<8x32xf32>
    %cst_39 = arith.constant dense<0.000000e+00> : vector<8x128xf32>
    %86 = tpu.matmul %85, %6, %cst_39 {dimension_numbers = #tpu.dot_dimension_numbers<[1], [0], [0], [1], [0, 0, 1, 1], [], []>} : vector<8x32xf32>, vector<32x128xf32>, vector<8x128xf32> -> vector<8x128xf32>
    %87 = arith.addf %86, %15 : vector<8x128xf32>
    %c0_40 = arith.constant 0 : index
    %c0_41 = arith.constant 0 : index
    %c0_42 = arith.constant 0 : index
    %88 = vector.load %arg13[%c0_40, %c0_41, %c0_42] : memref<8x8x128xf32, #tpu.memory_space<vmem>>, vector<1x8x128xf32>
    %89 = vector.shape_cast %88 : vector<1x8x128xf32> to vector<8x128xf32>
    %90 = vector.shape_cast %87 : vector<8x128xf32> to vector<1x8x128xf32>
    tpu.vector_store %arg13[%c0_40, %c0_41, %c0_42], %90 {strides = array<i32>} : memref<8x8x128xf32, #tpu.memory_space<vmem>>, vector<1x8x128xf32>,
    %91 = vector.extract_strided_slice %19 {offsets = [8, 0], sizes = [8, 128], strides = [1, 1]} : vector<64x128xf32> to vector<8x128xf32>
    %92 = arith.addf %91, %9 : vector<8x128xf32>
    %cst_43 = arith.constant dense<0.000000e+00> : vector<8x128xf32>
    %93 = tpu.matmul %56, %3, %cst_43 {dimension_numbers = #tpu.dot_dimension_numbers<[1], [0], [0], [1], [0, 0, 1, 1], [], []>} : vector<8x32xf32>, vector<32x128xf32>, vector<8x128xf32> -> vector<8x128xf32>
    %94 = arith.addf %92, %93 : vector<8x128xf32>
    %95 = vector.extract_strided_slice %94 {offsets = [0, 0], sizes = [8, 32], strides = [1, 1]} : vector<8x128xf32> to vector<8x32xf32>
    %96 = arith.negf %95 : vector<8x32xf32>
    %97 = math.exp %96 : vector<8x32xf32>
    %cst_44 = arith.constant 1.000000e+00 : f32
    %98 = vector.broadcast %cst_44 : f32 to vector<8x32xf32>
    %99 = arith.addf %98, %97 : vector<8x32xf32>
    %100 = arith.divf %98, %99 : vector<8x32xf32>
    %101 = vector.extract_strided_slice %94 {offsets = [0, 32], sizes = [8, 32], strides = [1, 1]} : vector<8x128xf32> to vector<8x32xf32>
    %102 = arith.negf %101 : vector<8x32xf32>
    %103 = math.exp %102 : vector<8x32xf32>
    %cst_45 = arith.constant 1.000000e+00 : f32
    %104 = vector.broadcast %cst_45 : f32 to vector<8x32xf32>
    %105 = arith.addf %104, %103 : vector<8x32xf32>
    %106 = arith.divf %104, %105 : vector<8x32xf32>
    %107 = vector.extract_strided_slice %94 {offsets = [0, 64], sizes = [8, 32], strides = [1, 1]} : vector<8x128xf32> to vector<8x32xf32>
    %108 = math.tanh %107 : vector<8x32xf32>
    %109 = vector.extract_strided_slice %94 {offsets = [0, 96], sizes = [8, 32], strides = [1, 1]} : vector<8x128xf32> to vector<8x32xf32>
    %110 = arith.negf %109 : vector<8x32xf32>
    %111 = math.exp %110 : vector<8x32xf32>
    %cst_46 = arith.constant 1.000000e+00 : f32
    %112 = vector.broadcast %cst_46 : f32 to vector<8x32xf32>
    %113 = arith.addf %112, %111 : vector<8x32xf32>
    %114 = arith.divf %112, %113 : vector<8x32xf32>
    %115 = arith.mulf %106, %54 : vector<8x32xf32>
    %116 = arith.mulf %100, %108 : vector<8x32xf32>
    %117 = arith.addf %115, %116 : vector<8x32xf32>
    %118 = math.tanh %117 : vector<8x32xf32>
    %119 = arith.mulf %114, %118 : vector<8x32xf32>
    %cst_47 = arith.constant dense<0.000000e+00> : vector<8x128xf32>
    %120 = tpu.matmul %119, %4, %cst_47 {dimension_numbers = #tpu.dot_dimension_numbers<[1], [0], [0], [1], [0, 0, 1, 1], [], []>} : vector<8x32xf32>, vector<32x128xf32>, vector<8x128xf32> -> vector<8x128xf32>
    %cst_48 = arith.constant dense<0.000000e+00> : vector<8x128xf32>
    %121 = tpu.matmul %85, %5, %cst_48 {dimension_numbers = #tpu.dot_dimension_numbers<[1], [0], [0], [1], [0, 0, 1, 1], [], []>} : vector<8x32xf32>, vector<32x128xf32>, vector<8x128xf32> -> vector<8x128xf32>
    %122 = arith.addf %120, %121 : vector<8x128xf32>
    %123 = arith.addf %122, %12 : vector<8x128xf32>
    %124 = vector.extract_strided_slice %123 {offsets = [0, 0], sizes = [8, 32], strides = [1, 1]} : vector<8x128xf32> to vector<8x32xf32>
    %125 = arith.negf %124 : vector<8x32xf32>
    %126 = math.exp %125 : vector<8x32xf32>
    %cst_49 = arith.constant 1.000000e+00 : f32
    %127 = vector.broadcast %cst_49 : f32 to vector<8x32xf32>
    %128 = arith.addf %127, %126 : vector<8x32xf32>
    %129 = arith.divf %127, %128 : vector<8x32xf32>
    %130 = vector.extract_strided_slice %123 {offsets = [0, 32], sizes = [8, 32], strides = [1, 1]} : vector<8x128xf32> to vector<8x32xf32>
    %131 = arith.negf %130 : vector<8x32xf32>
    %132 = math.exp %131 : vector<8x32xf32>
    %cst_50 = arith.constant 1.000000e+00 : f32
    %133 = vector.broadcast %cst_50 : f32 to vector<8x32xf32>
    %134 = arith.addf %133, %132 : vector<8x32xf32>
    %135 = arith.divf %133, %134 : vector<8x32xf32>
    %136 = vector.extract_strided_slice %123 {offsets = [0, 64], sizes = [8, 32], strides = [1, 1]} : vector<8x128xf32> to vector<8x32xf32>
    %137 = math.tanh %136 : vector<8x32xf32>
    %138 = vector.extract_strided_slice %123 {offsets = [0, 96], sizes = [8, 32], strides = [1, 1]} : vector<8x128xf32> to vector<8x32xf32>
    %139 = arith.negf %138 : vector<8x32xf32>
    %140 = math.exp %139 : vector<8x32xf32>
    %cst_51 = arith.constant 1.000000e+00 : f32
    %141 = vector.broadcast %cst_51 : f32 to vector<8x32xf32>
    %142 = arith.addf %141, %140 : vector<8x32xf32>
    %143 = arith.divf %141, %142 : vector<8x32xf32>
    %144 = arith.mulf %135, %83 : vector<8x32xf32>
    %145 = arith.mulf %129, %137 : vector<8x32xf32>
    %146 = arith.addf %144, %145 : vector<8x32xf32>
    %147 = math.tanh %146 : vector<8x32xf32>
    %148 = arith.mulf %143, %147 : vector<8x32xf32>
    %cst_52 = arith.constant dense<0.000000e+00> : vector<8x128xf32>
    %149 = tpu.matmul %148, %6, %cst_52 {dimension_numbers = #tpu.dot_dimension_numbers<[1], [0], [0], [1], [0, 0, 1, 1], [], []>} : vector<8x32xf32>, vector<32x128xf32>, vector<8x128xf32> -> vector<8x128xf32>
    %150 = arith.addf %149, %15 : vector<8x128xf32>
    %c1_53 = arith.constant 1 : index
    %c0_54 = arith.constant 0 : index
    %c0_55 = arith.constant 0 : index
    %151 = vector.load %arg13[%c1_53, %c0_54, %c0_55] : memref<8x8x128xf32, #tpu.memory_space<vmem>>, vector<1x8x128xf32>
    %152 = vector.shape_cast %151 : vector<1x8x128xf32> to vector<8x128xf32>
    %153 = vector.shape_cast %150 : vector<8x128xf32> to vector<1x8x128xf32>
    tpu.vector_store %arg13[%c1_53, %c0_54, %c0_55], %153 {strides = array<i32>} : memref<8x8x128xf32, #tpu.memory_space<vmem>>, vector<1x8x128xf32>,
    %154 = vector.extract_strided_slice %19 {offsets = [16, 0], sizes = [8, 128], strides = [1, 1]} : vector<64x128xf32> to vector<8x128xf32>
    %155 = arith.addf %154, %9 : vector<8x128xf32>
    %cst_56 = arith.constant dense<0.000000e+00> : vector<8x128xf32>
    %156 = tpu.matmul %119, %3, %cst_56 {dimension_numbers = #tpu.dot_dimension_numbers<[1], [0], [0], [1], [0, 0, 1, 1], [], []>} : vector<8x32xf32>, vector<32x128xf32>, vector<8x128xf32> -> vector<8x128xf32>
    %157 = arith.addf %155, %156 : vector<8x128xf32>
    %158 = vector.extract_strided_slice %157 {offsets = [0, 0], sizes = [8, 32], strides = [1, 1]} : vector<8x128xf32> to vector<8x32xf32>
    %159 = arith.negf %158 : vector<8x32xf32>
    %160 = math.exp %159 : vector<8x32xf32>
    %cst_57 = arith.constant 1.000000e+00 : f32
    %161 = vector.broadcast %cst_57 : f32 to vector<8x32xf32>
    %162 = arith.addf %161, %160 : vector<8x32xf32>
    %163 = arith.divf %161, %162 : vector<8x32xf32>
    %164 = vector.extract_strided_slice %157 {offsets = [0, 32], sizes = [8, 32], strides = [1, 1]} : vector<8x128xf32> to vector<8x32xf32>
    %165 = arith.negf %164 : vector<8x32xf32>
    %166 = math.exp %165 : vector<8x32xf32>
    %cst_58 = arith.constant 1.000000e+00 : f32
    %167 = vector.broadcast %cst_58 : f32 to vector<8x32xf32>
    %168 = arith.addf %167, %166 : vector<8x32xf32>
    %169 = arith.divf %167, %168 : vector<8x32xf32>
    %170 = vector.extract_strided_slice %157 {offsets = [0, 64], sizes = [8, 32], strides = [1, 1]} : vector<8x128xf32> to vector<8x32xf32>
    %171 = math.tanh %170 : vector<8x32xf32>
    %172 = vector.extract_strided_slice %157 {offsets = [0, 96], sizes = [8, 32], strides = [1, 1]} : vector<8x128xf32> to vector<8x32xf32>
    %173 = arith.negf %172 : vector<8x32xf32>
    %174 = math.exp %173 : vector<8x32xf32>
    %cst_59 = arith.constant 1.000000e+00 : f32
    %175 = vector.broadcast %cst_59 : f32 to vector<8x32xf32>
    %176 = arith.addf %175, %174 : vector<8x32xf32>
    %177 = arith.divf %175, %176 : vector<8x32xf32>
    %178 = arith.mulf %169, %117 : vector<8x32xf32>
    %179 = arith.mulf %163, %171 : vector<8x32xf32>
    %180 = arith.addf %178, %179 : vector<8x32xf32>
    %181 = math.tanh %180 : vector<8x32xf32>
    %182 = arith.mulf %177, %181 : vector<8x32xf32>
    %cst_60 = arith.constant dense<0.000000e+00> : vector<8x128xf32>
    %183 = tpu.matmul %182, %4, %cst_60 {dimension_numbers = #tpu.dot_dimension_numbers<[1], [0], [0], [1], [0, 0, 1, 1], [], []>} : vector<8x32xf32>, vector<32x128xf32>, vector<8x128xf32> -> vector<8x128xf32>
    %cst_61 = arith.constant dense<0.000000e+00> : vector<8x128xf32>
    %184 = tpu.matmul %148, %5, %cst_61 {dimension_numbers = #tpu.dot_dimension_numbers<[1], [0], [0], [1], [0, 0, 1, 1], [], []>} : vector<8x32xf32>, vector<32x128xf32>, vector<8x128xf32> -> vector<8x128xf32>
    %185 = arith.addf %183, %184 : vector<8x128xf32>
    %186 = arith.addf %185, %12 : vector<8x128xf32>
    %187 = vector.extract_strided_slice %186 {offsets = [0, 0], sizes = [8, 32], strides = [1, 1]} : vector<8x128xf32> to vector<8x32xf32>
    %188 = arith.negf %187 : vector<8x32xf32>
    %189 = math.exp %188 : vector<8x32xf32>
    %cst_62 = arith.constant 1.000000e+00 : f32
    %190 = vector.broadcast %cst_62 : f32 to vector<8x32xf32>
    %191 = arith.addf %190, %189 : vector<8x32xf32>
    %192 = arith.divf %190, %191 : vector<8x32xf32>
    %193 = vector.extract_strided_slice %186 {offsets = [0, 32], sizes = [8, 32], strides = [1, 1]} : vector<8x128xf32> to vector<8x32xf32>
    %194 = arith.negf %193 : vector<8x32xf32>
    %195 = math.exp %194 : vector<8x32xf32>
    %cst_63 = arith.constant 1.000000e+00 : f32
    %196 = vector.broadcast %cst_63 : f32 to vector<8x32xf32>
    %197 = arith.addf %196, %195 : vector<8x32xf32>
    %198 = arith.divf %196, %197 : vector<8x32xf32>
    %199 = vector.extract_strided_slice %186 {offsets = [0, 64], sizes = [8, 32], strides = [1, 1]} : vector<8x128xf32> to vector<8x32xf32>
    %200 = math.tanh %199 : vector<8x32xf32>
    %201 = vector.extract_strided_slice %186 {offsets = [0, 96], sizes = [8, 32], strides = [1, 1]} : vector<8x128xf32> to vector<8x32xf32>
    %202 = arith.negf %201 : vector<8x32xf32>
    %203 = math.exp %202 : vector<8x32xf32>
    %cst_64 = arith.constant 1.000000e+00 : f32
    %204 = vector.broadcast %cst_64 : f32 to vector<8x32xf32>
    %205 = arith.addf %204, %203 : vector<8x32xf32>
    %206 = arith.divf %204, %205 : vector<8x32xf32>
    %207 = arith.mulf %198, %146 : vector<8x32xf32>
    %208 = arith.mulf %192, %200 : vector<8x32xf32>
    %209 = arith.addf %207, %208 : vector<8x32xf32>
    %210 = math.tanh %209 : vector<8x32xf32>
    %211 = arith.mulf %206, %210 : vector<8x32xf32>
    %cst_65 = arith.constant dense<0.000000e+00> : vector<8x128xf32>
    %212 = tpu.matmul %211, %6, %cst_65 {dimension_numbers = #tpu.dot_dimension_numbers<[1], [0], [0], [1], [0, 0, 1, 1], [], []>} : vector<8x32xf32>, vector<32x128xf32>, vector<8x128xf32> -> vector<8x128xf32>
    %213 = arith.addf %212, %15 : vector<8x128xf32>
    %c2 = arith.constant 2 : index
    %c0_66 = arith.constant 0 : index
    %c0_67 = arith.constant 0 : index
    %214 = vector.load %arg13[%c2, %c0_66, %c0_67] : memref<8x8x128xf32, #tpu.memory_space<vmem>>, vector<1x8x128xf32>
    %215 = vector.shape_cast %214 : vector<1x8x128xf32> to vector<8x128xf32>
    %216 = vector.shape_cast %213 : vector<8x128xf32> to vector<1x8x128xf32>
    tpu.vector_store %arg13[%c2, %c0_66, %c0_67], %216 {strides = array<i32>} : memref<8x8x128xf32, #tpu.memory_space<vmem>>, vector<1x8x128xf32>,
    %217 = vector.extract_strided_slice %19 {offsets = [24, 0], sizes = [8, 128], strides = [1, 1]} : vector<64x128xf32> to vector<8x128xf32>
    %218 = arith.addf %217, %9 : vector<8x128xf32>
    %cst_68 = arith.constant dense<0.000000e+00> : vector<8x128xf32>
    %219 = tpu.matmul %182, %3, %cst_68 {dimension_numbers = #tpu.dot_dimension_numbers<[1], [0], [0], [1], [0, 0, 1, 1], [], []>} : vector<8x32xf32>, vector<32x128xf32>, vector<8x128xf32> -> vector<8x128xf32>
    %220 = arith.addf %218, %219 : vector<8x128xf32>
    %221 = vector.extract_strided_slice %220 {offsets = [0, 0], sizes = [8, 32], strides = [1, 1]} : vector<8x128xf32> to vector<8x32xf32>
    %222 = arith.negf %221 : vector<8x32xf32>
    %223 = math.exp %222 : vector<8x32xf32>
    %cst_69 = arith.constant 1.000000e+00 : f32
    %224 = vector.broadcast %cst_69 : f32 to vector<8x32xf32>
    %225 = arith.addf %224, %223 : vector<8x32xf32>
    %226 = arith.divf %224, %225 : vector<8x32xf32>
    %227 = vector.extract_strided_slice %220 {offsets = [0, 32], sizes = [8, 32], strides = [1, 1]} : vector<8x128xf32> to vector<8x32xf32>
    %228 = arith.negf %227 : vector<8x32xf32>
    %229 = math.exp %228 : vector<8x32xf32>
    %cst_70 = arith.constant 1.000000e+00 : f32
    %230 = vector.broadcast %cst_70 : f32 to vector<8x32xf32>
    %231 = arith.addf %230, %229 : vector<8x32xf32>
    %232 = arith.divf %230, %231 : vector<8x32xf32>
    %233 = vector.extract_strided_slice %220 {offsets = [0, 64], sizes = [8, 32], strides = [1, 1]} : vector<8x128xf32> to vector<8x32xf32>
    %234 = math.tanh %233 : vector<8x32xf32>
    %235 = vector.extract_strided_slice %220 {offsets = [0, 96], sizes = [8, 32], strides = [1, 1]} : vector<8x128xf32> to vector<8x32xf32>
    %236 = arith.negf %235 : vector<8x32xf32>
    %237 = math.exp %236 : vector<8x32xf32>
    %cst_71 = arith.constant 1.000000e+00 : f32
    %238 = vector.broadcast %cst_71 : f32 to vector<8x32xf32>
    %239 = arith.addf %238, %237 : vector<8x32xf32>
    %240 = arith.divf %238, %239 : vector<8x32xf32>
    %241 = arith.mulf %232, %180 : vector<8x32xf32>
    %242 = arith.mulf %226, %234 : vector<8x32xf32>
    %243 = arith.addf %241, %242 : vector<8x32xf32>
    %244 = math.tanh %243 : vector<8x32xf32>
    %245 = arith.mulf %240, %244 : vector<8x32xf32>
    %cst_72 = arith.constant dense<0.000000e+00> : vector<8x128xf32>
    %246 = tpu.matmul %245, %4, %cst_72 {dimension_numbers = #tpu.dot_dimension_numbers<[1], [0], [0], [1], [0, 0, 1, 1], [], []>} : vector<8x32xf32>, vector<32x128xf32>, vector<8x128xf32> -> vector<8x128xf32>
    %cst_73 = arith.constant dense<0.000000e+00> : vector<8x128xf32>
    %247 = tpu.matmul %211, %5, %cst_73 {dimension_numbers = #tpu.dot_dimension_numbers<[1], [0], [0], [1], [0, 0, 1, 1], [], []>} : vector<8x32xf32>, vector<32x128xf32>, vector<8x128xf32> -> vector<8x128xf32>
    %248 = arith.addf %246, %247 : vector<8x128xf32>
    %249 = arith.addf %248, %12 : vector<8x128xf32>
    %250 = vector.extract_strided_slice %249 {offsets = [0, 0], sizes = [8, 32], strides = [1, 1]} : vector<8x128xf32> to vector<8x32xf32>
    %251 = arith.negf %250 : vector<8x32xf32>
    %252 = math.exp %251 : vector<8x32xf32>
    %cst_74 = arith.constant 1.000000e+00 : f32
    %253 = vector.broadcast %cst_74 : f32 to vector<8x32xf32>
    %254 = arith.addf %253, %252 : vector<8x32xf32>
    %255 = arith.divf %253, %254 : vector<8x32xf32>
    %256 = vector.extract_strided_slice %249 {offsets = [0, 32], sizes = [8, 32], strides = [1, 1]} : vector<8x128xf32> to vector<8x32xf32>
    %257 = arith.negf %256 : vector<8x32xf32>
    %258 = math.exp %257 : vector<8x32xf32>
    %cst_75 = arith.constant 1.000000e+00 : f32
    %259 = vector.broadcast %cst_75 : f32 to vector<8x32xf32>
    %260 = arith.addf %259, %258 : vector<8x32xf32>
    %261 = arith.divf %259, %260 : vector<8x32xf32>
    %262 = vector.extract_strided_slice %249 {offsets = [0, 64], sizes = [8, 32], strides = [1, 1]} : vector<8x128xf32> to vector<8x32xf32>
    %263 = math.tanh %262 : vector<8x32xf32>
    %264 = vector.extract_strided_slice %249 {offsets = [0, 96], sizes = [8, 32], strides = [1, 1]} : vector<8x128xf32> to vector<8x32xf32>
    %265 = arith.negf %264 : vector<8x32xf32>
    %266 = math.exp %265 : vector<8x32xf32>
    %cst_76 = arith.constant 1.000000e+00 : f32
    %267 = vector.broadcast %cst_76 : f32 to vector<8x32xf32>
    %268 = arith.addf %267, %266 : vector<8x32xf32>
    %269 = arith.divf %267, %268 : vector<8x32xf32>
    %270 = arith.mulf %261, %209 : vector<8x32xf32>
    %271 = arith.mulf %255, %263 : vector<8x32xf32>
    %272 = arith.addf %270, %271 : vector<8x32xf32>
    %273 = math.tanh %272 : vector<8x32xf32>
    %274 = arith.mulf %269, %273 : vector<8x32xf32>
    %cst_77 = arith.constant dense<0.000000e+00> : vector<8x128xf32>
    %275 = tpu.matmul %274, %6, %cst_77 {dimension_numbers = #tpu.dot_dimension_numbers<[1], [0], [0], [1], [0, 0, 1, 1], [], []>} : vector<8x32xf32>, vector<32x128xf32>, vector<8x128xf32> -> vector<8x128xf32>
    %276 = arith.addf %275, %15 : vector<8x128xf32>
    %c3 = arith.constant 3 : index
    %c0_78 = arith.constant 0 : index
    %c0_79 = arith.constant 0 : index
    %277 = vector.load %arg13[%c3, %c0_78, %c0_79] : memref<8x8x128xf32, #tpu.memory_space<vmem>>, vector<1x8x128xf32>
    %278 = vector.shape_cast %277 : vector<1x8x128xf32> to vector<8x128xf32>
    %279 = vector.shape_cast %276 : vector<8x128xf32> to vector<1x8x128xf32>
    tpu.vector_store %arg13[%c3, %c0_78, %c0_79], %279 {strides = array<i32>} : memref<8x8x128xf32, #tpu.memory_space<vmem>>, vector<1x8x128xf32>,
    %280 = vector.extract_strided_slice %19 {offsets = [32, 0], sizes = [8, 128], strides = [1, 1]} : vector<64x128xf32> to vector<8x128xf32>
    %281 = arith.addf %280, %9 : vector<8x128xf32>
    %cst_80 = arith.constant dense<0.000000e+00> : vector<8x128xf32>
    %282 = tpu.matmul %245, %3, %cst_80 {dimension_numbers = #tpu.dot_dimension_numbers<[1], [0], [0], [1], [0, 0, 1, 1], [], []>} : vector<8x32xf32>, vector<32x128xf32>, vector<8x128xf32> -> vector<8x128xf32>
    %283 = arith.addf %281, %282 : vector<8x128xf32>
    %284 = vector.extract_strided_slice %283 {offsets = [0, 0], sizes = [8, 32], strides = [1, 1]} : vector<8x128xf32> to vector<8x32xf32>
    %285 = arith.negf %284 : vector<8x32xf32>
    %286 = math.exp %285 : vector<8x32xf32>
    %cst_81 = arith.constant 1.000000e+00 : f32
    %287 = vector.broadcast %cst_81 : f32 to vector<8x32xf32>
    %288 = arith.addf %287, %286 : vector<8x32xf32>
    %289 = arith.divf %287, %288 : vector<8x32xf32>
    %290 = vector.extract_strided_slice %283 {offsets = [0, 32], sizes = [8, 32], strides = [1, 1]} : vector<8x128xf32> to vector<8x32xf32>
    %291 = arith.negf %290 : vector<8x32xf32>
    %292 = math.exp %291 : vector<8x32xf32>
    %cst_82 = arith.constant 1.000000e+00 : f32
    %293 = vector.broadcast %cst_82 : f32 to vector<8x32xf32>
    %294 = arith.addf %293, %292 : vector<8x32xf32>
    %295 = arith.divf %293, %294 : vector<8x32xf32>
    %296 = vector.extract_strided_slice %283 {offsets = [0, 64], sizes = [8, 32], strides = [1, 1]} : vector<8x128xf32> to vector<8x32xf32>
    %297 = math.tanh %296 : vector<8x32xf32>
    %298 = vector.extract_strided_slice %283 {offsets = [0, 96], sizes = [8, 32], strides = [1, 1]} : vector<8x128xf32> to vector<8x32xf32>
    %299 = arith.negf %298 : vector<8x32xf32>
    %300 = math.exp %299 : vector<8x32xf32>
    %cst_83 = arith.constant 1.000000e+00 : f32
    %301 = vector.broadcast %cst_83 : f32 to vector<8x32xf32>
    %302 = arith.addf %301, %300 : vector<8x32xf32>
    %303 = arith.divf %301, %302 : vector<8x32xf32>
    %304 = arith.mulf %295, %243 : vector<8x32xf32>
    %305 = arith.mulf %289, %297 : vector<8x32xf32>
    %306 = arith.addf %304, %305 : vector<8x32xf32>
    %307 = math.tanh %306 : vector<8x32xf32>
    %308 = arith.mulf %303, %307 : vector<8x32xf32>
    %cst_84 = arith.constant dense<0.000000e+00> : vector<8x128xf32>
    %309 = tpu.matmul %308, %4, %cst_84 {dimension_numbers = #tpu.dot_dimension_numbers<[1], [0], [0], [1], [0, 0, 1, 1], [], []>} : vector<8x32xf32>, vector<32x128xf32>, vector<8x128xf32> -> vector<8x128xf32>
    %cst_85 = arith.constant dense<0.000000e+00> : vector<8x128xf32>
    %310 = tpu.matmul %274, %5, %cst_85 {dimension_numbers = #tpu.dot_dimension_numbers<[1], [0], [0], [1], [0, 0, 1, 1], [], []>} : vector<8x32xf32>, vector<32x128xf32>, vector<8x128xf32> -> vector<8x128xf32>
    %311 = arith.addf %309, %310 : vector<8x128xf32>
    %312 = arith.addf %311, %12 : vector<8x128xf32>
    %313 = vector.extract_strided_slice %312 {offsets = [0, 0], sizes = [8, 32], strides = [1, 1]} : vector<8x128xf32> to vector<8x32xf32>
    %314 = arith.negf %313 : vector<8x32xf32>
    %315 = math.exp %314 : vector<8x32xf32>
    %cst_86 = arith.constant 1.000000e+00 : f32
    %316 = vector.broadcast %cst_86 : f32 to vector<8x32xf32>
    %317 = arith.addf %316, %315 : vector<8x32xf32>
    %318 = arith.divf %316, %317 : vector<8x32xf32>
    %319 = vector.extract_strided_slice %312 {offsets = [0, 32], sizes = [8, 32], strides = [1, 1]} : vector<8x128xf32> to vector<8x32xf32>
    %320 = arith.negf %319 : vector<8x32xf32>
    %321 = math.exp %320 : vector<8x32xf32>
    %cst_87 = arith.constant 1.000000e+00 : f32
    %322 = vector.broadcast %cst_87 : f32 to vector<8x32xf32>
    %323 = arith.addf %322, %321 : vector<8x32xf32>
    %324 = arith.divf %322, %323 : vector<8x32xf32>
    %325 = vector.extract_strided_slice %312 {offsets = [0, 64], sizes = [8, 32], strides = [1, 1]} : vector<8x128xf32> to vector<8x32xf32>
    %326 = math.tanh %325 : vector<8x32xf32>
    %327 = vector.extract_strided_slice %312 {offsets = [0, 96], sizes = [8, 32], strides = [1, 1]} : vector<8x128xf32> to vector<8x32xf32>
    %328 = arith.negf %327 : vector<8x32xf32>
    %329 = math.exp %328 : vector<8x32xf32>
    %cst_88 = arith.constant 1.000000e+00 : f32
    %330 = vector.broadcast %cst_88 : f32 to vector<8x32xf32>
    %331 = arith.addf %330, %329 : vector<8x32xf32>
    %332 = arith.divf %330, %331 : vector<8x32xf32>
    %333 = arith.mulf %324, %272 : vector<8x32xf32>
    %334 = arith.mulf %318, %326 : vector<8x32xf32>
    %335 = arith.addf %333, %334 : vector<8x32xf32>
    %336 = math.tanh %335 : vector<8x32xf32>
    %337 = arith.mulf %332, %336 : vector<8x32xf32>
    %cst_89 = arith.constant dense<0.000000e+00> : vector<8x128xf32>
    %338 = tpu.matmul %337, %6, %cst_89 {dimension_numbers = #tpu.dot_dimension_numbers<[1], [0], [0], [1], [0, 0, 1, 1], [], []>} : vector<8x32xf32>, vector<32x128xf32>, vector<8x128xf32> -> vector<8x128xf32>
    %339 = arith.addf %338, %15 : vector<8x128xf32>
    %c4 = arith.constant 4 : index
    %c0_90 = arith.constant 0 : index
    %c0_91 = arith.constant 0 : index
    %340 = vector.load %arg13[%c4, %c0_90, %c0_91] : memref<8x8x128xf32, #tpu.memory_space<vmem>>, vector<1x8x128xf32>
    %341 = vector.shape_cast %340 : vector<1x8x128xf32> to vector<8x128xf32>
    %342 = vector.shape_cast %339 : vector<8x128xf32> to vector<1x8x128xf32>
    tpu.vector_store %arg13[%c4, %c0_90, %c0_91], %342 {strides = array<i32>} : memref<8x8x128xf32, #tpu.memory_space<vmem>>, vector<1x8x128xf32>,
    %343 = vector.extract_strided_slice %19 {offsets = [40, 0], sizes = [8, 128], strides = [1, 1]} : vector<64x128xf32> to vector<8x128xf32>
    %344 = arith.addf %343, %9 : vector<8x128xf32>
    %cst_92 = arith.constant dense<0.000000e+00> : vector<8x128xf32>
    %345 = tpu.matmul %308, %3, %cst_92 {dimension_numbers = #tpu.dot_dimension_numbers<[1], [0], [0], [1], [0, 0, 1, 1], [], []>} : vector<8x32xf32>, vector<32x128xf32>, vector<8x128xf32> -> vector<8x128xf32>
    %346 = arith.addf %344, %345 : vector<8x128xf32>
    %347 = vector.extract_strided_slice %346 {offsets = [0, 0], sizes = [8, 32], strides = [1, 1]} : vector<8x128xf32> to vector<8x32xf32>
    %348 = arith.negf %347 : vector<8x32xf32>
    %349 = math.exp %348 : vector<8x32xf32>
    %cst_93 = arith.constant 1.000000e+00 : f32
    %350 = vector.broadcast %cst_93 : f32 to vector<8x32xf32>
    %351 = arith.addf %350, %349 : vector<8x32xf32>
    %352 = arith.divf %350, %351 : vector<8x32xf32>
    %353 = vector.extract_strided_slice %346 {offsets = [0, 32], sizes = [8, 32], strides = [1, 1]} : vector<8x128xf32> to vector<8x32xf32>
    %354 = arith.negf %353 : vector<8x32xf32>
    %355 = math.exp %354 : vector<8x32xf32>
    %cst_94 = arith.constant 1.000000e+00 : f32
    %356 = vector.broadcast %cst_94 : f32 to vector<8x32xf32>
    %357 = arith.addf %356, %355 : vector<8x32xf32>
    %358 = arith.divf %356, %357 : vector<8x32xf32>
    %359 = vector.extract_strided_slice %346 {offsets = [0, 64], sizes = [8, 32], strides = [1, 1]} : vector<8x128xf32> to vector<8x32xf32>
    %360 = math.tanh %359 : vector<8x32xf32>
    %361 = vector.extract_strided_slice %346 {offsets = [0, 96], sizes = [8, 32], strides = [1, 1]} : vector<8x128xf32> to vector<8x32xf32>
    %362 = arith.negf %361 : vector<8x32xf32>
    %363 = math.exp %362 : vector<8x32xf32>
    %cst_95 = arith.constant 1.000000e+00 : f32
    %364 = vector.broadcast %cst_95 : f32 to vector<8x32xf32>
    %365 = arith.addf %364, %363 : vector<8x32xf32>
    %366 = arith.divf %364, %365 : vector<8x32xf32>
    %367 = arith.mulf %358, %306 : vector<8x32xf32>
    %368 = arith.mulf %352, %360 : vector<8x32xf32>
    %369 = arith.addf %367, %368 : vector<8x32xf32>
    %370 = math.tanh %369 : vector<8x32xf32>
    %371 = arith.mulf %366, %370 : vector<8x32xf32>
    %cst_96 = arith.constant dense<0.000000e+00> : vector<8x128xf32>
    %372 = tpu.matmul %371, %4, %cst_96 {dimension_numbers = #tpu.dot_dimension_numbers<[1], [0], [0], [1], [0, 0, 1, 1], [], []>} : vector<8x32xf32>, vector<32x128xf32>, vector<8x128xf32> -> vector<8x128xf32>
    %cst_97 = arith.constant dense<0.000000e+00> : vector<8x128xf32>
    %373 = tpu.matmul %337, %5, %cst_97 {dimension_numbers = #tpu.dot_dimension_numbers<[1], [0], [0], [1], [0, 0, 1, 1], [], []>} : vector<8x32xf32>, vector<32x128xf32>, vector<8x128xf32> -> vector<8x128xf32>
    %374 = arith.addf %372, %373 : vector<8x128xf32>
    %375 = arith.addf %374, %12 : vector<8x128xf32>
    %376 = vector.extract_strided_slice %375 {offsets = [0, 0], sizes = [8, 32], strides = [1, 1]} : vector<8x128xf32> to vector<8x32xf32>
    %377 = arith.negf %376 : vector<8x32xf32>
    %378 = math.exp %377 : vector<8x32xf32>
    %cst_98 = arith.constant 1.000000e+00 : f32
    %379 = vector.broadcast %cst_98 : f32 to vector<8x32xf32>
    %380 = arith.addf %379, %378 : vector<8x32xf32>
    %381 = arith.divf %379, %380 : vector<8x32xf32>
    %382 = vector.extract_strided_slice %375 {offsets = [0, 32], sizes = [8, 32], strides = [1, 1]} : vector<8x128xf32> to vector<8x32xf32>
    %383 = arith.negf %382 : vector<8x32xf32>
    %384 = math.exp %383 : vector<8x32xf32>
    %cst_99 = arith.constant 1.000000e+00 : f32
    %385 = vector.broadcast %cst_99 : f32 to vector<8x32xf32>
    %386 = arith.addf %385, %384 : vector<8x32xf32>
    %387 = arith.divf %385, %386 : vector<8x32xf32>
    %388 = vector.extract_strided_slice %375 {offsets = [0, 64], sizes = [8, 32], strides = [1, 1]} : vector<8x128xf32> to vector<8x32xf32>
    %389 = math.tanh %388 : vector<8x32xf32>
    %390 = vector.extract_strided_slice %375 {offsets = [0, 96], sizes = [8, 32], strides = [1, 1]} : vector<8x128xf32> to vector<8x32xf32>
    %391 = arith.negf %390 : vector<8x32xf32>
    %392 = math.exp %391 : vector<8x32xf32>
    %cst_100 = arith.constant 1.000000e+00 : f32
    %393 = vector.broadcast %cst_100 : f32 to vector<8x32xf32>
    %394 = arith.addf %393, %392 : vector<8x32xf32>
    %395 = arith.divf %393, %394 : vector<8x32xf32>
    %396 = arith.mulf %387, %335 : vector<8x32xf32>
    %397 = arith.mulf %381, %389 : vector<8x32xf32>
    %398 = arith.addf %396, %397 : vector<8x32xf32>
    %399 = math.tanh %398 : vector<8x32xf32>
    %400 = arith.mulf %395, %399 : vector<8x32xf32>
    %cst_101 = arith.constant dense<0.000000e+00> : vector<8x128xf32>
    %401 = tpu.matmul %400, %6, %cst_101 {dimension_numbers = #tpu.dot_dimension_numbers<[1], [0], [0], [1], [0, 0, 1, 1], [], []>} : vector<8x32xf32>, vector<32x128xf32>, vector<8x128xf32> -> vector<8x128xf32>
    %402 = arith.addf %401, %15 : vector<8x128xf32>
    %c5 = arith.constant 5 : index
    %c0_102 = arith.constant 0 : index
    %c0_103 = arith.constant 0 : index
    %403 = vector.load %arg13[%c5, %c0_102, %c0_103] : memref<8x8x128xf32, #tpu.memory_space<vmem>>, vector<1x8x128xf32>
    %404 = vector.shape_cast %403 : vector<1x8x128xf32> to vector<8x128xf32>
    %405 = vector.shape_cast %402 : vector<8x128xf32> to vector<1x8x128xf32>
    tpu.vector_store %arg13[%c5, %c0_102, %c0_103], %405 {strides = array<i32>} : memref<8x8x128xf32, #tpu.memory_space<vmem>>, vector<1x8x128xf32>,
    %406 = vector.extract_strided_slice %19 {offsets = [48, 0], sizes = [8, 128], strides = [1, 1]} : vector<64x128xf32> to vector<8x128xf32>
    %407 = arith.addf %406, %9 : vector<8x128xf32>
    %cst_104 = arith.constant dense<0.000000e+00> : vector<8x128xf32>
    %408 = tpu.matmul %371, %3, %cst_104 {dimension_numbers = #tpu.dot_dimension_numbers<[1], [0], [0], [1], [0, 0, 1, 1], [], []>} : vector<8x32xf32>, vector<32x128xf32>, vector<8x128xf32> -> vector<8x128xf32>
    %409 = arith.addf %407, %408 : vector<8x128xf32>
    %410 = vector.extract_strided_slice %409 {offsets = [0, 0], sizes = [8, 32], strides = [1, 1]} : vector<8x128xf32> to vector<8x32xf32>
    %411 = arith.negf %410 : vector<8x32xf32>
    %412 = math.exp %411 : vector<8x32xf32>
    %cst_105 = arith.constant 1.000000e+00 : f32
    %413 = vector.broadcast %cst_105 : f32 to vector<8x32xf32>
    %414 = arith.addf %413, %412 : vector<8x32xf32>
    %415 = arith.divf %413, %414 : vector<8x32xf32>
    %416 = vector.extract_strided_slice %409 {offsets = [0, 32], sizes = [8, 32], strides = [1, 1]} : vector<8x128xf32> to vector<8x32xf32>
    %417 = arith.negf %416 : vector<8x32xf32>
    %418 = math.exp %417 : vector<8x32xf32>
    %cst_106 = arith.constant 1.000000e+00 : f32
    %419 = vector.broadcast %cst_106 : f32 to vector<8x32xf32>
    %420 = arith.addf %419, %418 : vector<8x32xf32>
    %421 = arith.divf %419, %420 : vector<8x32xf32>
    %422 = vector.extract_strided_slice %409 {offsets = [0, 64], sizes = [8, 32], strides = [1, 1]} : vector<8x128xf32> to vector<8x32xf32>
    %423 = math.tanh %422 : vector<8x32xf32>
    %424 = vector.extract_strided_slice %409 {offsets = [0, 96], sizes = [8, 32], strides = [1, 1]} : vector<8x128xf32> to vector<8x32xf32>
    %425 = arith.negf %424 : vector<8x32xf32>
    %426 = math.exp %425 : vector<8x32xf32>
    %cst_107 = arith.constant 1.000000e+00 : f32
    %427 = vector.broadcast %cst_107 : f32 to vector<8x32xf32>
    %428 = arith.addf %427, %426 : vector<8x32xf32>
    %429 = arith.divf %427, %428 : vector<8x32xf32>
    %430 = arith.mulf %421, %369 : vector<8x32xf32>
    %431 = arith.mulf %415, %423 : vector<8x32xf32>
    %432 = arith.addf %430, %431 : vector<8x32xf32>
    %433 = math.tanh %432 : vector<8x32xf32>
    %434 = arith.mulf %429, %433 : vector<8x32xf32>
    %cst_108 = arith.constant dense<0.000000e+00> : vector<8x128xf32>
    %435 = tpu.matmul %434, %4, %cst_108 {dimension_numbers = #tpu.dot_dimension_numbers<[1], [0], [0], [1], [0, 0, 1, 1], [], []>} : vector<8x32xf32>, vector<32x128xf32>, vector<8x128xf32> -> vector<8x128xf32>
    %cst_109 = arith.constant dense<0.000000e+00> : vector<8x128xf32>
    %436 = tpu.matmul %400, %5, %cst_109 {dimension_numbers = #tpu.dot_dimension_numbers<[1], [0], [0], [1], [0, 0, 1, 1], [], []>} : vector<8x32xf32>, vector<32x128xf32>, vector<8x128xf32> -> vector<8x128xf32>
    %437 = arith.addf %435, %436 : vector<8x128xf32>
    %438 = arith.addf %437, %12 : vector<8x128xf32>
    %439 = vector.extract_strided_slice %438 {offsets = [0, 0], sizes = [8, 32], strides = [1, 1]} : vector<8x128xf32> to vector<8x32xf32>
    %440 = arith.negf %439 : vector<8x32xf32>
    %441 = math.exp %440 : vector<8x32xf32>
    %cst_110 = arith.constant 1.000000e+00 : f32
    %442 = vector.broadcast %cst_110 : f32 to vector<8x32xf32>
    %443 = arith.addf %442, %441 : vector<8x32xf32>
    %444 = arith.divf %442, %443 : vector<8x32xf32>
    %445 = vector.extract_strided_slice %438 {offsets = [0, 32], sizes = [8, 32], strides = [1, 1]} : vector<8x128xf32> to vector<8x32xf32>
    %446 = arith.negf %445 : vector<8x32xf32>
    %447 = math.exp %446 : vector<8x32xf32>
    %cst_111 = arith.constant 1.000000e+00 : f32
    %448 = vector.broadcast %cst_111 : f32 to vector<8x32xf32>
    %449 = arith.addf %448, %447 : vector<8x32xf32>
    %450 = arith.divf %448, %449 : vector<8x32xf32>
    %451 = vector.extract_strided_slice %438 {offsets = [0, 64], sizes = [8, 32], strides = [1, 1]} : vector<8x128xf32> to vector<8x32xf32>
    %452 = math.tanh %451 : vector<8x32xf32>
    %453 = vector.extract_strided_slice %438 {offsets = [0, 96], sizes = [8, 32], strides = [1, 1]} : vector<8x128xf32> to vector<8x32xf32>
    %454 = arith.negf %453 : vector<8x32xf32>
    %455 = math.exp %454 : vector<8x32xf32>
    %cst_112 = arith.constant 1.000000e+00 : f32
    %456 = vector.broadcast %cst_112 : f32 to vector<8x32xf32>
    %457 = arith.addf %456, %455 : vector<8x32xf32>
    %458 = arith.divf %456, %457 : vector<8x32xf32>
    %459 = arith.mulf %450, %398 : vector<8x32xf32>
    %460 = arith.mulf %444, %452 : vector<8x32xf32>
    %461 = arith.addf %459, %460 : vector<8x32xf32>
    %462 = math.tanh %461 : vector<8x32xf32>
    %463 = arith.mulf %458, %462 : vector<8x32xf32>
    %cst_113 = arith.constant dense<0.000000e+00> : vector<8x128xf32>
    %464 = tpu.matmul %463, %6, %cst_113 {dimension_numbers = #tpu.dot_dimension_numbers<[1], [0], [0], [1], [0, 0, 1, 1], [], []>} : vector<8x32xf32>, vector<32x128xf32>, vector<8x128xf32> -> vector<8x128xf32>
    %465 = arith.addf %464, %15 : vector<8x128xf32>
    %c6 = arith.constant 6 : index
    %c0_114 = arith.constant 0 : index
    %c0_115 = arith.constant 0 : index
    %466 = vector.load %arg13[%c6, %c0_114, %c0_115] : memref<8x8x128xf32, #tpu.memory_space<vmem>>, vector<1x8x128xf32>
    %467 = vector.shape_cast %466 : vector<1x8x128xf32> to vector<8x128xf32>
    %468 = vector.shape_cast %465 : vector<8x128xf32> to vector<1x8x128xf32>
    tpu.vector_store %arg13[%c6, %c0_114, %c0_115], %468 {strides = array<i32>} : memref<8x8x128xf32, #tpu.memory_space<vmem>>, vector<1x8x128xf32>,
    %469 = vector.extract_strided_slice %19 {offsets = [56, 0], sizes = [8, 128], strides = [1, 1]} : vector<64x128xf32> to vector<8x128xf32>
    %470 = arith.addf %469, %9 : vector<8x128xf32>
    %cst_116 = arith.constant dense<0.000000e+00> : vector<8x128xf32>
    %471 = tpu.matmul %434, %3, %cst_116 {dimension_numbers = #tpu.dot_dimension_numbers<[1], [0], [0], [1], [0, 0, 1, 1], [], []>} : vector<8x32xf32>, vector<32x128xf32>, vector<8x128xf32> -> vector<8x128xf32>
    %472 = arith.addf %470, %471 : vector<8x128xf32>
    %473 = vector.extract_strided_slice %472 {offsets = [0, 0], sizes = [8, 32], strides = [1, 1]} : vector<8x128xf32> to vector<8x32xf32>
    %474 = arith.negf %473 : vector<8x32xf32>
    %475 = math.exp %474 : vector<8x32xf32>
    %cst_117 = arith.constant 1.000000e+00 : f32
    %476 = vector.broadcast %cst_117 : f32 to vector<8x32xf32>
    %477 = arith.addf %476, %475 : vector<8x32xf32>
    %478 = arith.divf %476, %477 : vector<8x32xf32>
    %479 = vector.extract_strided_slice %472 {offsets = [0, 32], sizes = [8, 32], strides = [1, 1]} : vector<8x128xf32> to vector<8x32xf32>
    %480 = arith.negf %479 : vector<8x32xf32>
    %481 = math.exp %480 : vector<8x32xf32>
    %cst_118 = arith.constant 1.000000e+00 : f32
    %482 = vector.broadcast %cst_118 : f32 to vector<8x32xf32>
    %483 = arith.addf %482, %481 : vector<8x32xf32>
    %484 = arith.divf %482, %483 : vector<8x32xf32>
    %485 = vector.extract_strided_slice %472 {offsets = [0, 64], sizes = [8, 32], strides = [1, 1]} : vector<8x128xf32> to vector<8x32xf32>
    %486 = math.tanh %485 : vector<8x32xf32>
    %487 = vector.extract_strided_slice %472 {offsets = [0, 96], sizes = [8, 32], strides = [1, 1]} : vector<8x128xf32> to vector<8x32xf32>
    %488 = arith.negf %487 : vector<8x32xf32>
    %489 = math.exp %488 : vector<8x32xf32>
    %cst_119 = arith.constant 1.000000e+00 : f32
    %490 = vector.broadcast %cst_119 : f32 to vector<8x32xf32>
    %491 = arith.addf %490, %489 : vector<8x32xf32>
    %492 = arith.divf %490, %491 : vector<8x32xf32>
    %493 = arith.mulf %484, %432 : vector<8x32xf32>
    %494 = arith.mulf %478, %486 : vector<8x32xf32>
    %495 = arith.addf %493, %494 : vector<8x32xf32>
    %496 = math.tanh %495 : vector<8x32xf32>
    %497 = arith.mulf %492, %496 : vector<8x32xf32>
    %cst_120 = arith.constant dense<0.000000e+00> : vector<8x128xf32>
    %498 = tpu.matmul %497, %4, %cst_120 {dimension_numbers = #tpu.dot_dimension_numbers<[1], [0], [0], [1], [0, 0, 1, 1], [], []>} : vector<8x32xf32>, vector<32x128xf32>, vector<8x128xf32> -> vector<8x128xf32>
    %cst_121 = arith.constant dense<0.000000e+00> : vector<8x128xf32>
    %499 = tpu.matmul %463, %5, %cst_121 {dimension_numbers = #tpu.dot_dimension_numbers<[1], [0], [0], [1], [0, 0, 1, 1], [], []>} : vector<8x32xf32>, vector<32x128xf32>, vector<8x128xf32> -> vector<8x128xf32>
    %500 = arith.addf %498, %499 : vector<8x128xf32>
    %501 = arith.addf %500, %12 : vector<8x128xf32>
    %502 = vector.extract_strided_slice %501 {offsets = [0, 0], sizes = [8, 32], strides = [1, 1]} : vector<8x128xf32> to vector<8x32xf32>
    %503 = arith.negf %502 : vector<8x32xf32>
    %504 = math.exp %503 : vector<8x32xf32>
    %cst_122 = arith.constant 1.000000e+00 : f32
    %505 = vector.broadcast %cst_122 : f32 to vector<8x32xf32>
    %506 = arith.addf %505, %504 : vector<8x32xf32>
    %507 = arith.divf %505, %506 : vector<8x32xf32>
    %508 = vector.extract_strided_slice %501 {offsets = [0, 32], sizes = [8, 32], strides = [1, 1]} : vector<8x128xf32> to vector<8x32xf32>
    %509 = arith.negf %508 : vector<8x32xf32>
    %510 = math.exp %509 : vector<8x32xf32>
    %cst_123 = arith.constant 1.000000e+00 : f32
    %511 = vector.broadcast %cst_123 : f32 to vector<8x32xf32>
    %512 = arith.addf %511, %510 : vector<8x32xf32>
    %513 = arith.divf %511, %512 : vector<8x32xf32>
    %514 = vector.extract_strided_slice %501 {offsets = [0, 64], sizes = [8, 32], strides = [1, 1]} : vector<8x128xf32> to vector<8x32xf32>
    %515 = math.tanh %514 : vector<8x32xf32>
    %516 = vector.extract_strided_slice %501 {offsets = [0, 96], sizes = [8, 32], strides = [1, 1]} : vector<8x128xf32> to vector<8x32xf32>
    %517 = arith.negf %516 : vector<8x32xf32>
    %518 = math.exp %517 : vector<8x32xf32>
    %cst_124 = arith.constant 1.000000e+00 : f32
    %519 = vector.broadcast %cst_124 : f32 to vector<8x32xf32>
    %520 = arith.addf %519, %518 : vector<8x32xf32>
    %521 = arith.divf %519, %520 : vector<8x32xf32>
    %522 = arith.mulf %513, %461 : vector<8x32xf32>
    %523 = arith.mulf %507, %515 : vector<8x32xf32>
    %524 = arith.addf %522, %523 : vector<8x32xf32>
    %525 = math.tanh %524 : vector<8x32xf32>
    %526 = arith.mulf %521, %525 : vector<8x32xf32>
    %cst_125 = arith.constant dense<0.000000e+00> : vector<8x128xf32>
    %527 = tpu.matmul %526, %6, %cst_125 {dimension_numbers = #tpu.dot_dimension_numbers<[1], [0], [0], [1], [0, 0, 1, 1], [], []>} : vector<8x32xf32>, vector<32x128xf32>, vector<8x128xf32> -> vector<8x128xf32>
    %528 = arith.addf %527, %15 : vector<8x128xf32>
    %c7 = arith.constant 7 : index
    %c0_126 = arith.constant 0 : index
    %c0_127 = arith.constant 0 : index
    %529 = vector.load %arg13[%c7, %c0_126, %c0_127] : memref<8x8x128xf32, #tpu.memory_space<vmem>>, vector<1x8x128xf32>
    %530 = vector.shape_cast %529 : vector<1x8x128xf32> to vector<8x128xf32>
    %531 = vector.shape_cast %528 : vector<8x128xf32> to vector<1x8x128xf32>
    tpu.vector_store %arg13[%c7, %c0_126, %c0_127], %531 {strides = array<i32>} : memref<8x8x128xf32, #tpu.memory_space<vmem>>, vector<1x8x128xf32>,
    %c0_128 = arith.constant 0 : index
    %c0_129 = arith.constant 0 : index
    %c0_130 = arith.constant 0 : index
    %532 = vector.load %arg16[%c0_128, %c0_129, %c0_130] : memref<2x8x32xf32, #tpu.memory_space<vmem>>, vector<1x8x32xf32>
    %533 = vector.shape_cast %532 : vector<1x8x32xf32> to vector<8x32xf32>
    %534 = vector.shape_cast %497 : vector<8x32xf32> to vector<1x8x32xf32>
    tpu.vector_store %arg16[%c0_128, %c0_129, %c0_130], %534 {strides = array<i32>} : memref<2x8x32xf32, #tpu.memory_space<vmem>>, vector<1x8x32xf32>,
    %c0_131 = arith.constant 0 : index
    %c0_132 = arith.constant 0 : index
    %c0_133 = arith.constant 0 : index
    %535 = vector.load %arg17[%c0_131, %c0_132, %c0_133] : memref<2x8x32xf32, #tpu.memory_space<vmem>>, vector<1x8x32xf32>
    %536 = vector.shape_cast %535 : vector<1x8x32xf32> to vector<8x32xf32>
    %537 = vector.shape_cast %495 : vector<8x32xf32> to vector<1x8x32xf32>
    tpu.vector_store %arg17[%c0_131, %c0_132, %c0_133], %537 {strides = array<i32>} : memref<2x8x32xf32, #tpu.memory_space<vmem>>, vector<1x8x32xf32>,
    %c1_134 = arith.constant 1 : index
    %c0_135 = arith.constant 0 : index
    %c0_136 = arith.constant 0 : index
    %538 = vector.load %arg16[%c1_134, %c0_135, %c0_136] : memref<2x8x32xf32, #tpu.memory_space<vmem>>, vector<1x8x32xf32>
    %539 = vector.shape_cast %538 : vector<1x8x32xf32> to vector<8x32xf32>
    %540 = vector.shape_cast %526 : vector<8x32xf32> to vector<1x8x32xf32>
    tpu.vector_store %arg16[%c1_134, %c0_135, %c0_136], %540 {strides = array<i32>} : memref<2x8x32xf32, #tpu.memory_space<vmem>>, vector<1x8x32xf32>,
    %c1_137 = arith.constant 1 : index
    %c0_138 = arith.constant 0 : index
    %c0_139 = arith.constant 0 : index
    %541 = vector.load %arg17[%c1_137, %c0_138, %c0_139] : memref<2x8x32xf32, #tpu.memory_space<vmem>>, vector<1x8x32xf32>
    %542 = vector.shape_cast %541 : vector<1x8x32xf32> to vector<8x32xf32>
    %543 = vector.shape_cast %524 : vector<8x32xf32> to vector<1x8x32xf32>
    tpu.vector_store %arg17[%c1_137, %c0_138, %c0_139], %543 {strides = array<i32>} : memref<2x8x32xf32, #tpu.memory_space<vmem>>, vector<1x8x32xf32>,
    %c0_i32_140 = arith.constant 0 : i32
    %544 = arith.cmpi eq, %arg1, %c0_i32_140 : i32
    %545 = arith.extui %544 : i1 to i32
    %c0_i32_141 = arith.constant 0 : i32
    %546 = arith.cmpi ne, %545, %c0_i32_141 : i32
    scf.if %546 {
      %c0_142 = arith.constant 0 : index
      %c0_143 = arith.constant 0 : index
      %c0_144 = arith.constant 0 : index
      %547 = vector.load %arg16[%c0_142, %c0_143, %c0_144] : memref<2x8x32xf32, #tpu.memory_space<vmem>>, vector<2x8x32xf32>
      %c0_145 = arith.constant 0 : index
      %c0_146 = arith.constant 0 : index
      %c0_147 = arith.constant 0 : index
      %548 = vector.load %arg14[%c0_145, %c0_146, %c0_147] : memref<2x8x32xf32, #tpu.memory_space<vmem>>, vector<2x8x32xf32>
      tpu.vector_store %arg14[%c0_145, %c0_146, %c0_147], %547 {strides = array<i32>} : memref<2x8x32xf32, #tpu.memory_space<vmem>>, vector<2x8x32xf32>,
      %c0_148 = arith.constant 0 : index
      %c0_149 = arith.constant 0 : index
      %c0_150 = arith.constant 0 : index
      %549 = vector.load %arg17[%c0_148, %c0_149, %c0_150] : memref<2x8x32xf32, #tpu.memory_space<vmem>>, vector<2x8x32xf32>
      %c0_151 = arith.constant 0 : index
      %c0_152 = arith.constant 0 : index
      %c0_153 = arith.constant 0 : index
      %550 = vector.load %arg15[%c0_151, %c0_152, %c0_153] : memref<2x8x32xf32, #tpu.memory_space<vmem>>, vector<2x8x32xf32>
      tpu.vector_store %arg15[%c0_151, %c0_152, %c0_153], %549 {strides = array<i32>} : memref<2x8x32xf32, #tpu.memory_space<vmem>>, vector<2x8x32xf32>,
    } else {
    }
    return
  }
  func.func @transform_0(%arg0: i32, %arg1: i32) -> (i32, i32, i32) {
    %c0_i32 = arith.constant 0 : i32
    %c0_i32_0 = arith.constant 0 : i32
    return %arg1, %arg0, %c0_i32 : i32, i32, i32
  }
  func.func @transform_1(%arg0: i32, %arg1: i32) -> (i32, i32, i32) {
    %c0_i32 = arith.constant 0 : i32
    %c0_i32_0 = arith.constant 0 : i32
    %c0_i32_1 = arith.constant 0 : i32
    return %c0_i32, %arg0, %c0_i32_0 : i32, i32, i32
  }
  func.func @transform_2(%arg0: i32, %arg1: i32) -> (i32, i32, i32) {
    %c0_i32 = arith.constant 0 : i32
    %c0_i32_0 = arith.constant 0 : i32
    %c0_i32_1 = arith.constant 0 : i32
    return %c0_i32, %arg0, %c0_i32_0 : i32, i32, i32
  }
  func.func @transform_3(%arg0: i32, %arg1: i32) -> (i32, i32) {
    %c0_i32 = arith.constant 0 : i32
    %c0_i32_0 = arith.constant 0 : i32
    %c0_i32_1 = arith.constant 0 : i32
    return %c0_i32, %c0_i32_0 : i32, i32
  }
  func.func @transform_4(%arg0: i32, %arg1: i32) -> (i32, i32) {
    %c0_i32 = arith.constant 0 : i32
    %c0_i32_0 = arith.constant 0 : i32
    %c0_i32_1 = arith.constant 0 : i32
    return %c0_i32, %c0_i32_0 : i32, i32
  }
  func.func @transform_5(%arg0: i32, %arg1: i32) -> (i32, i32) {
    %c0_i32 = arith.constant 0 : i32
    %c0_i32_0 = arith.constant 0 : i32
    %c0_i32_1 = arith.constant 0 : i32
    return %c0_i32, %c0_i32_0 : i32, i32
  }
  func.func @transform_6(%arg0: i32, %arg1: i32) -> (i32, i32) {
    %c0_i32 = arith.constant 0 : i32
    %c0_i32_0 = arith.constant 0 : i32
    %c0_i32_1 = arith.constant 0 : i32
    return %c0_i32, %c0_i32_0 : i32, i32
  }
  func.func @transform_7(%arg0: i32, %arg1: i32) -> (i32, i32) {
    %c0_i32 = arith.constant 0 : i32
    %c0_i32_0 = arith.constant 0 : i32
    %c0_i32_1 = arith.constant 0 : i32
    return %c0_i32, %c0_i32_0 : i32, i32
  }
  func.func @transform_8(%arg0: i32, %arg1: i32) -> (i32, i32) {
    %c0_i32 = arith.constant 0 : i32
    %c0_i32_0 = arith.constant 0 : i32
    %c0_i32_1 = arith.constant 0 : i32
    return %c0_i32, %c0_i32_0 : i32, i32
  }
  func.func @transform_9(%arg0: i32, %arg1: i32) -> (i32, i32) {
    %c0_i32 = arith.constant 0 : i32
    %c0_i32_0 = arith.constant 0 : i32
    %c0_i32_1 = arith.constant 0 : i32
    return %c0_i32, %c0_i32_0 : i32, i32
  }
  func.func @transform_10(%arg0: i32, %arg1: i32) -> (i32, i32) {
    %c0_i32 = arith.constant 0 : i32
    %c0_i32_0 = arith.constant 0 : i32
    %c0_i32_1 = arith.constant 0 : i32
    return %c0_i32, %c0_i32_0 : i32, i32
  }
  func.func @transform_11(%arg0: i32, %arg1: i32) -> (i32, i32, i32) {
    %c0_i32 = arith.constant 0 : i32
    %c0_i32_0 = arith.constant 0 : i32
    return %arg1, %arg0, %c0_i32 : i32, i32, i32
  }
  func.func @transform_12(%arg0: i32, %arg1: i32) -> (i32, i32, i32) {
    %c0_i32 = arith.constant 0 : i32
    %c0_i32_0 = arith.constant 0 : i32
    %c0_i32_1 = arith.constant 0 : i32
    return %c0_i32, %arg0, %c0_i32_0 : i32, i32, i32
  }
  func.func @transform_13(%arg0: i32, %arg1: i32) -> (i32, i32, i32) {
    %c0_i32 = arith.constant 0 : i32
    %c0_i32_0 = arith.constant 0 : i32
    %c0_i32_1 = arith.constant 0 : i32
    return %c0_i32, %arg0, %c0_i32_0 : i32, i32, i32
  }
}

module attributes {stable_mosaic.version = 11 : i64} {
  func.func @_char_rnn_kernel(%arg0: i32, %arg1: i32, %arg2: memref<8x8x128xf32, #tpu.memory_space<vmem>>, %arg3: memref<2x8x32xf32, #tpu.memory_space<vmem>>, %arg4: memref<2x8x32xf32, #tpu.memory_space<vmem>>, %arg5: memref<128x128xf32, #tpu.memory_space<vmem>>, %arg6: memref<32x128xf32, #tpu.memory_space<vmem>>, %arg7: memref<1x128xf32, #tpu.memory_space<vmem>>, %arg8: memref<32x128xf32, #tpu.memory_space<vmem>>, %arg9: memref<32x128xf32, #tpu.memory_space<vmem>>, %arg10: memref<1x128xf32, #tpu.memory_space<vmem>>, %arg11: memref<32x128xf32, #tpu.memory_space<vmem>>, %arg12: memref<1x128xf32, #tpu.memory_space<vmem>>, %arg13: memref<8x8x128xf32, #tpu.memory_space<vmem>>, %arg14: memref<2x8x32xf32, #tpu.memory_space<vmem>>, %arg15: memref<2x8x32xf32, #tpu.memory_space<vmem>>, %arg16: memref<2x8x32xf32, #tpu.memory_space<vmem>>, %arg17: memref<2x8x32xf32, #tpu.memory_space<vmem>>) attributes {dimension_semantics = [#tpu.dimension_semantics<parallel>, #tpu.dimension_semantics<arbitrary>], iteration_bounds = array<i64: 1, 1>, scalar_prefetch = 0 : i64, scratch_operands = 2 : i64, tpu.core_type = #tpu.core_type<tc>, window_params = [{transform_indices = @transform_0, window_bounds = array<i64: 8, 8, 128>}, {transform_indices = @transform_1, window_bounds = array<i64: 2, 8, 32>}, {transform_indices = @transform_2, window_bounds = array<i64: 2, 8, 32>}, {pipeline_mode = #tpu.pipeline_mode<synchronous>, transform_indices = @transform_3, window_bounds = array<i64: 128, 128>}, {pipeline_mode = #tpu.pipeline_mode<synchronous>, transform_indices = @transform_4, window_bounds = array<i64: 32, 128>}, {pipeline_mode = #tpu.pipeline_mode<synchronous>, transform_indices = @transform_5, window_bounds = array<i64: 1, 128>}, {pipeline_mode = #tpu.pipeline_mode<synchronous>, transform_indices = @transform_6, window_bounds = array<i64: 32, 128>}, {pipeline_mode = #tpu.pipeline_mode<synchronous>, transform_indices = @transform_7, window_bounds = array<i64: 32, 128>}, {pipeline_mode = #tpu.pipeline_mode<synchronous>, transform_indices = @transform_8, window_bounds = array<i64: 1, 128>}, {pipeline_mode = #tpu.pipeline_mode<synchronous>, transform_indices = @transform_9, window_bounds = array<i64: 32, 128>}, {pipeline_mode = #tpu.pipeline_mode<synchronous>, transform_indices = @transform_10, window_bounds = array<i64: 1, 128>}, {transform_indices = @transform_11, window_bounds = array<i64: 8, 8, 128>}, {transform_indices = @transform_12, window_bounds = array<i64: 2, 8, 32>}, {transform_indices = @transform_13, window_bounds = array<i64: 2, 8, 32>}]} {
    %c0_i32 = arith.constant 0 : i32
    %0 = arith.cmpi eq, %arg1, %c0_i32 : i32
    %1 = arith.extui %0 : i1 to i32
    %c0_i32_0 = arith.constant 0 : i32
    %2 = arith.cmpi ne, %1, %c0_i32_0 : i32
    scf.if %2 {
      %c0_142 = arith.constant 0 : index
      %c0_143 = arith.constant 0 : index
      %c0_144 = arith.constant 0 : index
      %547 = vector.load %arg3[%c0_142, %c0_143, %c0_144] : memref<2x8x32xf32, #tpu.memory_space<vmem>>, vector<2x8x32xf32>
      %c0_145 = arith.constant 0 : index
      %c0_146 = arith.constant 0 : index
      %c0_147 = arith.constant 0 : index
      %548 = vector.load %arg16[%c0_145, %c0_146, %c0_147] : memref<2x8x32xf32, #tpu.memory_space<vmem>>, vector<2x8x32xf32>
      tpu.vector_store %arg16[%c0_145, %c0_146, %c0_147], %547 {strides = array<i32>} : memref<2x8x32xf32, #tpu.memory_space<vmem>>, vector<2x8x32xf32>,
      %c0_148 = arith.constant 0 : index
      %c0_149 = arith.constant 0 : index
      %c0_150 = arith.constant 0 : index
      %549 = vector.load %arg4[%c0_148, %c0_149, %c0_150] : memref<2x8x32xf32, #tpu.memory_space<vmem>>, vector<2x8x32xf32>
      %c0_151 = arith.constant 0 : index
      %c0_152 = arith.constant 0 : index
      %c0_153 = arith.constant 0 : index
      %550 = vector.load %arg17[%c0_151, %c0_152, %c0_153] : memref<2x8x32xf32, #tpu.memory_space<vmem>>, vector<2x8x32xf32>
      tpu.vector_store %arg17[%c0_151, %c0_152, %c0_153], %549 {strides = array<i32>} : memref<2x8x32xf32, #tpu.memory_space<vmem>>, vector<2x8x32xf32>,
    } else {
    }
    %c0 = arith.constant 0 : index
    %c0_1 = arith.constant 0 : index
    %3 = vector.load %arg6[%c0, %c0_1] : memref<32x128xf32, #tpu.memory_space<vmem>>, vector<32x128xf32>
    %c0_2 = arith.constant 0 : index
    %c0_3 = arith.constant 0 : index
    %4 = vector.load %arg8[%c0_2, %c0_3] : memref<32x128xf32, #tpu.memory_space<vmem>>, vector<32x128xf32>
    %c0_4 = arith.constant 0 : index
    %c0_5 = arith.constant 0 : index
    %5 = vector.load %arg9[%c0_4, %c0_5] : memref<32x128xf32, #tpu.memory_space<vmem>>, vector<32x128xf32>
    %c0_6 = arith.constant 0 : index
    %c0_7 = arith.constant 0 : index
    %6 = vector.load %arg11[%c0_6, %c0_7] : memref<32x128xf32, #tpu.memory_space<vmem>>, vector<32x128xf32>
    %c0_8 = arith.constant 0 : index
    %c0_9 = arith.constant 0 : index
    %7 = vector.load %arg7[%c0_8, %c0_9] : memref<1x128xf32, #tpu.memory_space<vmem>>, vector<1x128xf32>
    %8 = vector.shape_cast %7 : vector<1x128xf32> to vector<1x128xf32>
    %9 = vector.broadcast %8 : vector<1x128xf32> to vector<8x128xf32>
    %c0_10 = arith.constant 0 : index
    %c0_11 = arith.constant 0 : index
    %10 = vector.load %arg10[%c0_10, %c0_11] : memref<1x128xf32, #tpu.memory_space<vmem>>, vector<1x128xf32>
    %11 = vector.shape_cast %10 : vector<1x128xf32> to vector<1x128xf32>
    %12 = vector.broadcast %11 : vector<1x128xf32> to vector<8x128xf32>
    %c0_12 = arith.constant 0 : index
    %c0_13 = arith.constant 0 : index
    %13 = vector.load %arg12[%c0_12, %c0_13] : memref<1x128xf32, #tpu.memory_space<vmem>>, vector<1x128xf32>
    %14 = vector.shape_cast %13 : vector<1x128xf32> to vector<1x128xf32>
    %15 = vector.broadcast %14 : vector<1x128xf32> to vector<8x128xf32>
    %c0_14 = arith.constant 0 : index
    %c0_15 = arith.constant 0 : index
    %c0_16 = arith.constant 0 : index
    %16 = vector.load %arg2[%c0_14, %c0_15, %c0_16] : memref<8x8x128xf32, #tpu.memory_space<vmem>>, vector<8x8x128xf32>
    %17 = vector.shape_cast %16 : vector<8x8x128xf32> to vector<64x128xf32>
    %c0_17 = arith.constant 0 : index
    %c0_18 = arith.constant 0 : index
    %18 = vector.load %arg5[%c0_17, %c0_18] : memref<128x128xf32, #tpu.memory_space<vmem>>, vector<128x128xf32>
    %cst = arith.constant dense<0.000000e+00> : vector<64x128xf32>
    %19 = tpu.matmul %17, %18, %cst {dimension_numbers = #tpu.dot_dimension_numbers<[1], [0], [0], [1], [0, 0, 1, 1], [], []>} : vector<64x128xf32>, vector<128x128xf32>, vector<64x128xf32> -> vector<64x128xf32>
    %c0_19 = arith.constant 0 : index
    %c0_20 = arith.constant 0 : index
    %c0_21 = arith.constant 0 : index
    %20 = vector.load %arg16[%c0_19, %c0_20, %c0_21] : memref<2x8x32xf32, #tpu.memory_space<vmem>>, vector<1x8x32xf32>
    %21 = vector.shape_cast %20 : vector<1x8x32xf32> to vector<8x32xf32>
    %c0_22 = arith.constant 0 : index
    %c0_23 = arith.constant 0 : index
    %c0_24 = arith.constant 0 : index
    %22 = vector.load %arg17[%c0_22, %c0_23, %c0_24] : memref<2x8x32xf32, #tpu.memory_space<vmem>>, vector<1x8x32xf32>
    %23 = vector.shape_cast %22 : vector<1x8x32xf32> to vector<8x32xf32>
    %c1 = arith.constant 1 : index
    %c0_25 = arith.constant 0 : index
    %c0_26 = arith.constant 0 : index
    %24 = vector.load %arg16[%c1, %c0_25, %c0_26] : memref<2x8x32xf32, #tpu.memory_space<vmem>>, vector<1x8x32xf32>
    %25 = vector.shape_cast %24 : vector<1x8x32xf32> to vector<8x32xf32>
    %c1_27 = arith.constant 1 : index
    %c0_28 = arith.constant 0 : index
    %c0_29 = arith.constant 0 : index
    %26 = vector.load %arg17[%c1_27, %c0_28, %c0_29] : memref<2x8x32xf32, #tpu.memory_space<vmem>>, vector<1x8x32xf32>
    %27 = vector.shape_cast %26 : vector<1x8x32xf32> to vector<8x32xf32>
    %28 = vector.extract_strided_slice %19 {offsets = [0, 0], sizes = [8, 128], strides = [1, 1]} : vector<64x128xf32> to vector<8x128xf32>
    %29 = arith.addf %28, %9 : vector<8x128xf32>
    %cst_30 = arith.constant dense<0.000000e+00> : vector<8x128xf32>
    %30 = tpu.matmul %21, %3, %cst_30 {dimension_numbers = #tpu.dot_dimension_numbers<[1], [0], [0], [1], [0, 0, 1, 1], [], []>} : vector<8x32xf32>, vector<32x128xf32>, vector<8x128xf32> -> vector<8x128xf32>
    %31 = arith.addf %29, %30 : vector<8x128xf32>
    %32 = vector.extract_strided_slice %31 {offsets = [0, 0], sizes = [8, 32], strides = [1, 1]} : vector<8x128xf32> to vector<8x32xf32>
    %33 = arith.negf %32 : vector<8x32xf32>
    %34 = math.exp %33 : vector<8x32xf32>
    %cst_31 = arith.constant 1.000000e+00 : f32
    %35 = vector.broadcast %cst_31 : f32 to vector<8x32xf32>
    %36 = arith.addf %35, %34 : vector<8x32xf32>
    %37 = arith.divf %35, %36 : vector<8x32xf32>
    %38 = vector.extract_strided_slice %31 {offsets = [0, 32], sizes = [8, 32], strides = [1, 1]} : vector<8x128xf32> to vector<8x32xf32>
    %39 = arith.negf %38 : vector<8x32xf32>
    %40 = math.exp %39 : vector<8x32xf32>
    %cst_32 = arith.constant 1.000000e+00 : f32
    %41 = vector.broadcast %cst_32 : f32 to vector<8x32xf32>
    %42 = arith.addf %41, %40 : vector<8x32xf32>
    %43 = arith.divf %41, %42 : vector<8x32xf32>
    %44 = vector.extract_strided_slice %31 {offsets = [0, 64], sizes = [8, 32], strides = [1, 1]} : vector<8x128xf32> to vector<8x32xf32>
    %45 = math.tanh %44 : vector<8x32xf32>
    %46 = vector.extract_strided_slice %31 {offsets = [0, 96], sizes = [8, 32], strides = [1, 1]} : vector<8x128xf32> to vector<8x32xf32>
    %47 = arith.negf %46 : vector<8x32xf32>
    %48 = math.exp %47 : vector<8x32xf32>
    %cst_33 = arith.constant 1.000000e+00 : f32
    %49 = vector.broadcast %cst_33 : f32 to vector<8x32xf32>
    %50 = arith.addf %49, %48 : vector<8x32xf32>
    %51 = arith.divf %49, %50 : vector<8x32xf32>
    %52 = arith.mulf %43, %23 : vector<8x32xf32>
    %53 = arith.mulf %37, %45 : vector<8x32xf32>
    %54 = arith.addf %52, %53 : vector<8x32xf32>
    %55 = math.tanh %54 : vector<8x32xf32>
    %56 = arith.mulf %51, %55 : vector<8x32xf32>
    %cst_34 = arith.constant dense<0.000000e+00> : vector<8x128xf32>
    %57 = tpu.matmul %56, %4, %cst_34 {dimension_numbers = #tpu.dot_dimension_numbers<[1], [0], [0], [1], [0, 0, 1, 1], [], []>} : vector<8x32xf32>, vector<32x128xf32>, vector<8x128xf32> -> vector<8x128xf32>
    %cst_35 = arith.constant dense<0.000000e+00> : vector<8x128xf32>
    %58 = tpu.matmul %25, %5, %cst_35 {dimension_numbers = #tpu.dot_dimension_numbers<[1], [0], [0], [1], [0, 0, 1, 1], [], []>} : vector<8x32xf32>, vector<32x128xf32>, vector<8x128xf32> -> vector<8x128xf32>
    %59 = arith.addf %57, %58 : vector<8x128xf32>
    %60 = arith.addf %59, %12 : vector<8x128xf32>
    %61 = vector.extract_strided_slice %60 {offsets = [0, 0], sizes = [8, 32], strides = [1, 1]} : vector<8x128xf32> to vector<8x32xf32>
    %62 = arith.negf %61 : vector<8x32xf32>
    %63 = math.exp %62 : vector<8x32xf32>
    %cst_36 = arith.constant 1.000000e+00 : f32
    %64 = vector.broadcast %cst_36 : f32 to vector<8x32xf32>
    %65 = arith.addf %64, %63 : vector<8x32xf32>
    %66 = arith.divf %64, %65 : vector<8x32xf32>
    %67 = vector.extract_strided_slice %60 {offsets = [0, 32], sizes = [8, 32], strides = [1, 1]} : vector<8x128xf32> to vector<8x32xf32>
    %68 = arith.negf %67 : vector<8x32xf32>
    %69 = math.exp %68 : vector<8x32xf32>
    %cst_37 = arith.constant 1.000000e+00 : f32
    %70 = vector.broadcast %cst_37 : f32 to vector<8x32xf32>
    %71 = arith.addf %70, %69 : vector<8x32xf32>
    %72 = arith.divf %70, %71 : vector<8x32xf32>
    %73 = vector.extract_strided_slice %60 {offsets = [0, 64], sizes = [8, 32], strides = [1, 1]} : vector<8x128xf32> to vector<8x32xf32>
    %74 = math.tanh %73 : vector<8x32xf32>
    %75 = vector.extract_strided_slice %60 {offsets = [0, 96], sizes = [8, 32], strides = [1, 1]} : vector<8x128xf32> to vector<8x32xf32>
    %76 = arith.negf %75 : vector<8x32xf32>
    %77 = math.exp %76 : vector<8x32xf32>
    %cst_38 = arith.constant 1.000000e+00 : f32
    %78 = vector.broadcast %cst_38 : f32 to vector<8x32xf32>
    %79 = arith.addf %78, %77 : vector<8x32xf32>
    %80 = arith.divf %78, %79 : vector<8x32xf32>
    %81 = arith.mulf %72, %27 : vector<8x32xf32>
    %82 = arith.mulf %66, %74 : vector<8x32xf32>
    %83 = arith.addf %81, %82 : vector<8x32xf32>
    %84 = math.tanh %83 : vector<8x32xf32>
    %85 = arith.mulf %80, %84 : vector<8x32xf32>
    %cst_39 = arith.constant dense<0.000000e+00> : vector<8x128xf32>
    %86 = tpu.matmul %85, %6, %cst_39 {dimension_numbers = #tpu.dot_dimension_numbers<[1], [0], [0], [1], [0, 0, 1, 1], [], []>} : vector<8x32xf32>, vector<32x128xf32>, vector<8x128xf32> -> vector<8x128xf32>
    %87 = arith.addf %86, %15 : vector<8x128xf32>
    %c0_40 = arith.constant 0 : index
    %c0_41 = arith.constant 0 : index
    %c0_42 = arith.constant 0 : index
    %88 = vector.load %arg13[%c0_40, %c0_41, %c0_42] : memref<8x8x128xf32, #tpu.memory_space<vmem>>, vector<1x8x128xf32>
    %89 = vector.shape_cast %88 : vector<1x8x128xf32> to vector<8x128xf32>
    %90 = vector.shape_cast %87 : vector<8x128xf32> to vector<1x8x128xf32>
    tpu.vector_store %arg13[%c0_40, %c0_41, %c0_42], %90 {strides = array<i32>} : memref<8x8x128xf32, #tpu.memory_space<vmem>>, vector<1x8x128xf32>,
    %91 = vector.extract_strided_slice %19 {offsets = [8, 0], sizes = [8, 128], strides = [1, 1]} : vector<64x128xf32> to vector<8x128xf32>
    %92 = arith.addf %91, %9 : vector<8x128xf32>
    %cst_43 = arith.constant dense<0.000000e+00> : vector<8x128xf32>
    %93 = tpu.matmul %56, %3, %cst_43 {dimension_numbers = #tpu.dot_dimension_numbers<[1], [0], [0], [1], [0, 0, 1, 1], [], []>} : vector<8x32xf32>, vector<32x128xf32>, vector<8x128xf32> -> vector<8x128xf32>
    %94 = arith.addf %92, %93 : vector<8x128xf32>
    %95 = vector.extract_strided_slice %94 {offsets = [0, 0], sizes = [8, 32], strides = [1, 1]} : vector<8x128xf32> to vector<8x32xf32>
    %96 = arith.negf %95 : vector<8x32xf32>
    %97 = math.exp %96 : vector<8x32xf32>
    %cst_44 = arith.constant 1.000000e+00 : f32
    %98 = vector.broadcast %cst_44 : f32 to vector<8x32xf32>
    %99 = arith.addf %98, %97 : vector<8x32xf32>
    %100 = arith.divf %98, %99 : vector<8x32xf32>
    %101 = vector.extract_strided_slice %94 {offsets = [0, 32], sizes = [8, 32], strides = [1, 1]} : vector<8x128xf32> to vector<8x32xf32>
    %102 = arith.negf %101 : vector<8x32xf32>
    %103 = math.exp %102 : vector<8x32xf32>
    %cst_45 = arith.constant 1.000000e+00 : f32
    %104 = vector.broadcast %cst_45 : f32 to vector<8x32xf32>
    %105 = arith.addf %104, %103 : vector<8x32xf32>
    %106 = arith.divf %104, %105 : vector<8x32xf32>
    %107 = vector.extract_strided_slice %94 {offsets = [0, 64], sizes = [8, 32], strides = [1, 1]} : vector<8x128xf32> to vector<8x32xf32>
    %108 = math.tanh %107 : vector<8x32xf32>
    %109 = vector.extract_strided_slice %94 {offsets = [0, 96], sizes = [8, 32], strides = [1, 1]} : vector<8x128xf32> to vector<8x32xf32>
    %110 = arith.negf %109 : vector<8x32xf32>
    %111 = math.exp %110 : vector<8x32xf32>
    %cst_46 = arith.constant 1.000000e+00 : f32
    %112 = vector.broadcast %cst_46 : f32 to vector<8x32xf32>
    %113 = arith.addf %112, %111 : vector<8x32xf32>
    %114 = arith.divf %112, %113 : vector<8x32xf32>
    %115 = arith.mulf %106, %54 : vector<8x32xf32>
    %116 = arith.mulf %100, %108 : vector<8x32xf32>
    %117 = arith.addf %115, %116 : vector<8x32xf32>
    %118 = math.tanh %117 : vector<8x32xf32>
    %119 = arith.mulf %114, %118 : vector<8x32xf32>
    %cst_47 = arith.constant dense<0.000000e+00> : vector<8x128xf32>
    %120 = tpu.matmul %119, %4, %cst_47 {dimension_numbers = #tpu.dot_dimension_numbers<[1], [0], [0], [1], [0, 0, 1, 1], [], []>} : vector<8x32xf32>, vector<32x128xf32>, vector<8x128xf32> -> vector<8x128xf32>
    %cst_48 = arith.constant dense<0.000000e+00> : vector<8x128xf32>
    %121 = tpu.matmul %85, %5, %cst_48 {dimension_numbers = #tpu.dot_dimension_numbers<[1], [0], [0], [1], [0, 0, 1, 1], [], []>} : vector<8x32xf32>, vector<32x128xf32>, vector<8x128xf32> -> vector<8x128xf32>
    %122 = arith.addf %120, %121 : vector<8x128xf32>
    %123 = arith.addf %122, %12 : vector<8x128xf32>
    %124 = vector.extract_strided_slice %123 {offsets = [0, 0], sizes = [8, 32], strides = [1, 1]} : vector<8x128xf32> to vector<8x32xf32>
    %125 = arith.negf %124 : vector<8x32xf32>
    %126 = math.exp %125 : vector<8x32xf32>
    %cst_49 = arith.constant 1.000000e+00 : f32
    %127 = vector.broadcast %cst_49 : f32 to vector<8x32xf32>
    %128 = arith.addf %127, %126 : vector<8x32xf32>
    %129 = arith.divf %127, %128 : vector<8x32xf32>
    %130 = vector.extract_strided_slice %123 {offsets = [0, 32], sizes = [8, 32], strides = [1, 1]} : vector<8x128xf32> to vector<8x32xf32>
    %131 = arith.negf %130 : vector<8x32xf32>
    %132 = math.exp %131 : vector<8x32xf32>
    %cst_50 = arith.constant 1.000000e+00 : f32
    %133 = vector.broadcast %cst_50 : f32 to vector<8x32xf32>
    %134 = arith.addf %133, %132 : vector<8x32xf32>
    %135 = arith.divf %133, %134 : vector<8x32xf32>
    %136 = vector.extract_strided_slice %123 {offsets = [0, 64], sizes = [8, 32], strides = [1, 1]} : vector<8x128xf32> to vector<8x32xf32>
    %137 = math.tanh %136 : vector<8x32xf32>
    %138 = vector.extract_strided_slice %123 {offsets = [0, 96], sizes = [8, 32], strides = [1, 1]} : vector<8x128xf32> to vector<8x32xf32>
    %139 = arith.negf %138 : vector<8x32xf32>
    %140 = math.exp %139 : vector<8x32xf32>
    %cst_51 = arith.constant 1.000000e+00 : f32
    %141 = vector.broadcast %cst_51 : f32 to vector<8x32xf32>
    %142 = arith.addf %141, %140 : vector<8x32xf32>
    %143 = arith.divf %141, %142 : vector<8x32xf32>
    %144 = arith.mulf %135, %83 : vector<8x32xf32>
    %145 = arith.mulf %129, %137 : vector<8x32xf32>
    %146 = arith.addf %144, %145 : vector<8x32xf32>
    %147 = math.tanh %146 : vector<8x32xf32>
    %148 = arith.mulf %143, %147 : vector<8x32xf32>
    %cst_52 = arith.constant dense<0.000000e+00> : vector<8x128xf32>
    %149 = tpu.matmul %148, %6, %cst_52 {dimension_numbers = #tpu.dot_dimension_numbers<[1], [0], [0], [1], [0, 0, 1, 1], [], []>} : vector<8x32xf32>, vector<32x128xf32>, vector<8x128xf32> -> vector<8x128xf32>
    %150 = arith.addf %149, %15 : vector<8x128xf32>
    %c1_53 = arith.constant 1 : index
    %c0_54 = arith.constant 0 : index
    %c0_55 = arith.constant 0 : index
    %151 = vector.load %arg13[%c1_53, %c0_54, %c0_55] : memref<8x8x128xf32, #tpu.memory_space<vmem>>, vector<1x8x128xf32>
    %152 = vector.shape_cast %151 : vector<1x8x128xf32> to vector<8x128xf32>
    %153 = vector.shape_cast %150 : vector<8x128xf32> to vector<1x8x128xf32>
    tpu.vector_store %arg13[%c1_53, %c0_54, %c0_55], %153 {strides = array<i32>} : memref<8x8x128xf32, #tpu.memory_space<vmem>>, vector<1x8x128xf32>,
    %154 = vector.extract_strided_slice %19 {offsets = [16, 0], sizes = [8, 128], strides = [1, 1]} : vector<64x128xf32> to vector<8x128xf32>
    %155 = arith.addf %154, %9 : vector<8x128xf32>
    %cst_56 = arith.constant dense<0.000000e+00> : vector<8x128xf32>
    %156 = tpu.matmul %119, %3, %cst_56 {dimension_numbers = #tpu.dot_dimension_numbers<[1], [0], [0], [1], [0, 0, 1, 1], [], []>} : vector<8x32xf32>, vector<32x128xf32>, vector<8x128xf32> -> vector<8x128xf32>
    %157 = arith.addf %155, %156 : vector<8x128xf32>
    %158 = vector.extract_strided_slice %157 {offsets = [0, 0], sizes = [8, 32], strides = [1, 1]} : vector<8x128xf32> to vector<8x32xf32>
    %159 = arith.negf %158 : vector<8x32xf32>
    %160 = math.exp %159 : vector<8x32xf32>
    %cst_57 = arith.constant 1.000000e+00 : f32
    %161 = vector.broadcast %cst_57 : f32 to vector<8x32xf32>
    %162 = arith.addf %161, %160 : vector<8x32xf32>
    %163 = arith.divf %161, %162 : vector<8x32xf32>
    %164 = vector.extract_strided_slice %157 {offsets = [0, 32], sizes = [8, 32], strides = [1, 1]} : vector<8x128xf32> to vector<8x32xf32>
    %165 = arith.negf %164 : vector<8x32xf32>
    %166 = math.exp %165 : vector<8x32xf32>
    %cst_58 = arith.constant 1.000000e+00 : f32
    %167 = vector.broadcast %cst_58 : f32 to vector<8x32xf32>
    %168 = arith.addf %167, %166 : vector<8x32xf32>
    %169 = arith.divf %167, %168 : vector<8x32xf32>
    %170 = vector.extract_strided_slice %157 {offsets = [0, 64], sizes = [8, 32], strides = [1, 1]} : vector<8x128xf32> to vector<8x32xf32>
    %171 = math.tanh %170 : vector<8x32xf32>
    %172 = vector.extract_strided_slice %157 {offsets = [0, 96], sizes = [8, 32], strides = [1, 1]} : vector<8x128xf32> to vector<8x32xf32>
    %173 = arith.negf %172 : vector<8x32xf32>
    %174 = math.exp %173 : vector<8x32xf32>
    %cst_59 = arith.constant 1.000000e+00 : f32
    %175 = vector.broadcast %cst_59 : f32 to vector<8x32xf32>
    %176 = arith.addf %175, %174 : vector<8x32xf32>
    %177 = arith.divf %175, %176 : vector<8x32xf32>
    %178 = arith.mulf %169, %117 : vector<8x32xf32>
    %179 = arith.mulf %163, %171 : vector<8x32xf32>
    %180 = arith.addf %178, %179 : vector<8x32xf32>
    %181 = math.tanh %180 : vector<8x32xf32>
    %182 = arith.mulf %177, %181 : vector<8x32xf32>
    %cst_60 = arith.constant dense<0.000000e+00> : vector<8x128xf32>
    %183 = tpu.matmul %182, %4, %cst_60 {dimension_numbers = #tpu.dot_dimension_numbers<[1], [0], [0], [1], [0, 0, 1, 1], [], []>} : vector<8x32xf32>, vector<32x128xf32>, vector<8x128xf32> -> vector<8x128xf32>
    %cst_61 = arith.constant dense<0.000000e+00> : vector<8x128xf32>
    %184 = tpu.matmul %148, %5, %cst_61 {dimension_numbers = #tpu.dot_dimension_numbers<[1], [0], [0], [1], [0, 0, 1, 1], [], []>} : vector<8x32xf32>, vector<32x128xf32>, vector<8x128xf32> -> vector<8x128xf32>
    %185 = arith.addf %183, %184 : vector<8x128xf32>
    %186 = arith.addf %185, %12 : vector<8x128xf32>
    %187 = vector.extract_strided_slice %186 {offsets = [0, 0], sizes = [8, 32], strides = [1, 1]} : vector<8x128xf32> to vector<8x32xf32>
    %188 = arith.negf %187 : vector<8x32xf32>
    %189 = math.exp %188 : vector<8x32xf32>
    %cst_62 = arith.constant 1.000000e+00 : f32
    %190 = vector.broadcast %cst_62 : f32 to vector<8x32xf32>
    %191 = arith.addf %190, %189 : vector<8x32xf32>
    %192 = arith.divf %190, %191 : vector<8x32xf32>
    %193 = vector.extract_strided_slice %186 {offsets = [0, 32], sizes = [8, 32], strides = [1, 1]} : vector<8x128xf32> to vector<8x32xf32>
    %194 = arith.negf %193 : vector<8x32xf32>
    %195 = math.exp %194 : vector<8x32xf32>
    %cst_63 = arith.constant 1.000000e+00 : f32
    %196 = vector.broadcast %cst_63 : f32 to vector<8x32xf32>
    %197 = arith.addf %196, %195 : vector<8x32xf32>
    %198 = arith.divf %196, %197 : vector<8x32xf32>
    %199 = vector.extract_strided_slice %186 {offsets = [0, 64], sizes = [8, 32], strides = [1, 1]} : vector<8x128xf32> to vector<8x32xf32>
    %200 = math.tanh %199 : vector<8x32xf32>
    %201 = vector.extract_strided_slice %186 {offsets = [0, 96], sizes = [8, 32], strides = [1, 1]} : vector<8x128xf32> to vector<8x32xf32>
    %202 = arith.negf %201 : vector<8x32xf32>
    %203 = math.exp %202 : vector<8x32xf32>
    %cst_64 = arith.constant 1.000000e+00 : f32
    %204 = vector.broadcast %cst_64 : f32 to vector<8x32xf32>
    %205 = arith.addf %204, %203 : vector<8x32xf32>
    %206 = arith.divf %204, %205 : vector<8x32xf32>
    %207 = arith.mulf %198, %146 : vector<8x32xf32>
    %208 = arith.mulf %192, %200 : vector<8x32xf32>
    %209 = arith.addf %207, %208 : vector<8x32xf32>
    %210 = math.tanh %209 : vector<8x32xf32>
    %211 = arith.mulf %206, %210 : vector<8x32xf32>
    %cst_65 = arith.constant dense<0.000000e+00> : vector<8x128xf32>
    %212 = tpu.matmul %211, %6, %cst_65 {dimension_numbers = #tpu.dot_dimension_numbers<[1], [0], [0], [1], [0, 0, 1, 1], [], []>} : vector<8x32xf32>, vector<32x128xf32>, vector<8x128xf32> -> vector<8x128xf32>
    %213 = arith.addf %212, %15 : vector<8x128xf32>
    %c2 = arith.constant 2 : index
    %c0_66 = arith.constant 0 : index
    %c0_67 = arith.constant 0 : index
    %214 = vector.load %arg13[%c2, %c0_66, %c0_67] : memref<8x8x128xf32, #tpu.memory_space<vmem>>, vector<1x8x128xf32>
    %215 = vector.shape_cast %214 : vector<1x8x128xf32> to vector<8x128xf32>
    %216 = vector.shape_cast %213 : vector<8x128xf32> to vector<1x8x128xf32>
    tpu.vector_store %arg13[%c2, %c0_66, %c0_67], %216 {strides = array<i32>} : memref<8x8x128xf32, #tpu.memory_space<vmem>>, vector<1x8x128xf32>,
    %217 = vector.extract_strided_slice %19 {offsets = [24, 0], sizes = [8, 128], strides = [1, 1]} : vector<64x128xf32> to vector<8x128xf32>
    %218 = arith.addf %217, %9 : vector<8x128xf32>
    %cst_68 = arith.constant dense<0.000000e+00> : vector<8x128xf32>
    %219 = tpu.matmul %182, %3, %cst_68 {dimension_numbers = #tpu.dot_dimension_numbers<[1], [0], [0], [1], [0, 0, 1, 1], [], []>} : vector<8x32xf32>, vector<32x128xf32>, vector<8x128xf32> -> vector<8x128xf32>
    %220 = arith.addf %218, %219 : vector<8x128xf32>
    %221 = vector.extract_strided_slice %220 {offsets = [0, 0], sizes = [8, 32], strides = [1, 1]} : vector<8x128xf32> to vector<8x32xf32>
    %222 = arith.negf %221 : vector<8x32xf32>
    %223 = math.exp %222 : vector<8x32xf32>
    %cst_69 = arith.constant 1.000000e+00 : f32
    %224 = vector.broadcast %cst_69 : f32 to vector<8x32xf32>
    %225 = arith.addf %224, %223 : vector<8x32xf32>
    %226 = arith.divf %224, %225 : vector<8x32xf32>
    %227 = vector.extract_strided_slice %220 {offsets = [0, 32], sizes = [8, 32], strides = [1, 1]} : vector<8x128xf32> to vector<8x32xf32>
    %228 = arith.negf %227 : vector<8x32xf32>
    %229 = math.exp %228 : vector<8x32xf32>
    %cst_70 = arith.constant 1.000000e+00 : f32
    %230 = vector.broadcast %cst_70 : f32 to vector<8x32xf32>
    %231 = arith.addf %230, %229 : vector<8x32xf32>
    %232 = arith.divf %230, %231 : vector<8x32xf32>
    %233 = vector.extract_strided_slice %220 {offsets = [0, 64], sizes = [8, 32], strides = [1, 1]} : vector<8x128xf32> to vector<8x32xf32>
    %234 = math.tanh %233 : vector<8x32xf32>
    %235 = vector.extract_strided_slice %220 {offsets = [0, 96], sizes = [8, 32], strides = [1, 1]} : vector<8x128xf32> to vector<8x32xf32>
    %236 = arith.negf %235 : vector<8x32xf32>
    %237 = math.exp %236 : vector<8x32xf32>
    %cst_71 = arith.constant 1.000000e+00 : f32
    %238 = vector.broadcast %cst_71 : f32 to vector<8x32xf32>
    %239 = arith.addf %238, %237 : vector<8x32xf32>
    %240 = arith.divf %238, %239 : vector<8x32xf32>
    %241 = arith.mulf %232, %180 : vector<8x32xf32>
    %242 = arith.mulf %226, %234 : vector<8x32xf32>
    %243 = arith.addf %241, %242 : vector<8x32xf32>
    %244 = math.tanh %243 : vector<8x32xf32>
    %245 = arith.mulf %240, %244 : vector<8x32xf32>
    %cst_72 = arith.constant dense<0.000000e+00> : vector<8x128xf32>
    %246 = tpu.matmul %245, %4, %cst_72 {dimension_numbers = #tpu.dot_dimension_numbers<[1], [0], [0], [1], [0, 0, 1, 1], [], []>} : vector<8x32xf32>, vector<32x128xf32>, vector<8x128xf32> -> vector<8x128xf32>
    %cst_73 = arith.constant dense<0.000000e+00> : vector<8x128xf32>
    %247 = tpu.matmul %211, %5, %cst_73 {dimension_numbers = #tpu.dot_dimension_numbers<[1], [0], [0], [1], [0, 0, 1, 1], [], []>} : vector<8x32xf32>, vector<32x128xf32>, vector<8x128xf32> -> vector<8x128xf32>
    %248 = arith.addf %246, %247 : vector<8x128xf32>
    %249 = arith.addf %248, %12 : vector<8x128xf32>
    %250 = vector.extract_strided_slice %249 {offsets = [0, 0], sizes = [8, 32], strides = [1, 1]} : vector<8x128xf32> to vector<8x32xf32>
    %251 = arith.negf %250 : vector<8x32xf32>
    %252 = math.exp %251 : vector<8x32xf32>
    %cst_74 = arith.constant 1.000000e+00 : f32
    %253 = vector.broadcast %cst_74 : f32 to vector<8x32xf32>
    %254 = arith.addf %253, %252 : vector<8x32xf32>
    %255 = arith.divf %253, %254 : vector<8x32xf32>
    %256 = vector.extract_strided_slice %249 {offsets = [0, 32], sizes = [8, 32], strides = [1, 1]} : vector<8x128xf32> to vector<8x32xf32>
    %257 = arith.negf %256 : vector<8x32xf32>
    %258 = math.exp %257 : vector<8x32xf32>
    %cst_75 = arith.constant 1.000000e+00 : f32
    %259 = vector.broadcast %cst_75 : f32 to vector<8x32xf32>
    %260 = arith.addf %259, %258 : vector<8x32xf32>
    %261 = arith.divf %259, %260 : vector<8x32xf32>
    %262 = vector.extract_strided_slice %249 {offsets = [0, 64], sizes = [8, 32], strides = [1, 1]} : vector<8x128xf32> to vector<8x32xf32>
    %263 = math.tanh %262 : vector<8x32xf32>
    %264 = vector.extract_strided_slice %249 {offsets = [0, 96], sizes = [8, 32], strides = [1, 1]} : vector<8x128xf32> to vector<8x32xf32>
    %265 = arith.negf %264 : vector<8x32xf32>
    %266 = math.exp %265 : vector<8x32xf32>
    %cst_76 = arith.constant 1.000000e+00 : f32
    %267 = vector.broadcast %cst_76 : f32 to vector<8x32xf32>
    %268 = arith.addf %267, %266 : vector<8x32xf32>
    %269 = arith.divf %267, %268 : vector<8x32xf32>
    %270 = arith.mulf %261, %209 : vector<8x32xf32>
    %271 = arith.mulf %255, %263 : vector<8x32xf32>
    %272 = arith.addf %270, %271 : vector<8x32xf32>
    %273 = math.tanh %272 : vector<8x32xf32>
    %274 = arith.mulf %269, %273 : vector<8x32xf32>
    %cst_77 = arith.constant dense<0.000000e+00> : vector<8x128xf32>
    %275 = tpu.matmul %274, %6, %cst_77 {dimension_numbers = #tpu.dot_dimension_numbers<[1], [0], [0], [1], [0, 0, 1, 1], [], []>} : vector<8x32xf32>, vector<32x128xf32>, vector<8x128xf32> -> vector<8x128xf32>
    %276 = arith.addf %275, %15 : vector<8x128xf32>
    %c3 = arith.constant 3 : index
    %c0_78 = arith.constant 0 : index
    %c0_79 = arith.constant 0 : index
    %277 = vector.load %arg13[%c3, %c0_78, %c0_79] : memref<8x8x128xf32, #tpu.memory_space<vmem>>, vector<1x8x128xf32>
    %278 = vector.shape_cast %277 : vector<1x8x128xf32> to vector<8x128xf32>
    %279 = vector.shape_cast %276 : vector<8x128xf32> to vector<1x8x128xf32>
    tpu.vector_store %arg13[%c3, %c0_78, %c0_79], %279 {strides = array<i32>} : memref<8x8x128xf32, #tpu.memory_space<vmem>>, vector<1x8x128xf32>,
    %280 = vector.extract_strided_slice %19 {offsets = [32, 0], sizes = [8, 128], strides = [1, 1]} : vector<64x128xf32> to vector<8x128xf32>
    %281 = arith.addf %280, %9 : vector<8x128xf32>
    %cst_80 = arith.constant dense<0.000000e+00> : vector<8x128xf32>
    %282 = tpu.matmul %245, %3, %cst_80 {dimension_numbers = #tpu.dot_dimension_numbers<[1], [0], [0], [1], [0, 0, 1, 1], [], []>} : vector<8x32xf32>, vector<32x128xf32>, vector<8x128xf32> -> vector<8x128xf32>
    %283 = arith.addf %281, %282 : vector<8x128xf32>
    %284 = vector.extract_strided_slice %283 {offsets = [0, 0], sizes = [8, 32], strides = [1, 1]} : vector<8x128xf32> to vector<8x32xf32>
    %285 = arith.negf %284 : vector<8x32xf32>
    %286 = math.exp %285 : vector<8x32xf32>
    %cst_81 = arith.constant 1.000000e+00 : f32
    %287 = vector.broadcast %cst_81 : f32 to vector<8x32xf32>
    %288 = arith.addf %287, %286 : vector<8x32xf32>
    %289 = arith.divf %287, %288 : vector<8x32xf32>
    %290 = vector.extract_strided_slice %283 {offsets = [0, 32], sizes = [8, 32], strides = [1, 1]} : vector<8x128xf32> to vector<8x32xf32>
    %291 = arith.negf %290 : vector<8x32xf32>
    %292 = math.exp %291 : vector<8x32xf32>
    %cst_82 = arith.constant 1.000000e+00 : f32
    %293 = vector.broadcast %cst_82 : f32 to vector<8x32xf32>
    %294 = arith.addf %293, %292 : vector<8x32xf32>
    %295 = arith.divf %293, %294 : vector<8x32xf32>
    %296 = vector.extract_strided_slice %283 {offsets = [0, 64], sizes = [8, 32], strides = [1, 1]} : vector<8x128xf32> to vector<8x32xf32>
    %297 = math.tanh %296 : vector<8x32xf32>
    %298 = vector.extract_strided_slice %283 {offsets = [0, 96], sizes = [8, 32], strides = [1, 1]} : vector<8x128xf32> to vector<8x32xf32>
    %299 = arith.negf %298 : vector<8x32xf32>
    %300 = math.exp %299 : vector<8x32xf32>
    %cst_83 = arith.constant 1.000000e+00 : f32
    %301 = vector.broadcast %cst_83 : f32 to vector<8x32xf32>
    %302 = arith.addf %301, %300 : vector<8x32xf32>
    %303 = arith.divf %301, %302 : vector<8x32xf32>
    %304 = arith.mulf %295, %243 : vector<8x32xf32>
    %305 = arith.mulf %289, %297 : vector<8x32xf32>
    %306 = arith.addf %304, %305 : vector<8x32xf32>
    %307 = math.tanh %306 : vector<8x32xf32>
    %308 = arith.mulf %303, %307 : vector<8x32xf32>
    %cst_84 = arith.constant dense<0.000000e+00> : vector<8x128xf32>
    %309 = tpu.matmul %308, %4, %cst_84 {dimension_numbers = #tpu.dot_dimension_numbers<[1], [0], [0], [1], [0, 0, 1, 1], [], []>} : vector<8x32xf32>, vector<32x128xf32>, vector<8x128xf32> -> vector<8x128xf32>
    %cst_85 = arith.constant dense<0.000000e+00> : vector<8x128xf32>
    %310 = tpu.matmul %274, %5, %cst_85 {dimension_numbers = #tpu.dot_dimension_numbers<[1], [0], [0], [1], [0, 0, 1, 1], [], []>} : vector<8x32xf32>, vector<32x128xf32>, vector<8x128xf32> -> vector<8x128xf32>
    %311 = arith.addf %309, %310 : vector<8x128xf32>
    %312 = arith.addf %311, %12 : vector<8x128xf32>
    %313 = vector.extract_strided_slice %312 {offsets = [0, 0], sizes = [8, 32], strides = [1, 1]} : vector<8x128xf32> to vector<8x32xf32>
    %314 = arith.negf %313 : vector<8x32xf32>
    %315 = math.exp %314 : vector<8x32xf32>
    %cst_86 = arith.constant 1.000000e+00 : f32
    %316 = vector.broadcast %cst_86 : f32 to vector<8x32xf32>
    %317 = arith.addf %316, %315 : vector<8x32xf32>
    %318 = arith.divf %316, %317 : vector<8x32xf32>
    %319 = vector.extract_strided_slice %312 {offsets = [0, 32], sizes = [8, 32], strides = [1, 1]} : vector<8x128xf32> to vector<8x32xf32>
    %320 = arith.negf %319 : vector<8x32xf32>
    %321 = math.exp %320 : vector<8x32xf32>
    %cst_87 = arith.constant 1.000000e+00 : f32
    %322 = vector.broadcast %cst_87 : f32 to vector<8x32xf32>
    %323 = arith.addf %322, %321 : vector<8x32xf32>
    %324 = arith.divf %322, %323 : vector<8x32xf32>
    %325 = vector.extract_strided_slice %312 {offsets = [0, 64], sizes = [8, 32], strides = [1, 1]} : vector<8x128xf32> to vector<8x32xf32>
    %326 = math.tanh %325 : vector<8x32xf32>
    %327 = vector.extract_strided_slice %312 {offsets = [0, 96], sizes = [8, 32], strides = [1, 1]} : vector<8x128xf32> to vector<8x32xf32>
    %328 = arith.negf %327 : vector<8x32xf32>
    %329 = math.exp %328 : vector<8x32xf32>
    %cst_88 = arith.constant 1.000000e+00 : f32
    %330 = vector.broadcast %cst_88 : f32 to vector<8x32xf32>
    %331 = arith.addf %330, %329 : vector<8x32xf32>
    %332 = arith.divf %330, %331 : vector<8x32xf32>
    %333 = arith.mulf %324, %272 : vector<8x32xf32>
    %334 = arith.mulf %318, %326 : vector<8x32xf32>
    %335 = arith.addf %333, %334 : vector<8x32xf32>
    %336 = math.tanh %335 : vector<8x32xf32>
    %337 = arith.mulf %332, %336 : vector<8x32xf32>
    %cst_89 = arith.constant dense<0.000000e+00> : vector<8x128xf32>
    %338 = tpu.matmul %337, %6, %cst_89 {dimension_numbers = #tpu.dot_dimension_numbers<[1], [0], [0], [1], [0, 0, 1, 1], [], []>} : vector<8x32xf32>, vector<32x128xf32>, vector<8x128xf32> -> vector<8x128xf32>
    %339 = arith.addf %338, %15 : vector<8x128xf32>
    %c4 = arith.constant 4 : index
    %c0_90 = arith.constant 0 : index
    %c0_91 = arith.constant 0 : index
    %340 = vector.load %arg13[%c4, %c0_90, %c0_91] : memref<8x8x128xf32, #tpu.memory_space<vmem>>, vector<1x8x128xf32>
    %341 = vector.shape_cast %340 : vector<1x8x128xf32> to vector<8x128xf32>
    %342 = vector.shape_cast %339 : vector<8x128xf32> to vector<1x8x128xf32>
    tpu.vector_store %arg13[%c4, %c0_90, %c0_91], %342 {strides = array<i32>} : memref<8x8x128xf32, #tpu.memory_space<vmem>>, vector<1x8x128xf32>,
    %343 = vector.extract_strided_slice %19 {offsets = [40, 0], sizes = [8, 128], strides = [1, 1]} : vector<64x128xf32> to vector<8x128xf32>
    %344 = arith.addf %343, %9 : vector<8x128xf32>
    %cst_92 = arith.constant dense<0.000000e+00> : vector<8x128xf32>
    %345 = tpu.matmul %308, %3, %cst_92 {dimension_numbers = #tpu.dot_dimension_numbers<[1], [0], [0], [1], [0, 0, 1, 1], [], []>} : vector<8x32xf32>, vector<32x128xf32>, vector<8x128xf32> -> vector<8x128xf32>
    %346 = arith.addf %344, %345 : vector<8x128xf32>
    %347 = vector.extract_strided_slice %346 {offsets = [0, 0], sizes = [8, 32], strides = [1, 1]} : vector<8x128xf32> to vector<8x32xf32>
    %348 = arith.negf %347 : vector<8x32xf32>
    %349 = math.exp %348 : vector<8x32xf32>
    %cst_93 = arith.constant 1.000000e+00 : f32
    %350 = vector.broadcast %cst_93 : f32 to vector<8x32xf32>
    %351 = arith.addf %350, %349 : vector<8x32xf32>
    %352 = arith.divf %350, %351 : vector<8x32xf32>
    %353 = vector.extract_strided_slice %346 {offsets = [0, 32], sizes = [8, 32], strides = [1, 1]} : vector<8x128xf32> to vector<8x32xf32>
    %354 = arith.negf %353 : vector<8x32xf32>
    %355 = math.exp %354 : vector<8x32xf32>
    %cst_94 = arith.constant 1.000000e+00 : f32
    %356 = vector.broadcast %cst_94 : f32 to vector<8x32xf32>
    %357 = arith.addf %356, %355 : vector<8x32xf32>
    %358 = arith.divf %356, %357 : vector<8x32xf32>
    %359 = vector.extract_strided_slice %346 {offsets = [0, 64], sizes = [8, 32], strides = [1, 1]} : vector<8x128xf32> to vector<8x32xf32>
    %360 = math.tanh %359 : vector<8x32xf32>
    %361 = vector.extract_strided_slice %346 {offsets = [0, 96], sizes = [8, 32], strides = [1, 1]} : vector<8x128xf32> to vector<8x32xf32>
    %362 = arith.negf %361 : vector<8x32xf32>
    %363 = math.exp %362 : vector<8x32xf32>
    %cst_95 = arith.constant 1.000000e+00 : f32
    %364 = vector.broadcast %cst_95 : f32 to vector<8x32xf32>
    %365 = arith.addf %364, %363 : vector<8x32xf32>
    %366 = arith.divf %364, %365 : vector<8x32xf32>
    %367 = arith.mulf %358, %306 : vector<8x32xf32>
    %368 = arith.mulf %352, %360 : vector<8x32xf32>
    %369 = arith.addf %367, %368 : vector<8x32xf32>
    %370 = math.tanh %369 : vector<8x32xf32>
    %371 = arith.mulf %366, %370 : vector<8x32xf32>
    %cst_96 = arith.constant dense<0.000000e+00> : vector<8x128xf32>
    %372 = tpu.matmul %371, %4, %cst_96 {dimension_numbers = #tpu.dot_dimension_numbers<[1], [0], [0], [1], [0, 0, 1, 1], [], []>} : vector<8x32xf32>, vector<32x128xf32>, vector<8x128xf32> -> vector<8x128xf32>
    %cst_97 = arith.constant dense<0.000000e+00> : vector<8x128xf32>
    %373 = tpu.matmul %337, %5, %cst_97 {dimension_numbers = #tpu.dot_dimension_numbers<[1], [0], [0], [1], [0, 0, 1, 1], [], []>} : vector<8x32xf32>, vector<32x128xf32>, vector<8x128xf32> -> vector<8x128xf32>
    %374 = arith.addf %372, %373 : vector<8x128xf32>
    %375 = arith.addf %374, %12 : vector<8x128xf32>
    %376 = vector.extract_strided_slice %375 {offsets = [0, 0], sizes = [8, 32], strides = [1, 1]} : vector<8x128xf32> to vector<8x32xf32>
    %377 = arith.negf %376 : vector<8x32xf32>
    %378 = math.exp %377 : vector<8x32xf32>
    %cst_98 = arith.constant 1.000000e+00 : f32
    %379 = vector.broadcast %cst_98 : f32 to vector<8x32xf32>
    %380 = arith.addf %379, %378 : vector<8x32xf32>
    %381 = arith.divf %379, %380 : vector<8x32xf32>
    %382 = vector.extract_strided_slice %375 {offsets = [0, 32], sizes = [8, 32], strides = [1, 1]} : vector<8x128xf32> to vector<8x32xf32>
    %383 = arith.negf %382 : vector<8x32xf32>
    %384 = math.exp %383 : vector<8x32xf32>
    %cst_99 = arith.constant 1.000000e+00 : f32
    %385 = vector.broadcast %cst_99 : f32 to vector<8x32xf32>
    %386 = arith.addf %385, %384 : vector<8x32xf32>
    %387 = arith.divf %385, %386 : vector<8x32xf32>
    %388 = vector.extract_strided_slice %375 {offsets = [0, 64], sizes = [8, 32], strides = [1, 1]} : vector<8x128xf32> to vector<8x32xf32>
    %389 = math.tanh %388 : vector<8x32xf32>
    %390 = vector.extract_strided_slice %375 {offsets = [0, 96], sizes = [8, 32], strides = [1, 1]} : vector<8x128xf32> to vector<8x32xf32>
    %391 = arith.negf %390 : vector<8x32xf32>
    %392 = math.exp %391 : vector<8x32xf32>
    %cst_100 = arith.constant 1.000000e+00 : f32
    %393 = vector.broadcast %cst_100 : f32 to vector<8x32xf32>
    %394 = arith.addf %393, %392 : vector<8x32xf32>
    %395 = arith.divf %393, %394 : vector<8x32xf32>
    %396 = arith.mulf %387, %335 : vector<8x32xf32>
    %397 = arith.mulf %381, %389 : vector<8x32xf32>
    %398 = arith.addf %396, %397 : vector<8x32xf32>
    %399 = math.tanh %398 : vector<8x32xf32>
    %400 = arith.mulf %395, %399 : vector<8x32xf32>
    %cst_101 = arith.constant dense<0.000000e+00> : vector<8x128xf32>
    %401 = tpu.matmul %400, %6, %cst_101 {dimension_numbers = #tpu.dot_dimension_numbers<[1], [0], [0], [1], [0, 0, 1, 1], [], []>} : vector<8x32xf32>, vector<32x128xf32>, vector<8x128xf32> -> vector<8x128xf32>
    %402 = arith.addf %401, %15 : vector<8x128xf32>
    %c5 = arith.constant 5 : index
    %c0_102 = arith.constant 0 : index
    %c0_103 = arith.constant 0 : index
    %403 = vector.load %arg13[%c5, %c0_102, %c0_103] : memref<8x8x128xf32, #tpu.memory_space<vmem>>, vector<1x8x128xf32>
    %404 = vector.shape_cast %403 : vector<1x8x128xf32> to vector<8x128xf32>
    %405 = vector.shape_cast %402 : vector<8x128xf32> to vector<1x8x128xf32>
    tpu.vector_store %arg13[%c5, %c0_102, %c0_103], %405 {strides = array<i32>} : memref<8x8x128xf32, #tpu.memory_space<vmem>>, vector<1x8x128xf32>,
    %406 = vector.extract_strided_slice %19 {offsets = [48, 0], sizes = [8, 128], strides = [1, 1]} : vector<64x128xf32> to vector<8x128xf32>
    %407 = arith.addf %406, %9 : vector<8x128xf32>
    %cst_104 = arith.constant dense<0.000000e+00> : vector<8x128xf32>
    %408 = tpu.matmul %371, %3, %cst_104 {dimension_numbers = #tpu.dot_dimension_numbers<[1], [0], [0], [1], [0, 0, 1, 1], [], []>} : vector<8x32xf32>, vector<32x128xf32>, vector<8x128xf32> -> vector<8x128xf32>
    %409 = arith.addf %407, %408 : vector<8x128xf32>
    %410 = vector.extract_strided_slice %409 {offsets = [0, 0], sizes = [8, 32], strides = [1, 1]} : vector<8x128xf32> to vector<8x32xf32>
    %411 = arith.negf %410 : vector<8x32xf32>
    %412 = math.exp %411 : vector<8x32xf32>
    %cst_105 = arith.constant 1.000000e+00 : f32
    %413 = vector.broadcast %cst_105 : f32 to vector<8x32xf32>
    %414 = arith.addf %413, %412 : vector<8x32xf32>
    %415 = arith.divf %413, %414 : vector<8x32xf32>
    %416 = vector.extract_strided_slice %409 {offsets = [0, 32], sizes = [8, 32], strides = [1, 1]} : vector<8x128xf32> to vector<8x32xf32>
    %417 = arith.negf %416 : vector<8x32xf32>
    %418 = math.exp %417 : vector<8x32xf32>
    %cst_106 = arith.constant 1.000000e+00 : f32
    %419 = vector.broadcast %cst_106 : f32 to vector<8x32xf32>
    %420 = arith.addf %419, %418 : vector<8x32xf32>
    %421 = arith.divf %419, %420 : vector<8x32xf32>
    %422 = vector.extract_strided_slice %409 {offsets = [0, 64], sizes = [8, 32], strides = [1, 1]} : vector<8x128xf32> to vector<8x32xf32>
    %423 = math.tanh %422 : vector<8x32xf32>
    %424 = vector.extract_strided_slice %409 {offsets = [0, 96], sizes = [8, 32], strides = [1, 1]} : vector<8x128xf32> to vector<8x32xf32>
    %425 = arith.negf %424 : vector<8x32xf32>
    %426 = math.exp %425 : vector<8x32xf32>
    %cst_107 = arith.constant 1.000000e+00 : f32
    %427 = vector.broadcast %cst_107 : f32 to vector<8x32xf32>
    %428 = arith.addf %427, %426 : vector<8x32xf32>
    %429 = arith.divf %427, %428 : vector<8x32xf32>
    %430 = arith.mulf %421, %369 : vector<8x32xf32>
    %431 = arith.mulf %415, %423 : vector<8x32xf32>
    %432 = arith.addf %430, %431 : vector<8x32xf32>
    %433 = math.tanh %432 : vector<8x32xf32>
    %434 = arith.mulf %429, %433 : vector<8x32xf32>
    %cst_108 = arith.constant dense<0.000000e+00> : vector<8x128xf32>
    %435 = tpu.matmul %434, %4, %cst_108 {dimension_numbers = #tpu.dot_dimension_numbers<[1], [0], [0], [1], [0, 0, 1, 1], [], []>} : vector<8x32xf32>, vector<32x128xf32>, vector<8x128xf32> -> vector<8x128xf32>
    %cst_109 = arith.constant dense<0.000000e+00> : vector<8x128xf32>
    %436 = tpu.matmul %400, %5, %cst_109 {dimension_numbers = #tpu.dot_dimension_numbers<[1], [0], [0], [1], [0, 0, 1, 1], [], []>} : vector<8x32xf32>, vector<32x128xf32>, vector<8x128xf32> -> vector<8x128xf32>
    %437 = arith.addf %435, %436 : vector<8x128xf32>
    %438 = arith.addf %437, %12 : vector<8x128xf32>
    %439 = vector.extract_strided_slice %438 {offsets = [0, 0], sizes = [8, 32], strides = [1, 1]} : vector<8x128xf32> to vector<8x32xf32>
    %440 = arith.negf %439 : vector<8x32xf32>
    %441 = math.exp %440 : vector<8x32xf32>
    %cst_110 = arith.constant 1.000000e+00 : f32
    %442 = vector.broadcast %cst_110 : f32 to vector<8x32xf32>
    %443 = arith.addf %442, %441 : vector<8x32xf32>
    %444 = arith.divf %442, %443 : vector<8x32xf32>
    %445 = vector.extract_strided_slice %438 {offsets = [0, 32], sizes = [8, 32], strides = [1, 1]} : vector<8x128xf32> to vector<8x32xf32>
    %446 = arith.negf %445 : vector<8x32xf32>
    %447 = math.exp %446 : vector<8x32xf32>
    %cst_111 = arith.constant 1.000000e+00 : f32
    %448 = vector.broadcast %cst_111 : f32 to vector<8x32xf32>
    %449 = arith.addf %448, %447 : vector<8x32xf32>
    %450 = arith.divf %448, %449 : vector<8x32xf32>
    %451 = vector.extract_strided_slice %438 {offsets = [0, 64], sizes = [8, 32], strides = [1, 1]} : vector<8x128xf32> to vector<8x32xf32>
    %452 = math.tanh %451 : vector<8x32xf32>
    %453 = vector.extract_strided_slice %438 {offsets = [0, 96], sizes = [8, 32], strides = [1, 1]} : vector<8x128xf32> to vector<8x32xf32>
    %454 = arith.negf %453 : vector<8x32xf32>
    %455 = math.exp %454 : vector<8x32xf32>
    %cst_112 = arith.constant 1.000000e+00 : f32
    %456 = vector.broadcast %cst_112 : f32 to vector<8x32xf32>
    %457 = arith.addf %456, %455 : vector<8x32xf32>
    %458 = arith.divf %456, %457 : vector<8x32xf32>
    %459 = arith.mulf %450, %398 : vector<8x32xf32>
    %460 = arith.mulf %444, %452 : vector<8x32xf32>
    %461 = arith.addf %459, %460 : vector<8x32xf32>
    %462 = math.tanh %461 : vector<8x32xf32>
    %463 = arith.mulf %458, %462 : vector<8x32xf32>
    %cst_113 = arith.constant dense<0.000000e+00> : vector<8x128xf32>
    %464 = tpu.matmul %463, %6, %cst_113 {dimension_numbers = #tpu.dot_dimension_numbers<[1], [0], [0], [1], [0, 0, 1, 1], [], []>} : vector<8x32xf32>, vector<32x128xf32>, vector<8x128xf32> -> vector<8x128xf32>
    %465 = arith.addf %464, %15 : vector<8x128xf32>
    %c6 = arith.constant 6 : index
    %c0_114 = arith.constant 0 : index
    %c0_115 = arith.constant 0 : index
    %466 = vector.load %arg13[%c6, %c0_114, %c0_115] : memref<8x8x128xf32, #tpu.memory_space<vmem>>, vector<1x8x128xf32>
    %467 = vector.shape_cast %466 : vector<1x8x128xf32> to vector<8x128xf32>
    %468 = vector.shape_cast %465 : vector<8x128xf32> to vector<1x8x128xf32>
    tpu.vector_store %arg13[%c6, %c0_114, %c0_115], %468 {strides = array<i32>} : memref<8x8x128xf32, #tpu.memory_space<vmem>>, vector<1x8x128xf32>,
    %469 = vector.extract_strided_slice %19 {offsets = [56, 0], sizes = [8, 128], strides = [1, 1]} : vector<64x128xf32> to vector<8x128xf32>
    %470 = arith.addf %469, %9 : vector<8x128xf32>
    %cst_116 = arith.constant dense<0.000000e+00> : vector<8x128xf32>
    %471 = tpu.matmul %434, %3, %cst_116 {dimension_numbers = #tpu.dot_dimension_numbers<[1], [0], [0], [1], [0, 0, 1, 1], [], []>} : vector<8x32xf32>, vector<32x128xf32>, vector<8x128xf32> -> vector<8x128xf32>
    %472 = arith.addf %470, %471 : vector<8x128xf32>
    %473 = vector.extract_strided_slice %472 {offsets = [0, 0], sizes = [8, 32], strides = [1, 1]} : vector<8x128xf32> to vector<8x32xf32>
    %474 = arith.negf %473 : vector<8x32xf32>
    %475 = math.exp %474 : vector<8x32xf32>
    %cst_117 = arith.constant 1.000000e+00 : f32
    %476 = vector.broadcast %cst_117 : f32 to vector<8x32xf32>
    %477 = arith.addf %476, %475 : vector<8x32xf32>
    %478 = arith.divf %476, %477 : vector<8x32xf32>
    %479 = vector.extract_strided_slice %472 {offsets = [0, 32], sizes = [8, 32], strides = [1, 1]} : vector<8x128xf32> to vector<8x32xf32>
    %480 = arith.negf %479 : vector<8x32xf32>
    %481 = math.exp %480 : vector<8x32xf32>
    %cst_118 = arith.constant 1.000000e+00 : f32
    %482 = vector.broadcast %cst_118 : f32 to vector<8x32xf32>
    %483 = arith.addf %482, %481 : vector<8x32xf32>
    %484 = arith.divf %482, %483 : vector<8x32xf32>
    %485 = vector.extract_strided_slice %472 {offsets = [0, 64], sizes = [8, 32], strides = [1, 1]} : vector<8x128xf32> to vector<8x32xf32>
    %486 = math.tanh %485 : vector<8x32xf32>
    %487 = vector.extract_strided_slice %472 {offsets = [0, 96], sizes = [8, 32], strides = [1, 1]} : vector<8x128xf32> to vector<8x32xf32>
    %488 = arith.negf %487 : vector<8x32xf32>
    %489 = math.exp %488 : vector<8x32xf32>
    %cst_119 = arith.constant 1.000000e+00 : f32
    %490 = vector.broadcast %cst_119 : f32 to vector<8x32xf32>
    %491 = arith.addf %490, %489 : vector<8x32xf32>
    %492 = arith.divf %490, %491 : vector<8x32xf32>
    %493 = arith.mulf %484, %432 : vector<8x32xf32>
    %494 = arith.mulf %478, %486 : vector<8x32xf32>
    %495 = arith.addf %493, %494 : vector<8x32xf32>
    %496 = math.tanh %495 : vector<8x32xf32>
    %497 = arith.mulf %492, %496 : vector<8x32xf32>
    %cst_120 = arith.constant dense<0.000000e+00> : vector<8x128xf32>
    %498 = tpu.matmul %497, %4, %cst_120 {dimension_numbers = #tpu.dot_dimension_numbers<[1], [0], [0], [1], [0, 0, 1, 1], [], []>} : vector<8x32xf32>, vector<32x128xf32>, vector<8x128xf32> -> vector<8x128xf32>
    %cst_121 = arith.constant dense<0.000000e+00> : vector<8x128xf32>
    %499 = tpu.matmul %463, %5, %cst_121 {dimension_numbers = #tpu.dot_dimension_numbers<[1], [0], [0], [1], [0, 0, 1, 1], [], []>} : vector<8x32xf32>, vector<32x128xf32>, vector<8x128xf32> -> vector<8x128xf32>
    %500 = arith.addf %498, %499 : vector<8x128xf32>
    %501 = arith.addf %500, %12 : vector<8x128xf32>
    %502 = vector.extract_strided_slice %501 {offsets = [0, 0], sizes = [8, 32], strides = [1, 1]} : vector<8x128xf32> to vector<8x32xf32>
    %503 = arith.negf %502 : vector<8x32xf32>
    %504 = math.exp %503 : vector<8x32xf32>
    %cst_122 = arith.constant 1.000000e+00 : f32
    %505 = vector.broadcast %cst_122 : f32 to vector<8x32xf32>
    %506 = arith.addf %505, %504 : vector<8x32xf32>
    %507 = arith.divf %505, %506 : vector<8x32xf32>
    %508 = vector.extract_strided_slice %501 {offsets = [0, 32], sizes = [8, 32], strides = [1, 1]} : vector<8x128xf32> to vector<8x32xf32>
    %509 = arith.negf %508 : vector<8x32xf32>
    %510 = math.exp %509 : vector<8x32xf32>
    %cst_123 = arith.constant 1.000000e+00 : f32
    %511 = vector.broadcast %cst_123 : f32 to vector<8x32xf32>
    %512 = arith.addf %511, %510 : vector<8x32xf32>
    %513 = arith.divf %511, %512 : vector<8x32xf32>
    %514 = vector.extract_strided_slice %501 {offsets = [0, 64], sizes = [8, 32], strides = [1, 1]} : vector<8x128xf32> to vector<8x32xf32>
    %515 = math.tanh %514 : vector<8x32xf32>
    %516 = vector.extract_strided_slice %501 {offsets = [0, 96], sizes = [8, 32], strides = [1, 1]} : vector<8x128xf32> to vector<8x32xf32>
    %517 = arith.negf %516 : vector<8x32xf32>
    %518 = math.exp %517 : vector<8x32xf32>
    %cst_124 = arith.constant 1.000000e+00 : f32
    %519 = vector.broadcast %cst_124 : f32 to vector<8x32xf32>
    %520 = arith.addf %519, %518 : vector<8x32xf32>
    %521 = arith.divf %519, %520 : vector<8x32xf32>
    %522 = arith.mulf %513, %461 : vector<8x32xf32>
    %523 = arith.mulf %507, %515 : vector<8x32xf32>
    %524 = arith.addf %522, %523 : vector<8x32xf32>
    %525 = math.tanh %524 : vector<8x32xf32>
    %526 = arith.mulf %521, %525 : vector<8x32xf32>
    %cst_125 = arith.constant dense<0.000000e+00> : vector<8x128xf32>
    %527 = tpu.matmul %526, %6, %cst_125 {dimension_numbers = #tpu.dot_dimension_numbers<[1], [0], [0], [1], [0, 0, 1, 1], [], []>} : vector<8x32xf32>, vector<32x128xf32>, vector<8x128xf32> -> vector<8x128xf32>
    %528 = arith.addf %527, %15 : vector<8x128xf32>
    %c7 = arith.constant 7 : index
    %c0_126 = arith.constant 0 : index
    %c0_127 = arith.constant 0 : index
    %529 = vector.load %arg13[%c7, %c0_126, %c0_127] : memref<8x8x128xf32, #tpu.memory_space<vmem>>, vector<1x8x128xf32>
    %530 = vector.shape_cast %529 : vector<1x8x128xf32> to vector<8x128xf32>
    %531 = vector.shape_cast %528 : vector<8x128xf32> to vector<1x8x128xf32>
    tpu.vector_store %arg13[%c7, %c0_126, %c0_127], %531 {strides = array<i32>} : memref<8x8x128xf32, #tpu.memory_space<vmem>>, vector<1x8x128xf32>,
    %c0_128 = arith.constant 0 : index
    %c0_129 = arith.constant 0 : index
    %c0_130 = arith.constant 0 : index
    %532 = vector.load %arg16[%c0_128, %c0_129, %c0_130] : memref<2x8x32xf32, #tpu.memory_space<vmem>>, vector<1x8x32xf32>
    %533 = vector.shape_cast %532 : vector<1x8x32xf32> to vector<8x32xf32>
    %534 = vector.shape_cast %497 : vector<8x32xf32> to vector<1x8x32xf32>
    tpu.vector_store %arg16[%c0_128, %c0_129, %c0_130], %534 {strides = array<i32>} : memref<2x8x32xf32, #tpu.memory_space<vmem>>, vector<1x8x32xf32>,
    %c0_131 = arith.constant 0 : index
    %c0_132 = arith.constant 0 : index
    %c0_133 = arith.constant 0 : index
    %535 = vector.load %arg17[%c0_131, %c0_132, %c0_133] : memref<2x8x32xf32, #tpu.memory_space<vmem>>, vector<1x8x32xf32>
    %536 = vector.shape_cast %535 : vector<1x8x32xf32> to vector<8x32xf32>
    %537 = vector.shape_cast %495 : vector<8x32xf32> to vector<1x8x32xf32>
    tpu.vector_store %arg17[%c0_131, %c0_132, %c0_133], %537 {strides = array<i32>} : memref<2x8x32xf32, #tpu.memory_space<vmem>>, vector<1x8x32xf32>,
    %c1_134 = arith.constant 1 : index
    %c0_135 = arith.constant 0 : index
    %c0_136 = arith.constant 0 : index
    %538 = vector.load %arg16[%c1_134, %c0_135, %c0_136] : memref<2x8x32xf32, #tpu.memory_space<vmem>>, vector<1x8x32xf32>
    %539 = vector.shape_cast %538 : vector<1x8x32xf32> to vector<8x32xf32>
    %540 = vector.shape_cast %526 : vector<8x32xf32> to vector<1x8x32xf32>
    tpu.vector_store %arg16[%c1_134, %c0_135, %c0_136], %540 {strides = array<i32>} : memref<2x8x32xf32, #tpu.memory_space<vmem>>, vector<1x8x32xf32>,
    %c1_137 = arith.constant 1 : index
    %c0_138 = arith.constant 0 : index
    %c0_139 = arith.constant 0 : index
    %541 = vector.load %arg17[%c1_137, %c0_138, %c0_139] : memref<2x8x32xf32, #tpu.memory_space<vmem>>, vector<1x8x32xf32>
    %542 = vector.shape_cast %541 : vector<1x8x32xf32> to vector<8x32xf32>
    %543 = vector.shape_cast %524 : vector<8x32xf32> to vector<1x8x32xf32>
    tpu.vector_store %arg17[%c1_137, %c0_138, %c0_139], %543 {strides = array<i32>} : memref<2x8x32xf32, #tpu.memory_space<vmem>>, vector<1x8x32xf32>,
    %c0_i32_140 = arith.constant 0 : i32
    %544 = arith.cmpi eq, %arg1, %c0_i32_140 : i32
    %545 = arith.extui %544 : i1 to i32
    %c0_i32_141 = arith.constant 0 : i32
    %546 = arith.cmpi ne, %545, %c0_i32_141 : i32
    scf.if %546 {
      %c0_142 = arith.constant 0 : index
      %c0_143 = arith.constant 0 : index
      %c0_144 = arith.constant 0 : index
      %547 = vector.load %arg16[%c0_142, %c0_143, %c0_144] : memref<2x8x32xf32, #tpu.memory_space<vmem>>, vector<2x8x32xf32>
      %c0_145 = arith.constant 0 : index
      %c0_146 = arith.constant 0 : index
      %c0_147 = arith.constant 0 : index
      %548 = vector.load %arg14[%c0_145, %c0_146, %c0_147] : memref<2x8x32xf32, #tpu.memory_space<vmem>>, vector<2x8x32xf32>
      tpu.vector_store %arg14[%c0_145, %c0_146, %c0_147], %547 {strides = array<i32>} : memref<2x8x32xf32, #tpu.memory_space<vmem>>, vector<2x8x32xf32>,
      %c0_148 = arith.constant 0 : index
      %c0_149 = arith.constant 0 : index
      %c0_150 = arith.constant 0 : index
      %549 = vector.load %arg17[%c0_148, %c0_149, %c0_150] : memref<2x8x32xf32, #tpu.memory_space<vmem>>, vector<2x8x32xf32>
      %c0_151 = arith.constant 0 : index
      %c0_152 = arith.constant 0 : index
      %c0_153 = arith.constant 0 : index
      %550 = vector.load %arg15[%c0_151, %c0_152, %c0_153] : memref<2x8x32xf32, #tpu.memory_space<vmem>>, vector<2x8x32xf32>
      tpu.vector_store %arg15[%c0_151, %c0_152, %c0_153], %549 {strides = array<i32>} : memref<2x8x32xf32, #tpu.memory_space<vmem>>, vector<2x8x32xf32>,
    } else {
    }
    return
  }
  func.func @transform_0(%arg0: i32, %arg1: i32) -> (i32, i32, i32) {
    %c0_i32 = arith.constant 0 : i32
    %c0_i32_0 = arith.constant 0 : i32
    return %arg1, %arg0, %c0_i32 : i32, i32, i32
  }
  func.func @transform_1(%arg0: i32, %arg1: i32) -> (i32, i32, i32) {
    %c0_i32 = arith.constant 0 : i32
    %c0_i32_0 = arith.constant 0 : i32
    %c0_i32_1 = arith.constant 0 : i32
    return %c0_i32, %arg0, %c0_i32_0 : i32, i32, i32
  }
  func.func @transform_2(%arg0: i32, %arg1: i32) -> (i32, i32, i32) {
    %c0_i32 = arith.constant 0 : i32
    %c0_i32_0 = arith.constant 0 : i32
    %c0_i32_1 = arith.constant 0 : i32
    return %c0_i32, %arg0, %c0_i32_0 : i32, i32, i32
  }
  func.func @transform_3(%arg0: i32, %arg1: i32) -> (i32, i32) {
    %c0_i32 = arith.constant 0 : i32
    %c0_i32_0 = arith.constant 0 : i32
    %c0_i32_1 = arith.constant 0 : i32
    return %c0_i32, %c0_i32_0 : i32, i32
  }
  func.func @transform_4(%arg0: i32, %arg1: i32) -> (i32, i32) {
    %c0_i32 = arith.constant 0 : i32
    %c0_i32_0 = arith.constant 0 : i32
    %c0_i32_1 = arith.constant 0 : i32
    return %c0_i32, %c0_i32_0 : i32, i32
  }
  func.func @transform_5(%arg0: i32, %arg1: i32) -> (i32, i32) {
    %c0_i32 = arith.constant 0 : i32
    %c0_i32_0 = arith.constant 0 : i32
    %c0_i32_1 = arith.constant 0 : i32
    return %c0_i32, %c0_i32_0 : i32, i32
  }
  func.func @transform_6(%arg0: i32, %arg1: i32) -> (i32, i32) {
    %c0_i32 = arith.constant 0 : i32
    %c0_i32_0 = arith.constant 0 : i32
    %c0_i32_1 = arith.constant 0 : i32
    return %c0_i32, %c0_i32_0 : i32, i32
  }
  func.func @transform_7(%arg0: i32, %arg1: i32) -> (i32, i32) {
    %c0_i32 = arith.constant 0 : i32
    %c0_i32_0 = arith.constant 0 : i32
    %c0_i32_1 = arith.constant 0 : i32
    return %c0_i32, %c0_i32_0 : i32, i32
  }
  func.func @transform_8(%arg0: i32, %arg1: i32) -> (i32, i32) {
    %c0_i32 = arith.constant 0 : i32
    %c0_i32_0 = arith.constant 0 : i32
    %c0_i32_1 = arith.constant 0 : i32
    return %c0_i32, %c0_i32_0 : i32, i32
  }
  func.func @transform_9(%arg0: i32, %arg1: i32) -> (i32, i32) {
    %c0_i32 = arith.constant 0 : i32
    %c0_i32_0 = arith.constant 0 : i32
    %c0_i32_1 = arith.constant 0 : i32
    return %c0_i32, %c0_i32_0 : i32, i32
  }
  func.func @transform_10(%arg0: i32, %arg1: i32) -> (i32, i32) {
    %c0_i32 = arith.constant 0 : i32
    %c0_i32_0 = arith.constant 0 : i32
    %c0_i32_1 = arith.constant 0 : i32
    return %c0_i32, %c0_i32_0 : i32, i32
  }
  func.func @transform_11(%arg0: i32, %arg1: i32) -> (i32, i32, i32) {
    %c0_i32 = arith.constant 0 : i32
    %c0_i32_0 = arith.constant 0 : i32
    return %arg1, %arg0, %c0_i32 : i32, i32, i32
  }
  func.func @transform_12(%arg0: i32, %arg1: i32) -> (i32, i32, i32) {
    %c0_i32 = arith.constant 0 : i32
    %c0_i32_0 = arith.constant 0 : i32
    %c0_i32_1 = arith.constant 0 : i32
    return %c0_i32, %arg0, %c0_i32_0 : i32, i32, i32
  }
  func.func @transform_13(%arg0: i32, %arg1: i32) -> (i32, i32, i32) {
    %c0_i32 = arith.constant 0 : i32
    %c0_i32_0 = arith.constant 0 : i32
    %c0_i32_1 = arith.constant 0 : i32
    return %c0_i32, %arg0, %c0_i32_0 : i32, i32, i32
  }
}

</mosaic_0001>

<bundles_post_ra>
// kernel: tpu_custom_call.1
= control target key start
LH: loop header
LB: loop body
LE: loop exit
PB: predicated region body
PF: predicated region fallthrough
CT: control target
= control target key end

     0   :  { %19 = vsyncpa [#allocation5], 0  ;;  %s2757_s0 = inlined_call_operand.hbm [shape: f32[8,8,128], index: 0, kind: input, shape index: {}]   ;;  %s2758_s1 = inlined_call_operand.hbm [shape: f32[2,8,32], index: 1, kind: input, shape index: {}]   ;;  %s2759_s2 = inlined_call_operand.hbm [shape: f32[2,8,32], index: 2, kind: input, shape index: {}]   ;;  %s2760_s3 = inlined_call_operand.hbm [shape: f32[128,128], index: 3, kind: input, shape index: {}]   ;;  %s2761_s4 = inlined_call_operand.hbm [shape: f32[32,128], index: 4, kind: input, shape index: {}]   ;;  %s2762_s5 = inlined_call_operand.vmem [shape: f32[1,128], index: 5, kind: input, shape index: {}]   ;;  %s2763_s6 = inlined_call_operand.hbm [shape: f32[32,128], index: 6, kind: input, shape index: {}]   ;;  %s2764_s7 = inlined_call_operand.hbm [shape: f32[32,128], index: 7, kind: input, shape index: {}]   ;;  %s2765_s8 = inlined_call_operand.vmem [shape: f32[1,128], index: 8, kind: input, shape index: {}]   ;;  %s2766_s9 = inlined_call_operand.hbm [shape: f32[32,128], index: 9, kind: input, shape index: {}]   ;;  %s2767_s10 = inlined_call_operand.vmem [shape: f32[1,128], index: 10, kind: input, shape index: {}]   ;;  %s2768_s11 = inlined_call_operand.hbm [shape: f32[8,8,128], index: 11, kind: output, shape index: {0}]   ;;  %s2769_s12 = inlined_call_operand.hbm [shape: f32[2,8,32], index: 12, kind: output, shape index: {1}]   ;;  %s2770_s13 = inlined_call_operand.hbm [shape: f32[2,8,32], index: 13, kind: output, shape index: {2}]  }
   0x1   :  { %20 = vsyncpa [#allocation8], 0 }
   0x2   :  { %21 = vsyncpa [#allocation11], 0 }
   0x3   :  { %22 = vsyncpa [#allocation14], 0 }
   0x4   :  { %23 = vsyncpa [#allocation17], 0 }
   0x5   :  { %24 = vsyncpa [#allocation6], 0 }
   0x6   :  { %25 = vsyncpa [#allocation20], 0  ;;  %s43_s27 = sshll.u32 %s2758_s1, 4  ;;  %s2221_s28 = smov [#allocation7]   ;;  %s44_s27 = int_to_ptr.hbm [resolvable:$true] %s43_s27 }
   0x7   :  { %s45_s29 = sshll.u32 %s2221_s28, 4  ;;  %s69_s15 = sshll.u32 %s2760_s3, 4  ;;  %s46_s29 = int_to_ptr.vmem [resolvable:$true] %s45_s29  ;;  %s70_s15 = int_to_ptr.hbm [resolvable:$true] %s69_s15 }
   0x8   :  { %s2222_s16 = smov 128   ;;  %s2223_s17 = smov 8  }
   0x9   :  { %51 = dma.hbm_to_vmem [thread:$0]  %s44_s27, 256, %s46_s29, [#allocation8], %s2222_s16, %s2222_s16, %s2223_s17  }
   0xa   :  { %s2224_s18 = smov [#allocation10]   ;;  %s97_s1 = sshll.u32 %s2763_s6, 4  ;;  %s98_s1 = int_to_ptr.hbm [resolvable:$true] %s97_s1 }
   0xb   :  { %s71_s19 = sshll.u32 %s2224_s18, 4  ;;  %s30_s23 = sshll.u32 %s2757_s0, 4  ;;  %s72_s19 = int_to_ptr.vmem [resolvable:$true] %s71_s19  ;;  %s31_s23 = int_to_ptr.hbm [resolvable:$true] %s30_s23 }
   0xc   :  { %77 = dma.hbm_to_vmem [thread:$0]  %s70_s15, 2048, %s72_s19, [#allocation11], %s2222_s16, %s2222_s16, %s2223_s17  }
   0xd   :  { %s2225_s24 = smov [#allocation13]   ;;  %s2226_s26 = smov [#allocation4]  }
   0xe   :  { %s99_s25 = sshll.u32 %s2225_s24, 4  ;;  %s32_s6 = sshll.u32 %s2226_s26, 4  ;;  %s100_s25 = int_to_ptr.vmem [resolvable:$true] %s99_s25  ;;  %s33_s6 = int_to_ptr.vmem [resolvable:$true] %s32_s6 }
   0xf   :  { %105 = dma.hbm_to_vmem [thread:$0]  %s98_s1, 512, %s100_s25, [#allocation14], %s2222_s16, %s2222_s16, %s2223_s17  }
  0x10   :  { %s56_s29 = sshll.u32 %s2759_s2, 4  ;;  %s82_s14 = sshll.u32 %s2761_s4, 4  ;;  %s57_s29 = int_to_ptr.hbm [resolvable:$true] %s56_s29  ;;  %s83_s14 = int_to_ptr.hbm [resolvable:$true] %s82_s14 }
  0x11   :  { %38 = dma.hbm_to_vmem [thread:$0]  %s31_s23, 1024, %s33_s6, [#allocation5], %s2222_s16, %s2222_s16, %s2223_s17  }
  0x12   :  { %s2227_s15 = smov [#allocation9]   ;;  %s2228_s19 = smov [#allocation12]  }
  0x13   :  { %s58_s18 = sshll.u32 %s2227_s15, 4  ;;  %s84_s2 = sshll.u32 %s2228_s19, 4  ;;  %s59_s18 = int_to_ptr.vmem [resolvable:$true] %s58_s18  ;;  %s85_s2 = int_to_ptr.vmem [resolvable:$true] %s84_s2 }
  0x14   :  { %64 = dma.hbm_to_vmem [thread:$0]  %s57_s29, 256, %s59_s18, [#allocation8], %s2222_s16, %s2222_s16, %s2223_s17  }
  0x15   :  { %s110_s1 = sshll.u32 %s2764_s7, 4  ;;  %s125_s22 = sshll.u32 %s2766_s9, 4  ;;  %s111_s1 = int_to_ptr.hbm [resolvable:$true] %s110_s1  ;;  %s126_s22 = int_to_ptr.hbm [resolvable:$true] %s125_s22 }
  0x16   :  { %90 = dma.hbm_to_vmem [thread:$0]  %s83_s14, 512, %s85_s2, [#allocation11], %s2222_s16, %s2222_s16, %s2223_s17  }
  0x17   :  { %s2229_s23 = smov [#allocation15]   ;;  %s2230_s25 = smov [#allocation16]  }
  0x18   :  { %s112_s24 = sshll.u32 %s2229_s23, 4  ;;  %s127_s7 = sshll.u32 %s2230_s25, 4  ;;  %s113_s24 = int_to_ptr.vmem [resolvable:$true] %s112_s24  ;;  %s128_s7 = int_to_ptr.vmem [resolvable:$true] %s127_s7 }
  0x19   :  { %118 = dma.hbm_to_vmem [thread:$0]  %s111_s1, 512, %s113_s24, [#allocation14], %s2222_s16, %s2222_s16, %s2223_s17  }
  0x1a   :  { %133 = dma.hbm_to_vmem [thread:$0]  %s126_s22, 512, %s128_s7, [#allocation17], %s2222_s16, %s2222_s16, %s2223_s17  }
  0x1b   :  { %2207 = dma.done.wait [#allocation5], 1024  }
  0x1c   :  { %2208 = vsyncadd [#allocation5], 4294966272 }
  0x1d   :  { %2209 = dma.done.wait [#allocation8], 512  }
  0x1e   :  { %2210 = vsyncadd [#allocation8], 4294966784 }
  0x1f   :  { %2211 = dma.done.wait [#allocation11], 2560  }
  0x20   :  { %2212 = vsyncadd [#allocation11], 4294964736 }
  0x21   :  { %2213 = dma.done.wait [#allocation14], 1024  }
  0x22   :  { %2214 = vsyncadd [#allocation14], 4294966272 }
  0x23   :  { %2215 = dma.done.wait [#allocation17], 512  }
  0x24   :  { %2216 = vsyncadd [#allocation17], 4294966784  ;;  %v232_v0 = vld [vmem:[#allocation10 + $0x78] sm:$0xff]  ;;  %v231_v1 = vld [vmem:[#allocation10 + $0x70] sm:$0xff]  ;;  %vm174_vm0 = vcmask 261120   ;;  %s2231_s6 = smov 64  }
  0x25   :  { %233 = vmatpush.msra.mxu0 %v232_v0  ;;  %v230_v2 = vld [vmem:[#allocation10 + $0x68] sm:$0xff]  ;;  %v229_v3 = vld [vmem:[#allocation10 + $0x60] sm:$0xff]  ;;  %v2355_v4 = vld [vmem:[#allocation12 + $0x18] sm:$0xff]  ;;  %s2232_s27 = smov 32   ;;  %s2234_s2 = smov [#allocation19]  }
  0x26   :  { %297 = vmatpush.msra.mxu1 %v2355_v4  ;;  %v2358_v5 = vld [vmem:[#allocation12 + $0x10] sm:$0xff]  ;;  %v228_v6 = vld [vmem:[#allocation10 + $0x58] sm:$0xff]  ;;  %v2360_v7 = vld [vmem:[#allocation12 + $0x8] sm:$0xff]  ;;  %s1688_s20 = sshll.u32 %s2234_s2, 4  ;;  %s1690_s4 = sshll.u32 %s2769_s12, 4  ;;  %s1689_s20 = int_to_ptr.vmem [resolvable:$true] %s1688_s20  ;;  %s1691_s4 = int_to_ptr.hbm [resolvable:$true] %s1690_s4 }
  0x27   :  { %234 = vmatpush.msra.mxu0 %v231_v1  ;;  %v227_v8 = vld [vmem:[#allocation10 + $0x50] sm:$0xff]  ;;  %v172_v9 = vld [vmem:[#allocation7] sm:$0xff]  ;;  %v226_v11 = vld [vmem:[#allocation10 + $0x48] sm:$0xff]  ;;  %s2235_s3 = smov [#allocation21]   ;;  %s1703_s25 = sshll.u32 %s2770_s13, 4  ;;  %s1704_s25 = int_to_ptr.hbm [resolvable:$true] %s1703_s25 }
  0x28   :  { %298 = vmatpush.msra.mxu1 %v2358_v5  ;;  %v2363_v10 = vld [vmem:[#allocation12] sm:$0xff]  ;;  %175 = vst.msk [vmem:[#allocation2] sm:$0xff] %vm174_vm0, %v172_v9  ;;  %v224_v13 = vld [vmem:[#allocation10 + $0x38] sm:$0xff]  ;;  %v223_v15 = vld [vmem:[#allocation10 + $0x30] sm:$0xff]  ;;  %s1701_s22 = sshll.u32 %s2235_s3, 4  ;;  %s2236_s12 = smov [#allocation18]   ;;  %s1702_s22 = int_to_ptr.vmem [resolvable:$true] %s1701_s22 }
  0x29   :  { %235 = vmatpush.msra.mxu0 %v230_v2  ;;  %v225_v12 = vld [vmem:[#allocation10 + $0x40] sm:$0xff]  ;;  %v222_v16 = vld [vmem:[#allocation10 + $0x28] sm:$0xff]  ;;  %v220_v18 = vld [vmem:[#allocation10 + $0x18] sm:$0xff]  ;;  %s1675_s7 = sshll.u32 %s2236_s12, 4  ;;  %s1676_s7 = int_to_ptr.vmem [resolvable:$true] %s1675_s7 }
  0x2a   :  { %299 = vmatpush.msra.mxu1 %v2360_v7  ;;  %v221_v17 = vld [vmem:[#allocation10 + $0x20] sm:$0xff]  ;;  %v219_v19 = vld [vmem:[#allocation10 + $0x10] sm:$0xff]  ;;  %v218_v20 = vld [vmem:[#allocation10 + $0x8] sm:$0xff] }
  0x2b   :  { %236 = vmatpush.msra.mxu0 %v229_v3  ;;  %v217_v21 = vld [vmem:[#allocation10] sm:$0xff]  ;;  %v177_v23 = vld [vmem:[#allocation9] sm:$0xff]  ;;  %v2383_v51 = vld [vmem:[#allocation15 + $0x18] sm:$0xff] }
  0x2c   :  { %300 = vmatpush.msra.mxu1 %v2363_v10  ;;  %v209_v22 = vld [vmem:[#allocation4] sm:$0xff]  ;;  %179 = vst.msk [vmem:[#allocation3] sm:$0xff] %vm174_vm0, %v177_v23  ;;  %v2385_v52 = vld [vmem:[#allocation15 + $0x10] sm:$0xff]  ;;  %362 = vmatpush.msra.mxu2 %v2383_v51  ;;  %v173_v53 = vld [vmem:[#allocation7 + $0x8] sm:$0xff] }
  0x2d   :  { %237 = vmatpush.msra.mxu0 %v228_v6  ;;  %v2373_v24 = vld [vmem:[%s2762_s5] ss:$0 sm:$0xff]  ;;  %v2388_v54 = vld [vmem:[#allocation13 + $0x18] sm:$0xff]  ;;  %v2390_v55 = vld [vmem:[#allocation15 + $0x8] sm:$0xff]  ;;  %176 = vst.msk [vmem:[#allocation2 + $0x8] sm:$0xff] %vm174_vm0, %v173_v53 }
  0x2e   :  { %387 = vmatpush.msra.mxu3 %v2388_v54  ;;  %v2394_v56 = vld [vmem:[#allocation13 + $0x10] sm:$0xff]  ;;  %363 = vmatpush.msra.mxu2 %v2385_v52  ;;  %v2397_v57 = vld [vmem:[#allocation13 + $0x8] sm:$0xff]  ;;  %v2399_v58 = vld [vmem:[#allocation15] sm:$0xff] }
  0x2f   :  { %238 = vmatpush.msra.mxu0 %v227_v8  ;;  %v274_v14 = vld [vmem:[#allocation2] sm:$0xff]  ;;  %v210_v63 = vld [vmem:[#allocation4 + $0x8] sm:$0xff]  ;;  %v178_v0 = vld [vmem:[#allocation9 + $0x8] sm:$0xff] }
  0x30   :  { %1729 = vmatmul.msk.f32.vlgmr.msra.gmra.mxu1 %vm174_vm0, %v274_v14  ;;  %388 = vmatpush.msra.mxu3 %v2394_v56  ;;  %v2403_v59 = vld [vmem:[#allocation13] sm:$0xff]  ;;  %180 = vst.msk [vmem:[#allocation3 + $0x8] sm:$0xff] %vm174_vm0, %v178_v0 }
  0x31   :  { %239 = vmatpush.msra.mxu0 %v226_v11  ;;  %364 = vmatpush.msra.mxu2 %v2390_v55  ;;  %v2430_v9 = vld [vmem:[%s2765_s8] ss:$0 sm:$0xff] }
  0x32   :  { %389 = vmatpush.msra.mxu3 %v2397_v57 }
  0x33   :  { %240 = vmatpush.msra.mxu0 %v225_v12  ;;  %v275_v30 = vld [vmem:[#allocation3] sm:$0xff]  ;;  %365 = vmatpush.msra.mxu2 %v2399_v58 }
  0x34   :  { %390 = vmatpush.msra.mxu3 %v2403_v59  ;;  %v277_v60 = vld [vmem:[#allocation2 + $0x8] sm:$0xff] }
  0x35   :  { %241 = vmatpush.msra.mxu0 %v224_v13  ;;  %476 = vmatpush.msrb.mxu2 %v2355_v4 }
  0x36   :  { %534 = vmatpush.msrb.mxu3 %v2383_v51  ;;  %1731 = vmatmul.msk.f32.vlgmr.msra.gmra.mxu2 %vm174_vm0, %v277_v60 }
  0x37   :  { %242 = vmatpush.msra.mxu0 %v223_v15  ;;  %477 = vmatpush.msrb.mxu2 %v2358_v5  ;;  %v279_v1 = vld [vmem:[#allocation3 + $0x8] sm:$0xff] }
  0x38   :  { %535 = vmatpush.msrb.mxu3 %v2385_v52 }
  0x39   :  { %243 = vmatpush.msra.mxu0 %v222_v16  ;;  %478 = vmatpush.msrb.mxu2 %v2360_v7 }
  0x3a   :  { %536 = vmatpush.msrb.mxu3 %v2390_v55 }
  0x3b   :  { %244 = vmatpush.msra.mxu0 %v221_v17  ;;  %479 = vmatpush.msrb.mxu2 %v2363_v10 }
  0x3c   :  { %537 = vmatpush.msrb.mxu3 %v2399_v58 }
  0x3d   :  { %245 = vmatpush.msra.mxu0 %v220_v18 }
  0x3f   :  { %246 = vmatpush.msra.mxu0 %v219_v19 }
  0x41   :  { %247 = vmatpush.msra.mxu0 %v218_v20 }
  0x43   :  { %248 = vmatpush.msra.mxu0 %v217_v21 }
  0x44   :  { %249 = vmatmul.f32.vlgmr.msra.gmra.mxu0 %v209_v22 }
  0x4c   :  { %252 = vmatmul.f32.gmra.mxu0 %v210_v63 }
  0xad   :  { %v302_v26 = vpop.f32.mrf.mxu1 }
  0xb9   :  { %v367_v3 = vpop.f32.mrf.mxu2 }
  0xc1   :  { %v250_v25 = vpop.f32.mrf.mxu0 }
  0xc2   :  { %v280_v27 = vadd.f32 %v2373_v24, %v250_v25 }
  0xc4   :  { %v305_v28 = vadd.f32 %v302_v26, %v280_v27 }
  0xc6   :  { %1796 = vtanh.f32 %v305_v28  ;;  %v1730_v31 = vmul.f32 -1.442695, %v305_v28 }
  0xc8   :  { %1798 = vpow2.f32 %v1730_v31 }
  0xc9   :  { %v253_v6 = vpop.f32.mrf.mxu0 }
  0xca   :  { %v463_v8 = vadd.f32 %v2373_v24, %v253_v6  ;;  %v2448_v6 = vld [vmem:[#allocation16 + $0x10] sm:$0xff] }
  0xcc   :  { %v1797_v29 = vpop.eup %1796 }
  0xcd   :  { %332 = vrot.lane.b32.xlu0 %v1797_v29, %s2231_s6 }
  0xce   :  { %v1799_v32 = vpop.eup %1798 }
  0xcf   :  { %v309_v33 = vadd.f32 1.0, %v1799_v32 }
  0xd1   :  { %1800 = vrcp.f32 %v309_v33  ;;  %v321_v39 = vand.u32 2147483648, %v309_v33  ;;  %vm315_vm2 = vweird.f32 %v309_v33  ;;  %v319_v40 = vand.u32 2147483647, %v309_v33 }
  0xd3   :  { %v322_v42 = vor.u32 1.1754944e-38, %v321_v39  ;;  %vm320_vm4 = vcmp.eq.f32.partialorder %v319_v40, 8.507059e+37 }
  0xd5   :  { %327 = vrot.lane.b32.xlu0 %v275_v30, %s2232_s27 }
  0xd7   :  { %v1801_v34 = vpop.eup %1800 }
  0xd8   :  { %v311_v35 = vmul.f32 %v1801_v34, %v309_v33  ;;  %vm316_vm1 = vweird.f32 %v1801_v34 }
  0xd9   :  { %vm317_vm3 = vmor %vm315_vm2, %vm316_vm1 }
  0xda   :  { %v312_v36 = vsub.f32 1.0, %v311_v35 }
  0xdc   :  { %v313_v37 = vmul.f32 %v1801_v34, %v312_v36 }
  0xde   :  { %v314_v38 = vadd.f32 %v1801_v34, %v313_v37 }
  0xe0   :  { %v318_v41 = vsel %vm317_vm3, %v1801_v34, %v314_v38 }
  0xe1   :  { %v323_v44 = vsel %vm320_vm4, %v322_v42, %v318_v41 }
 0x13f   :  { %v333_v43 = vpop.permute.xlu0 %332 }
 0x140   :  { %v335_v45 = vmul.f32 %v333_v43, %v323_v44 }
 0x142   :  { %337 = vrot.lane.b32.xlu1 %v335_v45, %s2232_s27 }
 0x147   :  { %v328_v46 = vpop.permute.xlu0 %327 }
 0x148   :  { %v330_v47 = vmul.f32 %v328_v46, %v323_v44 }
 0x1b4   :  { %v338_v48 = vpop.permute.xlu1 %337 }
 0x1b5   :  { %v2379_v49 = vadd.f32 %v338_v48, %v330_v47 }
 0x1b7   :  { %1802 = vtanh.f32 %v2379_v49 }
 0x1bd   :  { %v1803_v50 = vpop.eup %1802 }
 0x1be   :  { %343 = vrot.lane.b32.xlu1 %v1803_v50, %s2231_s6 }
 0x1c6   :  { %417 = vrot.lane.b32.xlu1 %v279_v1, %s2232_s27 }
 0x230   :  { %v344_v61 = vpop.permute.xlu1 %343 }
 0x231   :  { %v346_v62 = vmul.f32 %v344_v61, %v323_v44 }
 0x233   :  { %371 = vrot.lane.b32.xlu2 %v346_v62, %s2232_s27 }
 0x238   :  { %v418_v50 = vpop.permute.xlu1 %417 }
 0x28d   :  { %v372_v2 = vpop.permute.xlu2 %371 }
 0x28e   :  { %1732 = vmatmul.msk.f32.vlgmr.msra.gmra.mxu3 %vm174_vm0, %v372_v2  ;;  %1735 = vmatmul.msk.f32.vlgmr.msrb.gmra.mxu2 %vm174_vm0, %v372_v2 }
 0x28f   :  { %645 = vmatpush.msra.mxu3 %v2355_v4 }
 0x291   :  { %646 = vmatpush.msra.mxu3 %v2358_v5 }
 0x293   :  { %647 = vmatpush.msra.mxu3 %v2360_v7 }
 0x295   :  { %648 = vmatpush.msra.mxu3 %v2363_v10 }
 0x311   :  { %v392_v11 = vpop.f32.mrf.mxu3  ;;  %v481_v12 = vpop.f32.mrf.mxu2 }
 0x312   :  { %v393_v13 = vadd.f32 %v392_v11, %v367_v3  ;;  %v484_v14 = vadd.f32 %v481_v12, %v463_v8  ;;  %v2446_v3 = vld [vmem:[#allocation16 + $0x18] sm:$0xff]  ;;  %v2452_v8 = vld [vmem:[#allocation16 + $0x8] sm:$0xff] }
 0x313   :  { %454 = vmatpush.msrb.mxu1 %v2446_v3  ;;  %622 = vmatpush.msra.mxu2 %v2446_v3 }
 0x314   :  { %v395_v15 = vadd.f32 %v2430_v9, %v393_v13  ;;  %1804 = vtanh.f32 %v484_v14  ;;  %v1736_v21 = vmul.f32 -1.442695, %v484_v14 }
 0x315   :  { %455 = vmatpush.msrb.mxu1 %v2448_v6  ;;  %623 = vmatpush.msra.mxu2 %v2448_v6 }
 0x316   :  { %1806 = vtanh.f32 %v395_v15  ;;  %v1733_v18 = vmul.f32 -1.442695, %v395_v15  ;;  %v211_v15 = vld [vmem:[#allocation4 + $0x10] sm:$0xff] }
 0x317   :  { %456 = vmatpush.msrb.mxu1 %v2452_v8  ;;  %624 = vmatpush.msra.mxu2 %v2452_v8 }
 0x318   :  { %1808 = vpow2.f32 %v1733_v18  ;;  %255 = vmatmul.f32.gmra.mxu0 %v211_v15  ;;  %v2495_v18 = vld [vmem:[%s2767_s10] ss:$0 sm:$0xff] }
 0x31a   :  { %v1805_v16 = vpop.eup %1804 }
 0x31b   :  { %507 = vrot.lane.b32.xlu0 %v1805_v16, %s2231_s6 }
 0x31c   :  { %v1807_v17 = vpop.eup %1806 }
 0x31d   :  { %422 = vrot.lane.b32.xlu2 %v1807_v17, %s2231_s6 }
 0x31e   :  { %v1809_v19 = vpop.eup %1808 }
 0x31f   :  { %v399_v20 = vadd.f32 1.0, %v1809_v19 }
 0x321   :  { %1810 = vrcp.f32 %v399_v20  ;;  %v411_v30 = vand.u32 2147483648, %v399_v20  ;;  %vm405_vm6 = vweird.f32 %v399_v20  ;;  %v409_v31 = vand.u32 2147483647, %v399_v20 }
 0x322   :  { %1812 = vpow2.f32 %v1736_v21 }
 0x323   :  { %v412_v33 = vor.u32 1.1754944e-38, %v411_v30  ;;  %vm410_vm8 = vcmp.eq.f32.partialorder %v409_v31, 8.507059e+37 }
 0x327   :  { %v1811_v22 = vpop.eup %1810 }
 0x328   :  { %v401_v23 = vmul.f32 %v1811_v22, %v399_v20  ;;  %v1813_v26 = vpop.eup %1812  ;;  %vm406_vm5 = vweird.f32 %v1811_v22 }
 0x329   :  { %v488_v28 = vadd.f32 1.0, %v1813_v26  ;;  %vm407_vm7 = vmor %vm405_vm6, %vm406_vm5 }
 0x32a   :  { %v402_v25 = vsub.f32 1.0, %v401_v23 }
 0x32b   :  { %1814 = vrcp.f32 %v488_v28  ;;  %v500_v42 = vand.u32 2147483648, %v488_v28  ;;  %vm494_vm10 = vweird.f32 %v488_v28  ;;  %v498_v43 = vand.u32 2147483647, %v488_v28 }
 0x32c   :  { %v403_v27 = vmul.f32 %v1811_v22, %v402_v25 }
 0x32d   :  { %v501_v45 = vor.u32 1.1754944e-38, %v500_v42  ;;  %vm499_vm12 = vcmp.eq.f32.partialorder %v498_v43, 8.507059e+37 }
 0x32e   :  { %v404_v29 = vadd.f32 %v1811_v22, %v403_v27 }
 0x330   :  { %v408_v32 = vsel %vm407_vm7, %v1811_v22, %v404_v29 }
 0x331   :  { %v1815_v34 = vpop.eup %1814  ;;  %v413_v35 = vsel %vm410_vm8, %v412_v33, %v408_v32 }
 0x332   :  { %v490_v38 = vmul.f32 %v1815_v34, %v488_v28  ;;  %vm495_vm9 = vweird.f32 %v1815_v34  ;;  %v420_v53 = vmul.f32 %v418_v50, %v413_v35 }
 0x333   :  { %vm496_vm11 = vmor %vm494_vm10, %vm495_vm9 }
 0x334   :  { %v491_v39 = vsub.f32 1.0, %v490_v38 }
 0x336   :  { %v492_v40 = vmul.f32 %v1815_v34, %v491_v39 }
 0x338   :  { %v493_v41 = vadd.f32 %v1815_v34, %v492_v40 }
 0x33a   :  { %v497_v44 = vsel %vm496_vm11, %v1815_v34, %v493_v41 }
 0x33b   :  { %v502_v47 = vsel %vm499_vm12, %v501_v45, %v497_v44 }
 0x33c   :  { %v505_v63 = vmul.f32 %v502_v47, %v2379_v49  ;;  %v2456_v49 = vld [vmem:[#allocation16] sm:$0xff] }
 0x33d   :  { %457 = vmatpush.msrb.mxu1 %v2456_v49  ;;  %625 = vmatpush.msra.mxu2 %v2456_v49 }
 0x33f   :  { %559 = vmatpush.msra.mxu1 %v2388_v54  ;;  %728 = vmatpush.msrb.mxu2 %v2388_v54 }
 0x341   :  { %560 = vmatpush.msra.mxu1 %v2394_v56  ;;  %729 = vmatpush.msrb.mxu2 %v2394_v56 }
 0x343   :  { %561 = vmatpush.msra.mxu1 %v2397_v57  ;;  %730 = vmatpush.msrb.mxu2 %v2397_v57 }
 0x345   :  { %562 = vmatpush.msra.mxu1 %v2403_v59  ;;  %731 = vmatpush.msrb.mxu2 %v2403_v59 }
 0x377   :  { %v423_v36 = vpop.permute.xlu2 %422 }
 0x378   :  { %v425_v37 = vmul.f32 %v423_v36, %v413_v35 }
 0x37a   :  { %427 = vrot.lane.b32.xlu2 %v425_v37, %s2232_s27 }
 0x38d   :  { %v508_v46 = vpop.permute.xlu0 %507 }
 0x38e   :  { %v510_v48 = vmul.f32 %v508_v46, %v502_v47 }
 0x390   :  { %512 = vrot.lane.b32.xlu0 %v510_v48, %s2232_s27 }
 0x395   :  { %v256_v23 = vpop.f32.mrf.mxu0 }
 0x396   :  { %v632_v27 = vadd.f32 %v2373_v24, %v256_v23 }
 0x3d4   :  { %v428_v60 = vpop.permute.xlu2 %427 }
 0x3d5   :  { %v2437_v61 = vadd.f32 %v428_v60, %v420_v53 }
 0x3d7   :  { %1816 = vtanh.f32 %v2437_v61 }
 0x3dd   :  { %v1817_v62 = vpop.eup %1816 }
 0x3de   :  { %433 = vrot.lane.b32.xlu1 %v1817_v62, %s2231_s6 }
 0x402   :  { %v513_v0 = vpop.permute.xlu0 %512 }
 0x403   :  { %v2442_v1 = vadd.f32 %v513_v0, %v505_v63 }
 0x405   :  { %1818 = vtanh.f32 %v2442_v1 }
 0x40b   :  { %v1819_v2 = vpop.eup %1818 }
 0x40c   :  { %518 = vrot.lane.b32.xlu2 %v1819_v2, %s2231_s6 }
 0x450   :  { %v434_v11 = vpop.permute.xlu1 %433 }
 0x451   :  { %v436_v12 = vmul.f32 %v434_v11, %v413_v35 }
 0x453   :  { %438 = vrot.lane.b32.xlu0 %v436_v12, %s2232_s27 }
 0x466   :  { %v519_v13 = vpop.permute.xlu2 %518 }
 0x467   :  { %v521_v14 = vmul.f32 %v519_v13, %v502_v47 }
 0x469   :  { %543 = vrot.lane.b32.xlu1 %v521_v14, %s2232_s27 }
 0x4c5   :  { %v439_v16 = vpop.permute.xlu0 %438 }
 0x4c6   :  { %1734 = vmatmul.msk.f32.vlgmr.msrb.gmra.mxu1 %vm174_vm0, %v439_v16  ;;  %1737 = vmatmul.msk.f32.vlgmr.msrb.gmra.mxu3 %vm174_vm0, %v439_v16 }
 0x4c7   :  { %703 = vmatpush.msrb.mxu1 %v2383_v51  ;;  %791 = vmatpush.msrb.mxu3 %v2446_v3 }
 0x4c9   :  { %704 = vmatpush.msrb.mxu1 %v2385_v52  ;;  %792 = vmatpush.msrb.mxu3 %v2448_v6 }
 0x4cb   :  { %705 = vmatpush.msrb.mxu1 %v2390_v55  ;;  %793 = vmatpush.msrb.mxu3 %v2452_v8 }
 0x4cd   :  { %706 = vmatpush.msrb.mxu1 %v2399_v58  ;;  %794 = vmatpush.msrb.mxu3 %v2456_v49 }
 0x4db   :  { %v544_v17 = vpop.permute.xlu1 %543 }
 0x4dc   :  { %1738 = vmatmul.msk.f32.vlgmr.msra.gmra.mxu1 %vm174_vm0, %v544_v17  ;;  %1741 = vmatmul.msk.f32.vlgmr.msra.gmra.mxu3 %vm174_vm0, %v544_v17 }
 0x4dd   :  { %814 = vmatpush.msra.mxu1 %v2355_v4  ;;  %897 = vmatpush.msra.mxu3 %v2388_v54 }
 0x4df   :  { %815 = vmatpush.msra.mxu1 %v2358_v5  ;;  %898 = vmatpush.msra.mxu3 %v2394_v56 }
 0x4e1   :  { %816 = vmatpush.msra.mxu1 %v2360_v7  ;;  %899 = vmatpush.msra.mxu3 %v2397_v57 }
 0x4e3   :  { %817 = vmatpush.msra.mxu1 %v2363_v10  ;;  %900 = vmatpush.msra.mxu3 %v2403_v59 }
 0x543   :  { %v459_v19 = vpop.f32.mrf.mxu1 }
 0x544   :  { %v460_v20 = vadd.f32 %v2495_v18, %v459_v19 }
 0x546   :  { %462 = vst [vmem:[#allocation18] sm:$0xff] %v460_v20 }
 0x549   :  { %v539_v21 = vpop.f32.mrf.mxu3 }
 0x559   :  { %v564_v22 = vpop.f32.mrf.mxu1 }
 0x55a   :  { %v565_v25 = vadd.f32 %v564_v22, %v539_v21 }
 0x55c   :  { %v567_v26 = vadd.f32 %v2430_v9, %v565_v25 }
 0x55e   :  { %1820 = vtanh.f32 %v567_v26  ;;  %v1739_v32 = vmul.f32 -1.442695, %v567_v26 }
 0x55f   :  { %v650_v28 = vpop.f32.mrf.mxu3 }
 0x560   :  { %v653_v29 = vadd.f32 %v650_v28, %v632_v27 }
 0x562   :  { %1822 = vtanh.f32 %v653_v29  ;;  %v1742_v37 = vmul.f32 -1.442695, %v653_v29 }
 0x563   :  { %1824 = vpow2.f32 %v1739_v32 }
 0x564   :  { %v1821_v30 = vpop.eup %1820 }
 0x565   :  { %590 = vrot.lane.b32.xlu2 %v1821_v30, %s2231_s6 }
 0x568   :  { %v1823_v31 = vpop.eup %1822 }
 0x569   :  { %676 = vrot.lane.b32.xlu0 %v1823_v31, %s2231_s6  ;;  %v1825_v33 = vpop.eup %1824 }
 0x56a   :  { %v571_v34 = vadd.f32 1.0, %v1825_v33 }
 0x56c   :  { %1826 = vrcp.f32 %v571_v34  ;;  %v583_v42 = vand.u32 2147483648, %v571_v34  ;;  %vm577_vm14 = vweird.f32 %v571_v34  ;;  %v581_v43 = vand.u32 2147483647, %v571_v34 }
 0x56d   :  { %1828 = vpow2.f32 %v1742_v37 }
 0x56e   :  { %v584_v46 = vor.u32 1.1754944e-38, %v583_v42  ;;  %vm582_vm1 = vcmp.eq.f32.partialorder %v581_v43, 8.507059e+37 }
 0x572   :  { %v1827_v35 = vpop.eup %1826 }
 0x573   :  { %v573_v36 = vmul.f32 %v1827_v35, %v571_v34  ;;  %v1829_v40 = vpop.eup %1828  ;;  %vm578_vm13 = vweird.f32 %v1827_v35 }
 0x574   :  { %v657_v44 = vadd.f32 1.0, %v1829_v40  ;;  %vm579_vm15 = vmor %vm577_vm14, %vm578_vm13 }
 0x575   :  { %v574_v38 = vsub.f32 1.0, %v573_v36 }
 0x576   :  { %1830 = vrcp.f32 %v657_v44  ;;  %v669_v2 = vand.u32 2147483648, %v657_v44  ;;  %vm663_vm3 = vweird.f32 %v657_v44  ;;  %v667_v11 = vand.u32 2147483647, %v657_v44 }
 0x577   :  { %v575_v39 = vmul.f32 %v1827_v35, %v574_v38 }
 0x578   :  { %v670_v13 = vor.u32 1.1754944e-38, %v669_v2  ;;  %vm668_vm5 = vcmp.eq.f32.partialorder %v667_v11, 8.507059e+37 }
 0x579   :  { %v576_v41 = vadd.f32 %v1827_v35, %v575_v39 }
 0x57b   :  { %v580_v45 = vsel %vm579_vm15, %v1827_v35, %v576_v41 }
 0x57c   :  { %v585_v48 = vsel %vm582_vm1, %v584_v46, %v580_v45  ;;  %v1831_v53 = vpop.eup %1830 }
 0x57d   :  { %v659_v60 = vmul.f32 %v1831_v53, %v657_v44  ;;  %vm664_vm2 = vweird.f32 %v1831_v53  ;;  %v588_v17 = vmul.f32 %v585_v48, %v2437_v61 }
 0x57e   :  { %vm665_vm4 = vmor %vm663_vm3, %vm664_vm2 }
 0x57f   :  { %v660_v62 = vsub.f32 1.0, %v659_v60 }
 0x581   :  { %v661_v63 = vmul.f32 %v1831_v53, %v660_v62 }
 0x583   :  { %v662_v0 = vadd.f32 %v1831_v53, %v661_v63 }
 0x585   :  { %v666_v12 = vsel %vm665_vm4, %v1831_v53, %v662_v0 }
 0x586   :  { %v671_v15 = vsel %vm668_vm5, %v670_v13, %v666_v12 }
 0x587   :  { %v674_v21 = vmul.f32 %v671_v15, %v2442_v1  ;;  %v212_v1 = vld [vmem:[#allocation4 + $0x18] sm:$0xff] }
 0x588   :  { %258 = vmatmul.f32.gmra.mxu0 %v212_v1 }
 0x5bf   :  { %v591_v47 = vpop.permute.xlu2 %590 }
 0x5c0   :  { %v593_v50 = vmul.f32 %v591_v47, %v585_v48 }
 0x5c2   :  { %595 = vrot.lane.b32.xlu1 %v593_v50, %s2232_s27 }
 0x5db   :  { %v677_v14 = vpop.permute.xlu0 %676 }
 0x5dc   :  { %v679_v16 = vmul.f32 %v677_v14, %v671_v15 }
 0x5de   :  { %681 = vrot.lane.b32.xlu2 %v679_v16, %s2232_s27 }
 0x605   :  { %v259_v35 = vpop.f32.mrf.mxu0 }
 0x606   :  { %v801_v36 = vadd.f32 %v2373_v24, %v259_v35 }
 0x634   :  { %v596_v19 = vpop.permute.xlu1 %595 }
 0x635   :  { %v2505_v20 = vadd.f32 %v596_v19, %v588_v17 }
 0x637   :  { %1832 = vtanh.f32 %v2505_v20 }
 0x638   :  { %v682_v22 = vpop.permute.xlu2 %681 }
 0x639   :  { %v2509_v23 = vadd.f32 %v682_v22, %v674_v21 }
 0x63b   :  { %1834 = vtanh.f32 %v2509_v23 }
 0x63d   :  { %v1833_v25 = vpop.eup %1832 }
 0x63e   :  { %601 = vrot.lane.b32.xlu0 %v1833_v25, %s2231_s6 }
 0x641   :  { %v1835_v26 = vpop.eup %1834 }
 0x642   :  { %687 = vrot.lane.b32.xlu1 %v1835_v26, %s2231_s6 }
 0x6b0   :  { %v602_v27 = vpop.permute.xlu0 %601 }
 0x6b1   :  { %v604_v61 = vmul.f32 %v602_v27, %v585_v48 }
 0x6b3   :  { %606 = vrot.lane.b32.xlu2 %v604_v61, %s2232_s27 }
 0x6b4   :  { %v688_v28 = vpop.permute.xlu1 %687 }
 0x6b5   :  { %v690_v29 = vmul.f32 %v688_v28, %v671_v15 }
 0x6b7   :  { %712 = vrot.lane.b32.xlu0 %v690_v29, %s2232_s27 }
 0x70d   :  { %v607_v30 = vpop.permute.xlu2 %606 }
 0x70e   :  { %1740 = vmatmul.msk.f32.vlgmr.msra.gmra.mxu2 %vm174_vm0, %v607_v30  ;;  %1743 = vmatmul.msk.f32.vlgmr.msrb.gmra.mxu1 %vm174_vm0, %v607_v30 }
 0x70f   :  { %872 = vmatpush.msra.mxu2 %v2383_v51  ;;  %960 = vmatpush.msrb.mxu1 %v2446_v3 }
 0x711   :  { %873 = vmatpush.msra.mxu2 %v2385_v52  ;;  %961 = vmatpush.msrb.mxu1 %v2448_v6 }
 0x713   :  { %874 = vmatpush.msra.mxu2 %v2390_v55  ;;  %962 = vmatpush.msrb.mxu1 %v2452_v8 }
 0x715   :  { %875 = vmatpush.msra.mxu2 %v2399_v58  ;;  %963 = vmatpush.msrb.mxu1 %v2456_v49 }
 0x729   :  { %v713_v31 = vpop.permute.xlu0 %712 }
 0x72a   :  { %1744 = vmatmul.msk.f32.vlgmr.msrb.gmra.mxu2 %vm174_vm0, %v713_v31  ;;  %1747 = vmatmul.msk.f32.vlgmr.msra.gmra.mxu1 %vm174_vm0, %v713_v31 }
 0x72b   :  { %983 = vmatpush.msrb.mxu2 %v2355_v4  ;;  %1066 = vmatpush.msra.mxu1 %v2388_v54 }
 0x72d   :  { %984 = vmatpush.msrb.mxu2 %v2358_v5  ;;  %1067 = vmatpush.msra.mxu1 %v2394_v56 }
 0x72f   :  { %985 = vmatpush.msrb.mxu2 %v2360_v7  ;;  %1068 = vmatpush.msra.mxu1 %v2397_v57 }
 0x731   :  { %986 = vmatpush.msrb.mxu2 %v2363_v10  ;;  %1069 = vmatpush.msra.mxu1 %v2403_v59 }
 0x78b   :  { %v708_v34 = vpop.f32.mrf.mxu1 }
 0x791   :  { %v627_v32 = vpop.f32.mrf.mxu2 }
 0x792   :  { %v628_v33 = vadd.f32 %v2495_v18, %v627_v32 }
 0x794   :  { %631 = vst [vmem:[#allocation18 + $0x8] sm:$0xff] %v628_v33 }
 0x7a7   :  { %v819_v37 = vpop.f32.mrf.mxu1 }
 0x7a8   :  { %v822_v38 = vadd.f32 %v819_v37, %v801_v36 }
 0x7aa   :  { %1836 = vtanh.f32 %v822_v38  ;;  %v1748_v44 = vmul.f32 -1.442695, %v822_v38 }
 0x7ad   :  { %v733_v39 = vpop.f32.mrf.mxu2 }
 0x7ae   :  { %v734_v40 = vadd.f32 %v733_v39, %v708_v34 }
 0x7b0   :  { %v1837_v41 = vpop.eup %1836  ;;  %v736_v42 = vadd.f32 %v2430_v9, %v734_v40 }
 0x7b1   :  { %845 = vrot.lane.b32.xlu2 %v1837_v41, %s2231_s6 }
 0x7b2   :  { %1838 = vtanh.f32 %v736_v42  ;;  %v1745_v53 = vmul.f32 -1.442695, %v736_v42  ;;  %v213_v42 = vld [vmem:[#allocation4 + $0x20] sm:$0xff] }
 0x7b3   :  { %1840 = vpow2.f32 %v1748_v44  ;;  %261 = vmatmul.f32.gmra.mxu0 %v213_v42 }
 0x7b8   :  { %v1839_v43 = vpop.eup %1838 }
 0x7b9   :  { %759 = vrot.lane.b32.xlu1 %v1839_v43, %s2231_s6  ;;  %v1841_v45 = vpop.eup %1840 }
 0x7ba   :  { %v826_v46 = vadd.f32 1.0, %v1841_v45 }
 0x7bc   :  { %1842 = vrcp.f32 %v826_v46  ;;  %v838_v63 = vand.u32 2147483648, %v826_v46  ;;  %vm832_vm7 = vweird.f32 %v826_v46  ;;  %v836_v0 = vand.u32 2147483647, %v826_v46 }
 0x7bd   :  { %1844 = vpow2.f32 %v1745_v53 }
 0x7be   :  { %v839_v12 = vor.u32 1.1754944e-38, %v838_v63  ;;  %vm837_vm9 = vcmp.eq.f32.partialorder %v836_v0, 8.507059e+37 }
 0x7c2   :  { %v1843_v47 = vpop.eup %1842 }
 0x7c3   :  { %v828_v48 = vmul.f32 %v1843_v47, %v826_v46  ;;  %vm833_vm6 = vweird.f32 %v1843_v47  ;;  %v1845_v2 = vpop.eup %1844 }
 0x7c4   :  { %vm834_vm8 = vmor %vm832_vm7, %vm833_vm6  ;;  %v740_v13 = vadd.f32 1.0, %v1845_v2 }
 0x7c5   :  { %v829_v50 = vsub.f32 1.0, %v828_v48 }
 0x7c6   :  { %1846 = vrcp.f32 %v740_v13  ;;  %v752_v26 = vand.u32 2147483648, %v740_v13  ;;  %vm746_vm11 = vweird.f32 %v740_v13  ;;  %v750_v27 = vand.u32 2147483647, %v740_v13 }
 0x7c7   :  { %v830_v60 = vmul.f32 %v1843_v47, %v829_v50 }
 0x7c8   :  { %v753_v28 = vor.u32 1.1754944e-38, %v752_v26  ;;  %vm751_vm13 = vcmp.eq.f32.partialorder %v750_v27, 8.507059e+37 }
 0x7c9   :  { %v831_v62 = vadd.f32 %v1843_v47, %v830_v60 }
 0x7cb   :  { %v835_v11 = vsel %vm834_vm8, %v1843_v47, %v831_v62 }
 0x7cc   :  { %v840_v15 = vsel %vm837_vm9, %v839_v12, %v835_v11  ;;  %v1847_v17 = vpop.eup %1846 }
 0x7cd   :  { %v742_v19 = vmul.f32 %v1847_v17, %v740_v13  ;;  %vm747_vm10 = vweird.f32 %v1847_v17  ;;  %v843_v31 = vmul.f32 %v840_v15, %v2509_v23 }
 0x7ce   :  { %vm748_vm12 = vmor %vm746_vm11, %vm747_vm10 }
 0x7cf   :  { %v743_v21 = vsub.f32 1.0, %v742_v19 }
 0x7d1   :  { %v744_v22 = vmul.f32 %v1847_v17, %v743_v21 }
 0x7d3   :  { %v745_v25 = vadd.f32 %v1847_v17, %v744_v22 }
 0x7d5   :  { %v749_v61 = vsel %vm748_vm12, %v1847_v17, %v745_v25 }
 0x7d6   :  { %v754_v1 = vsel %vm751_vm13, %v753_v28, %v749_v61 }
 0x7d7   :  { %v757_v35 = vmul.f32 %v754_v1, %v2505_v20 }
 0x80b   :  { %v846_v14 = vpop.permute.xlu2 %845 }
 0x80c   :  { %v848_v16 = vmul.f32 %v846_v14, %v840_v15 }
 0x80e   :  { %850 = vrot.lane.b32.xlu1 %v848_v16, %s2232_s27 }
 0x82b   :  { %v760_v29 = vpop.permute.xlu1 %759 }
 0x82c   :  { %v762_v30 = vmul.f32 %v760_v29, %v754_v1 }
 0x82e   :  { %764 = vrot.lane.b32.xlu0 %v762_v30, %s2232_s27 }
 0x830   :  { %v262_v47 = vpop.f32.mrf.mxu0 }
 0x880   :  { %v851_v32 = vpop.permute.xlu1 %850 }
 0x881   :  { %v2544_v33 = vadd.f32 %v851_v32, %v843_v31 }
 0x883   :  { %1848 = vtanh.f32 %v2544_v33 }
 0x889   :  { %v1849_v34 = vpop.eup %1848 }
 0x88a   :  { %856 = vrot.lane.b32.xlu0 %v1849_v34, %s2231_s6 }
 0x8a0   :  { %v765_v36 = vpop.permute.xlu0 %764 }
 0x8a1   :  { %v2549_v37 = vadd.f32 %v765_v36, %v757_v35 }
 0x8a3   :  { %1850 = vtanh.f32 %v2549_v37 }
 0x8a9   :  { %v1851_v38 = vpop.eup %1850 }
 0x8aa   :  { %770 = vrot.lane.b32.xlu2 %v1851_v38, %s2231_s6 }
 0x8fc   :  { %v857_v39 = vpop.permute.xlu0 %856 }
 0x8fd   :  { %v859_v23 = vmul.f32 %v857_v39, %v840_v15 }
 0x8ff   :  { %881 = vrot.lane.b32.xlu2 %v859_v23, %s2232_s27 }
 0x904   :  { %v771_v40 = vpop.permute.xlu2 %770 }
 0x905   :  { %v773_v41 = vmul.f32 %v771_v40, %v754_v1 }
 0x907   :  { %775 = vrot.lane.b32.xlu1 %v773_v41, %s2232_s27 }
 0x959   :  { %v882_v20 = vpop.permute.xlu2 %881 }
 0x979   :  { %v776_v43 = vpop.permute.xlu1 %775 }
 0x97a   :  { %1746 = vmatmul.msk.f32.vlgmr.msrb.gmra.mxu3 %vm174_vm0, %v776_v43  ;;  %1749 = vmatmul.msk.f32.vlgmr.msra.gmra.mxu2 %vm174_vm0, %v776_v43 }
 0x97b   :  { %1041 = vmatpush.msrb.mxu3 %v2383_v51  ;;  %1129 = vmatpush.msra.mxu2 %v2446_v3 }
 0x97d   :  { %1042 = vmatpush.msrb.mxu3 %v2385_v52  ;;  %1130 = vmatpush.msra.mxu2 %v2448_v6 }
 0x97f   :  { %1043 = vmatpush.msrb.mxu3 %v2390_v55  ;;  %1131 = vmatpush.msra.mxu2 %v2452_v8 }
 0x981   :  { %1044 = vmatpush.msrb.mxu3 %v2399_v58  ;;  %1132 = vmatpush.msra.mxu2 %v2456_v49 }
 0x982   :  { %1750 = vmatmul.msk.f32.vlgmr.msra.gmra.mxu3 %vm174_vm0, %v882_v20  ;;  %1753 = vmatmul.msk.f32.vlgmr.msrb.gmra.mxu2 %vm174_vm0, %v882_v20 }
 0x983   :  { %1152 = vmatpush.msra.mxu3 %v2355_v4  ;;  %1235 = vmatpush.msrb.mxu2 %v2388_v54  ;;  %v970_v4 = vadd.f32 %v2373_v24, %v262_v47 }
 0x985   :  { %1153 = vmatpush.msra.mxu3 %v2358_v5  ;;  %1236 = vmatpush.msrb.mxu2 %v2394_v56 }
 0x987   :  { %1154 = vmatpush.msra.mxu3 %v2360_v7  ;;  %1237 = vmatpush.msrb.mxu2 %v2397_v57 }
 0x989   :  { %1155 = vmatpush.msra.mxu3 %v2363_v10  ;;  %1238 = vmatpush.msrb.mxu2 %v2403_v59 }
 0x9fd   :  { %v796_v44 = vpop.f32.mrf.mxu3  ;;  %v877_v45 = vpop.f32.mrf.mxu2 }
 0x9fe   :  { %v797_v46 = vadd.f32 %v2495_v18, %v796_v44 }
 0xa00   :  { %800 = vst [vmem:[#allocation18 + $0x10] sm:$0xff] %v797_v46 }
 0xa05   :  { %v902_v48 = vpop.f32.mrf.mxu3  ;;  %v988_v5 = vpop.f32.mrf.mxu2 }
 0xa06   :  { %v903_v50 = vadd.f32 %v902_v48, %v877_v45  ;;  %v991_v53 = vadd.f32 %v988_v5, %v970_v4  ;;  %v214_v48 = vld [vmem:[#allocation4 + $0x28] sm:$0xff] }
 0xa07   :  { %264 = vmatmul.f32.gmra.mxu0 %v214_v48 }
 0xa08   :  { %v905_v7 = vadd.f32 %v2430_v9, %v903_v50  ;;  %1852 = vtanh.f32 %v991_v53  ;;  %v1754_v62 = vmul.f32 -1.442695, %v991_v53 }
 0xa0a   :  { %1854 = vtanh.f32 %v905_v7  ;;  %v1751_v63 = vmul.f32 -1.442695, %v905_v7 }
 0xa0b   :  { %1856 = vpow2.f32 %v1754_v62 }
 0xa0c   :  { %1858 = vpow2.f32 %v1751_v63 }
 0xa0e   :  { %v1853_v60 = vpop.eup %1852 }
 0xa0f   :  { %1014 = vrot.lane.b32.xlu1 %v1853_v60, %s2231_s6 }
 0xa10   :  { %v1855_v10 = vpop.eup %1854 }
 0xa11   :  { %928 = vrot.lane.b32.xlu0 %v1855_v10, %s2231_s6  ;;  %v1857_v0 = vpop.eup %1856 }
 0xa12   :  { %v1859_v24 = vpop.eup %1858  ;;  %v995_v2 = vadd.f32 1.0, %v1857_v0 }
 0xa13   :  { %v909_v11 = vadd.f32 1.0, %v1859_v24 }
 0xa14   :  { %1860 = vrcp.f32 %v995_v2  ;;  %v1007_v25 = vand.u32 2147483648, %v995_v2  ;;  %vm1001_vm15 = vweird.f32 %v995_v2  ;;  %v1005_v26 = vand.u32 2147483647, %v995_v2 }
 0xa15   :  { %1862 = vrcp.f32 %v909_v11  ;;  %v921_v61 = vand.u32 2147483648, %v909_v11  ;;  %vm915_vm3 = vweird.f32 %v909_v11  ;;  %v919_v29 = vand.u32 2147483647, %v909_v11 }
 0xa16   :  { %v1008_v1 = vor.u32 1.1754944e-38, %v1007_v25  ;;  %vm1006_vm5 = vcmp.eq.f32.partialorder %v1005_v26, 8.507059e+37 }
 0xa17   :  { %v922_v34 = vor.u32 1.1754944e-38, %v921_v61  ;;  %vm920_vm6 = vcmp.eq.f32.partialorder %v919_v29, 8.507059e+37 }
 0xa1a   :  { %v1861_v12 = vpop.eup %1860 }
 0xa1b   :  { %v1863_v13 = vpop.eup %1862  ;;  %v997_v14 = vmul.f32 %v1861_v12, %v995_v2  ;;  %vm1002_vm14 = vweird.f32 %v1861_v12 }
 0xa1c   :  { %v911_v15 = vmul.f32 %v1863_v13, %v909_v11  ;;  %vm916_vm1 = vweird.f32 %v1863_v13  ;;  %vm1003_vm2 = vmor %vm1001_vm15, %vm1002_vm14 }
 0xa1d   :  { %v998_v16 = vsub.f32 1.0, %v997_v14  ;;  %vm917_vm4 = vmor %vm915_vm3, %vm916_vm1 }
 0xa1e   :  { %v912_v17 = vsub.f32 1.0, %v911_v15 }
 0xa1f   :  { %v999_v19 = vmul.f32 %v1861_v12, %v998_v16 }
 0xa20   :  { %v913_v21 = vmul.f32 %v1863_v13, %v912_v17 }
 0xa21   :  { %v1000_v22 = vadd.f32 %v1861_v12, %v999_v19 }
 0xa22   :  { %v914_v27 = vadd.f32 %v1863_v13, %v913_v21 }
 0xa23   :  { %v1004_v28 = vsel %vm1003_vm2, %v1861_v12, %v1000_v22 }
 0xa24   :  { %v918_v30 = vsel %vm917_vm4, %v1863_v13, %v914_v27  ;;  %v1009_v32 = vsel %vm1006_vm5, %v1008_v1, %v1004_v28 }
 0xa25   :  { %v923_v38 = vsel %vm920_vm6, %v922_v34, %v918_v30  ;;  %v1012_v43 = vmul.f32 %v1009_v32, %v2544_v33 }
 0xa26   :  { %v926_v23 = vmul.f32 %v923_v38, %v2549_v37 }
 0xa81   :  { %v1015_v31 = vpop.permute.xlu1 %1014 }
 0xa82   :  { %v1017_v35 = vmul.f32 %v1015_v31, %v1009_v32 }
 0xa83   :  { %v929_v36 = vpop.permute.xlu0 %928 }
 0xa84   :  { %v931_v39 = vmul.f32 %v929_v36, %v923_v38  ;;  %1019 = vrot.lane.b32.xlu0 %v1017_v35, %s2232_s27  ;;  %v265_v60 = vpop.f32.mrf.mxu0 }
 0xa86   :  { %933 = vrot.lane.b32.xlu2 %v931_v39, %s2232_s27 }
 0xae0   :  { %v934_v40 = vpop.permute.xlu2 %933 }
 0xae1   :  { %v2583_v41 = vadd.f32 %v934_v40, %v926_v23 }
 0xae3   :  { %1864 = vtanh.f32 %v2583_v41 }
 0xae9   :  { %v1865_v42 = vpop.eup %1864 }
 0xaea   :  { %939 = vrot.lane.b32.xlu1 %v1865_v42, %s2231_s6 }
 0xaf6   :  { %v1020_v20 = vpop.permute.xlu0 %1019 }
 0xaf7   :  { %v2588_v44 = vadd.f32 %v1020_v20, %v1012_v43 }
 0xaf9   :  { %1866 = vtanh.f32 %v2588_v44 }
 0xaff   :  { %v1867_v45 = vpop.eup %1866 }
 0xb00   :  { %1025 = vrot.lane.b32.xlu2 %v1867_v45, %s2231_s6 }
 0xb5a   :  { %v1026_v46 = vpop.permute.xlu2 %1025 }
 0xb5b   :  { %v1028_v37 = vmul.f32 %v1026_v46, %v1009_v32 }
 0xb5c   :  { %v940_v47 = vpop.permute.xlu1 %939 }
 0xb5d   :  { %v942_v4 = vmul.f32 %v940_v47, %v923_v38  ;;  %1050 = vrot.lane.b32.xlu1 %v1028_v37, %s2232_s27 }
 0xb5f   :  { %944 = vrot.lane.b32.xlu0 %v942_v4, %s2232_s27 }
 0xbcf   :  { %v1051_v33 = vpop.permute.xlu1 %1050 }
 0xbd1   :  { %v945_v5 = vpop.permute.xlu0 %944 }
 0xbd2   :  { %1752 = vmatmul.msk.f32.vlgmr.msrb.gmra.mxu1 %vm174_vm0, %v945_v5  ;;  %1755 = vmatmul.msk.f32.vlgmr.msrb.gmra.mxu3 %vm174_vm0, %v945_v5 }
 0xbd3   :  { %1210 = vmatpush.msrb.mxu1 %v2383_v51  ;;  %1298 = vmatpush.msrb.mxu3 %v2446_v3  ;;  %v2606_v51 = vld [vmem:[#allocation12 + $0x18] sm:$0xff] }
 0xbd5   :  { %1211 = vmatpush.msrb.mxu1 %v2385_v52  ;;  %1299 = vmatpush.msrb.mxu3 %v2448_v6  ;;  %v2610_v52 = vld [vmem:[#allocation12 + $0x10] sm:$0xff] }
 0xbd7   :  { %1212 = vmatpush.msrb.mxu1 %v2390_v55  ;;  %1300 = vmatpush.msrb.mxu3 %v2452_v8  ;;  %v2614_v55 = vld [vmem:[#allocation12 + $0x8] sm:$0xff] }
 0xbd9   :  { %1213 = vmatpush.msrb.mxu1 %v2399_v58  ;;  %1301 = vmatpush.msrb.mxu3 %v2456_v49  ;;  %v2618_v58 = vld [vmem:[#allocation12] sm:$0xff] }
 0xbda   :  { %1756 = vmatmul.msk.f32.vlgmr.msra.gmra.mxu1 %vm174_vm0, %v1051_v33  ;;  %1759 = vmatmul.msk.f32.vlgmr.msra.gmra.mxu3 %vm174_vm0, %v1051_v33 }
 0xbdb   :  { %1321 = vmatpush.msra.mxu1 %v2606_v51  ;;  %1404 = vmatpush.msra.mxu3 %v2388_v54 }
 0xbdd   :  { %1322 = vmatpush.msra.mxu1 %v2610_v52  ;;  %1405 = vmatpush.msra.mxu3 %v2394_v56 }
 0xbdf   :  { %1323 = vmatpush.msra.mxu1 %v2614_v55  ;;  %1406 = vmatpush.msra.mxu3 %v2397_v57  ;;  %v2627_v57 = vld [vmem:[%s2762_s5] ss:$0 sm:$0xff] }
 0xbe0   :  { %v1139_v62 = vadd.f32 %v2627_v57, %v265_v60  ;;  %v2656_v60 = vld [vmem:[#allocation15 + $0x8] sm:$0xff] }
 0xbe1   :  { %1324 = vmatpush.msra.mxu1 %v2618_v58  ;;  %1407 = vmatpush.msra.mxu3 %v2403_v59 }
 0xc4f   :  { %v965_v50 = vpop.f32.mrf.mxu1 }
 0xc50   :  { %v966_v54 = vadd.f32 %v2495_v18, %v965_v50 }
 0xc52   :  { %969 = vst [vmem:[#allocation18 + $0x18] sm:$0xff] %v966_v54 }
 0xc55   :  { %v1046_v53 = vpop.f32.mrf.mxu3 }
 0xc57   :  { %v1071_v7 = vpop.f32.mrf.mxu1 }
 0xc58   :  { %v1072_v56 = vadd.f32 %v1071_v7, %v1046_v53  ;;  %v2648_v53 = vld [vmem:[#allocation15 + $0x18] sm:$0xff]  ;;  %v2652_v7 = vld [vmem:[#allocation15 + $0x10] sm:$0xff] }
 0xc5a   :  { %v1074_v10 = vadd.f32 %v2430_v9, %v1072_v56  ;;  %v2660_v56 = vld [vmem:[#allocation15] sm:$0xff] }
 0xc5c   :  { %1868 = vtanh.f32 %v1074_v10  ;;  %v1757_v2 = vmul.f32 -1.442695, %v1074_v10 }
 0xc5d   :  { %v1157_v63 = vpop.f32.mrf.mxu3 }
 0xc5e   :  { %v1160_v59 = vadd.f32 %v1157_v63, %v1139_v62 }
 0xc60   :  { %1870 = vtanh.f32 %v1160_v59  ;;  %v1760_v14 = vmul.f32 -1.442695, %v1160_v59 }
 0xc61   :  { %1872 = vpow2.f32 %v1757_v2 }
 0xc62   :  { %v1869_v0 = vpop.eup %1868 }
 0xc63   :  { %1097 = vrot.lane.b32.xlu2 %v1869_v0, %s2231_s6 }
 0xc66   :  { %v1871_v24 = vpop.eup %1870 }
 0xc67   :  { %1183 = vrot.lane.b32.xlu0 %v1871_v24, %s2231_s6  ;;  %v1873_v9 = vpop.eup %1872 }
 0xc68   :  { %v1078_v11 = vadd.f32 1.0, %v1873_v9 }
 0xc6a   :  { %1874 = vrcp.f32 %v1078_v11  ;;  %v1090_v21 = vand.u32 2147483648, %v1078_v11  ;;  %vm1084_vm8 = vweird.f32 %v1078_v11  ;;  %v1088_v22 = vand.u32 2147483647, %v1078_v11 }
 0xc6b   :  { %1876 = vpow2.f32 %v1760_v14 }
 0xc6c   :  { %v1091_v27 = vor.u32 1.1754944e-38, %v1090_v21  ;;  %vm1089_vm10 = vcmp.eq.f32.partialorder %v1088_v22, 8.507059e+37 }
 0xc70   :  { %v1875_v12 = vpop.eup %1874 }
 0xc71   :  { %v1080_v13 = vmul.f32 %v1875_v12, %v1078_v11  ;;  %v1877_v17 = vpop.eup %1876  ;;  %vm1085_vm7 = vweird.f32 %v1875_v12 }
 0xc72   :  { %v1164_v25 = vadd.f32 1.0, %v1877_v17  ;;  %vm1086_vm9 = vmor %vm1084_vm8, %vm1085_vm7 }
 0xc73   :  { %v1081_v15 = vsub.f32 1.0, %v1080_v13 }
 0xc74   :  { %1878 = vrcp.f32 %v1164_v25  ;;  %v1176_v35 = vand.u32 2147483648, %v1164_v25  ;;  %vm1170_vm12 = vweird.f32 %v1164_v25  ;;  %v1174_v36 = vand.u32 2147483647, %v1164_v25 }
 0xc75   :  { %v1082_v16 = vmul.f32 %v1875_v12, %v1081_v15 }
 0xc76   :  { %v1177_v39 = vor.u32 1.1754944e-38, %v1176_v35  ;;  %vm1175_vm14 = vcmp.eq.f32.partialorder %v1174_v36, 8.507059e+37 }
 0xc77   :  { %v1083_v19 = vadd.f32 %v1875_v12, %v1082_v16 }
 0xc79   :  { %v1087_v26 = vsel %vm1086_vm9, %v1875_v12, %v1083_v19 }
 0xc7a   :  { %v1092_v28 = vsel %vm1089_vm10, %v1091_v27, %v1087_v26  ;;  %v1879_v1 = vpop.eup %1878 }
 0xc7b   :  { %v1166_v30 = vmul.f32 %v1879_v1, %v1164_v25  ;;  %vm1171_vm11 = vweird.f32 %v1879_v1  ;;  %v1095_v43 = vmul.f32 %v1092_v28, %v2583_v41 }
 0xc7c   :  { %vm1172_vm13 = vmor %vm1170_vm12, %vm1171_vm11 }
 0xc7d   :  { %v1167_v31 = vsub.f32 1.0, %v1166_v30 }
 0xc7f   :  { %v1168_v32 = vmul.f32 %v1879_v1, %v1167_v31 }
 0xc81   :  { %v1169_v34 = vadd.f32 %v1879_v1, %v1168_v32 }
 0xc83   :  { %v1173_v38 = vsel %vm1172_vm13, %v1879_v1, %v1169_v34 }
 0xc84   :  { %v1178_v40 = vsel %vm1175_vm14, %v1177_v39, %v1173_v38 }
 0xc85   :  { %v1181_v46 = vmul.f32 %v1178_v40, %v2588_v44  ;;  %v215_v44 = vld [vmem:[#allocation4 + $0x30] sm:$0xff] }
 0xc86   :  { %267 = vmatmul.f32.gmra.mxu0 %v215_v44 }
 0xcbd   :  { %v1098_v61 = vpop.permute.xlu2 %1097 }
 0xcbe   :  { %v1100_v29 = vmul.f32 %v1098_v61, %v1092_v28 }
 0xcc0   :  { %1102 = vrot.lane.b32.xlu1 %v1100_v29, %s2232_s27 }
 0xcd9   :  { %v1184_v23 = vpop.permute.xlu0 %1183 }
 0xcda   :  { %v1186_v42 = vmul.f32 %v1184_v23, %v1178_v40 }
 0xcdc   :  { %1188 = vrot.lane.b32.xlu2 %v1186_v42, %s2232_s27 }
 0xd32   :  { %v1103_v20 = vpop.permute.xlu1 %1102 }
 0xd33   :  { %v2635_v45 = vadd.f32 %v1103_v20, %v1095_v43 }
 0xd35   :  { %1880 = vtanh.f32 %v2635_v45 }
 0xd36   :  { %v1189_v37 = vpop.permute.xlu2 %1188 }
 0xd37   :  { %v2639_v47 = vadd.f32 %v1189_v37, %v1181_v46 }
 0xd39   :  { %1882 = vtanh.f32 %v2639_v47 }
 0xd3b   :  { %v1881_v4 = vpop.eup %1880 }
 0xd3c   :  { %1108 = vrot.lane.b32.xlu0 %v1881_v4, %s2231_s6 }
 0xd3f   :  { %v1883_v48 = vpop.eup %1882 }
 0xd40   :  { %1194 = vrot.lane.b32.xlu1 %v1883_v48, %s2231_s6 }
 0xdae   :  { %v1109_v5 = vpop.permute.xlu0 %1108 }
 0xdaf   :  { %v1111_v41 = vmul.f32 %v1109_v5, %v1092_v28 }
 0xdb1   :  { %1113 = vrot.lane.b32.xlu2 %v1111_v41, %s2232_s27 }
 0xdb2   :  { %v1195_v33 = vpop.permute.xlu1 %1194 }
 0xdb3   :  { %v1197_v50 = vmul.f32 %v1195_v33, %v1178_v40 }
 0xdb5   :  { %1219 = vrot.lane.b32.xlu0 %v1197_v50, %s2232_s27 }
 0xe0b   :  { %v1114_v54 = vpop.permute.xlu2 %1113 }
 0xe0c   :  { %1758 = vmatmul.msk.f32.vlgmr.msra.gmra.mxu2 %vm174_vm0, %v1114_v54  ;;  %1761 = vmatmul.msk.f32.vlgmr.msrb.gmra.mxu1 %vm174_vm0, %v1114_v54 }
 0xe0d   :  { %1379 = vmatpush.msra.mxu2 %v2648_v53  ;;  %1467 = vmatpush.msrb.mxu1 %v2446_v3  ;;  %v1933_v3 = vld [vmem:[#allocation13 + $0x18] sm:$0xff] }
 0xe0f   :  { %1380 = vmatpush.msra.mxu2 %v2652_v7  ;;  %1468 = vmatpush.msrb.mxu1 %v2448_v6  ;;  %v1934_v6 = vld [vmem:[#allocation13 + $0x10] sm:$0xff] }
 0xe11   :  { %1381 = vmatpush.msra.mxu2 %v2656_v60  ;;  %1469 = vmatpush.msrb.mxu1 %v2452_v8  ;;  %v1935_v8 = vld [vmem:[#allocation13 + $0x8] sm:$0xff] }
 0xe13   :  { %1382 = vmatpush.msra.mxu2 %v2660_v56  ;;  %1470 = vmatpush.msrb.mxu1 %v2456_v49  ;;  %v1936_v49 = vld [vmem:[#allocation13] sm:$0xff] }
 0xe27   :  { %v1220_v10 = vpop.permute.xlu0 %1219 }
 0xe28   :  { %1762 = vmatmul.msk.f32.vlgmr.msrb.gmra.mxu2 %vm174_vm0, %v1220_v10  ;;  %1765 = vmatmul.msk.f32.vlgmr.msra.gmra.mxu1 %vm174_vm0, %v1220_v10 }
 0xe29   :  { %1490 = vmatpush.msrb.mxu2 %v2606_v51  ;;  %1573 = vmatpush.msra.mxu1 %v1933_v3  ;;  %v268_v51 = vpop.f32.mrf.mxu0 }
 0xe2a   :  { %v1308_v0 = vadd.f32 %v2627_v57, %v268_v51  ;;  %v1941_v51 = vld [vmem:[#allocation16] sm:$0xff] }
 0xe2b   :  { %1491 = vmatpush.msrb.mxu2 %v2610_v52  ;;  %1574 = vmatpush.msra.mxu1 %v1934_v6 }
 0xe2d   :  { %1492 = vmatpush.msrb.mxu2 %v2614_v55  ;;  %1575 = vmatpush.msra.mxu1 %v1935_v8  ;;  %v216_v8 = vld [vmem:[#allocation4 + $0x38] sm:$0xff] }
 0xe2e   :  { %270 = vmatmul.f32.gmra.mxu0 %v216_v8 }
 0xe2f   :  { %1493 = vmatpush.msrb.mxu2 %v2618_v58  ;;  %1576 = vmatpush.msra.mxu1 %v1936_v49  ;;  %v2675_v58 = vld [vmem:[%s2765_s8] ss:$0 sm:$0xff] }
 0xe89   :  { %v1215_v59 = vpop.f32.mrf.mxu1 }
 0xe8f   :  { %v1134_v62 = vpop.f32.mrf.mxu2 }
 0xe90   :  { %v1135_v63 = vadd.f32 %v2495_v18, %v1134_v62  ;;  %v1939_v62 = vld [vmem:[#allocation16 + $0x10] sm:$0xff] }
 0xe92   :  { %1138 = vst [vmem:[#allocation18 + $0x20] sm:$0xff] %v1135_v63  ;;  %v1940_v63 = vld [vmem:[#allocation16 + $0x8] sm:$0xff] }
 0xea5   :  { %v1326_v24 = vpop.f32.mrf.mxu1 }
 0xea6   :  { %v1329_v52 = vadd.f32 %v1326_v24, %v1308_v0 }
 0xea8   :  { %1884 = vtanh.f32 %v1329_v52  ;;  %v1766_v13 = vmul.f32 -1.442695, %v1329_v52 }
 0xeab   :  { %v1240_v2 = vpop.f32.mrf.mxu2 }
 0xeac   :  { %v1241_v9 = vadd.f32 %v1240_v2, %v1215_v59 }
 0xeae   :  { %v1885_v55 = vpop.eup %1884  ;;  %v1243_v11 = vadd.f32 %v2675_v58, %v1241_v9 }
 0xeaf   :  { %1352 = vrot.lane.b32.xlu2 %v1885_v55, %s2231_s6 }
 0xeb0   :  { %1886 = vtanh.f32 %v1243_v11  ;;  %v1763_v21 = vmul.f32 -1.442695, %v1243_v11 }
 0xeb1   :  { %1888 = vpow2.f32 %v1766_v13 }
 0xeb6   :  { %v1887_v12 = vpop.eup %1886 }
 0xeb7   :  { %1266 = vrot.lane.b32.xlu1 %v1887_v12, %s2231_s6  ;;  %v1889_v14 = vpop.eup %1888 }
 0xeb8   :  { %v1333_v15 = vadd.f32 1.0, %v1889_v14 }
 0xeba   :  { %1890 = vrcp.f32 %v1333_v15  ;;  %v1345_v26 = vand.u32 2147483648, %v1333_v15  ;;  %vm1339_vm1 = vweird.f32 %v1333_v15  ;;  %v1343_v27 = vand.u32 2147483647, %v1333_v15 }
 0xebb   :  { %1892 = vpow2.f32 %v1763_v21 }
 0xebc   :  { %v1346_v29 = vor.u32 1.1754944e-38, %v1345_v26  ;;  %vm1344_vm3 = vcmp.eq.f32.partialorder %v1343_v27, 8.507059e+37 }
 0xec0   :  { %v1891_v16 = vpop.eup %1890 }
 0xec1   :  { %v1335_v17 = vmul.f32 %v1891_v16, %v1333_v15  ;;  %vm1340_vm15 = vweird.f32 %v1891_v16  ;;  %v1893_v61 = vpop.eup %1892 }
 0xec2   :  { %vm1341_vm2 = vmor %vm1339_vm1, %vm1340_vm15  ;;  %v1247_v1 = vadd.f32 1.0, %v1893_v61 }
 0xec3   :  { %v1336_v19 = vsub.f32 1.0, %v1335_v17 }
 0xec4   :  { %1894 = vrcp.f32 %v1247_v1  ;;  %v1259_v23 = vand.u32 2147483648, %v1247_v1  ;;  %vm1253_vm5 = vweird.f32 %v1247_v1  ;;  %v1257_v40 = vand.u32 2147483647, %v1247_v1 }
 0xec5   :  { %v1337_v22 = vmul.f32 %v1891_v16, %v1336_v19 }
 0xec6   :  { %v1260_v43 = vor.u32 1.1754944e-38, %v1259_v23  ;;  %vm1258_vm7 = vcmp.eq.f32.partialorder %v1257_v40, 8.507059e+37 }
 0xec7   :  { %v1338_v25 = vadd.f32 %v1891_v16, %v1337_v22 }
 0xec9   :  { %v1342_v28 = vsel %vm1341_vm2, %v1891_v16, %v1338_v25 }
 0xeca   :  { %v1347_v31 = vsel %vm1344_vm3, %v1346_v29, %v1342_v28  ;;  %v1895_v34 = vpop.eup %1894 }
 0xecb   :  { %v1249_v35 = vmul.f32 %v1895_v34, %v1247_v1  ;;  %vm1254_vm4 = vweird.f32 %v1895_v34  ;;  %v1350_v4 = vmul.f32 %v1347_v31, %v2639_v47 }
 0xecc   :  { %vm1255_vm6 = vmor %vm1253_vm5, %vm1254_vm4 }
 0xecd   :  { %v1250_v36 = vsub.f32 1.0, %v1249_v35 }
 0xecf   :  { %v1251_v38 = vmul.f32 %v1895_v34, %v1250_v36 }
 0xed1   :  { %v1252_v39 = vadd.f32 %v1895_v34, %v1251_v38 }
 0xed3   :  { %v1256_v42 = vsel %vm1255_vm6, %v1895_v34, %v1252_v39 }
 0xed4   :  { %v1261_v46 = vsel %vm1258_vm7, %v1260_v43, %v1256_v42 }
 0xed5   :  { %v1264_v33 = vmul.f32 %v1261_v46, %v2635_v45  ;;  %v1938_v45 = vld [vmem:[#allocation16 + $0x18] sm:$0xff] }
 0xf09   :  { %v1353_v30 = vpop.permute.xlu2 %1352 }
 0xf0a   :  { %v1355_v32 = vmul.f32 %v1353_v30, %v1347_v31 }
 0xf0c   :  { %1357 = vrot.lane.b32.xlu1 %v1355_v32, %s2232_s27 }
 0xf29   :  { %v1267_v20 = vpop.permute.xlu1 %1266 }
 0xf2a   :  { %v1269_v37 = vmul.f32 %v1267_v20, %v1261_v46 }
 0xf2c   :  { %1271 = vrot.lane.b32.xlu0 %v1269_v37, %s2232_s27 }
 0xf7e   :  { %v1358_v48 = vpop.permute.xlu1 %1357 }
 0xf7f   :  { %v2683_v5 = vadd.f32 %v1358_v48, %v1350_v4 }
 0xf81   :  { %1896 = vtanh.f32 %v2683_v5 }
 0xf87   :  { %v1897_v41 = vpop.eup %1896 }
 0xf88   :  { %1363 = vrot.lane.b32.xlu0 %v1897_v41, %s2231_s6 }
 0xf9e   :  { %v1272_v50 = vpop.permute.xlu0 %1271 }
 0xf9f   :  { %v2688_v44 = vadd.f32 %v1272_v50, %v1264_v33 }
 0xfa1   :  { %1898 = vtanh.f32 %v2688_v44 }
 0xfa7   :  { %v1899_v54 = vpop.eup %1898 }
 0xfa8   :  { %1277 = vrot.lane.b32.xlu2 %v1899_v54, %s2231_s6 }
 0xffa   :  { %v1364_v10 = vpop.permute.xlu0 %1363 }
 0xffb   :  { %v1366_v47 = vmul.f32 %v1364_v10, %v1347_v31 }
 0xffd   :  { %1388 = vrot.lane.b32.xlu2 %v1366_v47, %s2232_s27 }
0x1002   :  { %v1278_v3 = vpop.permute.xlu2 %1277 }
0x1003   :  { %v1280_v6 = vmul.f32 %v1278_v3, %v1261_v46 }
0x1005   :  { %1282 = vrot.lane.b32.xlu1 %v1280_v6, %s2232_s27 }
0x1057   :  { %v1389_v59 = vpop.permute.xlu2 %1388 }
0x1077   :  { %v1283_v49 = vpop.permute.xlu1 %1282 }
0x1078   :  { %1764 = vmatmul.msk.f32.vlgmr.msrb.gmra.mxu3 %vm174_vm0, %v1283_v49  ;;  %1767 = vmatmul.msk.f32.vlgmr.msra.gmra.mxu2 %vm174_vm0, %v1283_v49 }
0x1079   :  { %1548 = vmatpush.msrb.mxu3 %v2648_v53  ;;  %1636 = vmatpush.msra.mxu2 %v1938_v45  ;;  %v2723_v45 = vld [vmem:[%s2767_s10] ss:$0 sm:$0xff]  ;;  %s2233_s10 = smov 96  }
0x107b   :  { %1549 = vmatpush.msrb.mxu3 %v2652_v7  ;;  %1637 = vmatpush.msra.mxu2 %v1939_v62  ;;  %v271_v7 = vpop.f32.mrf.mxu0 }
0x107c   :  { %v1477_v52 = vadd.f32 %v2627_v57, %v271_v7 }
0x107d   :  { %1550 = vmatpush.msrb.mxu3 %v2656_v60  ;;  %1638 = vmatpush.msra.mxu2 %v1940_v63 }
0x107f   :  { %1551 = vmatpush.msrb.mxu3 %v2660_v56  ;;  %1639 = vmatpush.msra.mxu2 %v1941_v51 }
0x1080   :  { %1768 = vmatmul.msk.f32.vlgmr.msra.gmra.mxu3 %vm174_vm0, %v1389_v59  ;;  %1771 = vmatmul.msk.f32.vlgmr.msrb.gmra.mxu2 %vm174_vm0, %v1389_v59 }
0x10fb   :  { %v1303_v53 = vpop.f32.mrf.mxu3  ;;  %v1384_v0 = vpop.f32.mrf.mxu2 }
0x10fc   :  { %v1304_v24 = vadd.f32 %v2495_v18, %v1303_v53 }
0x10fe   :  { %1307 = vst [vmem:[#allocation18 + $0x28] sm:$0xff] %v1304_v24 }
0x1103   :  { %v1409_v60 = vpop.f32.mrf.mxu3  ;;  %v1495_v2 = vpop.f32.mrf.mxu2 }
0x1104   :  { %v1410_v9 = vadd.f32 %v1409_v60, %v1384_v0  ;;  %v1498_v55 = vadd.f32 %v1495_v2, %v1477_v52 }
0x1106   :  { %v1412_v56 = vadd.f32 %v2675_v58, %v1410_v9  ;;  %1900 = vtanh.f32 %v1498_v55  ;;  %v1772_v13 = vmul.f32 -1.442695, %v1498_v55 }
0x1108   :  { %1902 = vtanh.f32 %v1412_v56  ;;  %v1769_v18 = vmul.f32 -1.442695, %v1412_v56 }
0x1109   :  { %1904 = vpow2.f32 %v1772_v13 }
0x110a   :  { %1906 = vpow2.f32 %v1769_v18 }
0x110c   :  { %v1901_v11 = vpop.eup %1900 }
0x110d   :  { %1521 = vrot.lane.b32.xlu1 %v1901_v11, %s2231_s6 }
0x110e   :  { %v1903_v12 = vpop.eup %1902 }
0x110f   :  { %1435 = vrot.lane.b32.xlu0 %v1903_v12, %s2231_s6  ;;  %v1905_v14 = vpop.eup %1904 }
0x1110   :  { %v1907_v57 = vpop.eup %1906  ;;  %v1502_v15 = vadd.f32 1.0, %v1905_v14 }
0x1111   :  { %v1416_v16 = vadd.f32 1.0, %v1907_v57 }
0x1112   :  { %1908 = vrcp.f32 %v1502_v15  ;;  %v1514_v29 = vand.u32 2147483648, %v1502_v15  ;;  %vm1508_vm9 = vweird.f32 %v1502_v15  ;;  %v1512_v1 = vand.u32 2147483647, %v1502_v15 }
0x1113   :  { %1910 = vrcp.f32 %v1416_v16  ;;  %v1428_v31 = vand.u32 2147483648, %v1416_v16  ;;  %vm1422_vm12 = vweird.f32 %v1416_v16  ;;  %v1426_v34 = vand.u32 2147483647, %v1416_v16 }
0x1114   :  { %v1515_v35 = vor.u32 1.1754944e-38, %v1514_v29  ;;  %vm1513_vm14 = vcmp.eq.f32.partialorder %v1512_v1, 8.507059e+37 }
0x1115   :  { %v1429_v23 = vor.u32 1.1754944e-38, %v1428_v31  ;;  %vm1427_vm15 = vcmp.eq.f32.partialorder %v1426_v34, 8.507059e+37 }
0x1118   :  { %v1909_v17 = vpop.eup %1908 }
0x1119   :  { %v1911_v19 = vpop.eup %1910  ;;  %v1504_v21 = vmul.f32 %v1909_v17, %v1502_v15  ;;  %vm1509_vm8 = vweird.f32 %v1909_v17 }
0x111a   :  { %v1418_v22 = vmul.f32 %v1911_v19, %v1416_v16  ;;  %vm1423_vm10 = vweird.f32 %v1911_v19  ;;  %vm1510_vm11 = vmor %vm1508_vm9, %vm1509_vm8 }
0x111b   :  { %v1505_v25 = vsub.f32 1.0, %v1504_v21  ;;  %vm1424_vm13 = vmor %vm1422_vm12, %vm1423_vm10 }
0x111c   :  { %v1419_v26 = vsub.f32 1.0, %v1418_v22 }
0x111d   :  { %v1506_v27 = vmul.f32 %v1909_v17, %v1505_v25 }
0x111e   :  { %v1420_v61 = vmul.f32 %v1911_v19, %v1419_v26 }
0x111f   :  { %v1507_v28 = vadd.f32 %v1909_v17, %v1506_v27 }
0x1120   :  { %v1421_v30 = vadd.f32 %v1911_v19, %v1420_v61 }
0x1121   :  { %v1511_v32 = vsel %vm1510_vm11, %v1909_v17, %v1507_v28 }
0x1122   :  { %v1425_v36 = vsel %vm1424_vm13, %v1911_v19, %v1421_v30  ;;  %v1516_v39 = vsel %vm1513_vm14, %v1515_v35, %v1511_v32 }
0x1123   :  { %v1430_v43 = vsel %vm1427_vm15, %v1429_v23, %v1425_v36  ;;  %v1519_v41 = vmul.f32 %v1516_v39, %v2683_v5 }
0x1124   :  { %v1433_v46 = vmul.f32 %v1430_v43, %v2688_v44 }
0x117f   :  { %v1522_v38 = vpop.permute.xlu1 %1521 }
0x1180   :  { %v1524_v40 = vmul.f32 %v1522_v38, %v1516_v39 }
0x1181   :  { %v1436_v42 = vpop.permute.xlu0 %1435 }
0x1182   :  { %v1438_v20 = vmul.f32 %v1436_v42, %v1430_v43  ;;  %1526 = vrot.lane.b32.xlu0 %v1524_v40, %s2232_s27 }
0x1184   :  { %1440 = vrot.lane.b32.xlu2 %v1438_v20, %s2232_s27 }
0x11de   :  { %v1441_v37 = vpop.permute.xlu2 %1440 }
0x11df   :  { %v1443_v4 = vadd.f32 %v1441_v37, %v1433_v46 }
0x11e1   :  { %1912 = vtanh.f32 %v1443_v4 }
0x11e7   :  { %v1913_v48 = vpop.eup %1912 }
0x11e8   :  { %1446 = vrot.lane.b32.xlu1 %v1913_v48, %s2231_s6 }
0x11f4   :  { %v1527_v33 = vpop.permute.xlu0 %1526 }
0x11f5   :  { %v1529_v50 = vadd.f32 %v1527_v33, %v1519_v41 }
0x11f7   :  { %1914 = vtanh.f32 %v1529_v50 }
0x11fd   :  { %v1915_v54 = vpop.eup %1914 }
0x11fe   :  { %1532 = vrot.lane.b32.xlu2 %v1915_v54, %s2231_s6 }
0x1258   :  { %v1533_v10 = vpop.permute.xlu2 %1532 }
0x1259   :  { %v1535_v47 = vmul.f32 %v1533_v10, %v1516_v39 }
0x125a   :  { %v1447_v3 = vpop.permute.xlu1 %1446 }
0x125b   :  { %v1449_v6 = vmul.f32 %v1447_v3, %v1430_v43  ;;  %1557 = vrot.lane.b32.xlu1 %v1535_v47, %s2232_s27 }
0x125d   :  { %1451 = vrot.lane.b32.xlu0 %v1449_v6, %s2232_s27 }
0x12cd   :  { %v1558_v44 = vpop.permute.xlu1 %1557 }
0x12ce   :  { %1647 = vst.msk [vmem:[#allocation2] sm:$0xff] %vm174_vm0, %v1558_v44 }
0x12cf   :  { %v1452_v8 = vpop.permute.xlu0 %1451 }
0x12d0   :  { %1770 = vmatmul.msk.f32.vlgmr.msrb.gmra.mxu1 %vm174_vm0, %v1452_v8  ;;  %1773 = vmatmul.msk.f32.vlgmr.msrb.gmra.mxu3 %vm174_vm0, %v1452_v8 }
0x12d5   :  { %v1663_v5 = vld [vmem:[#allocation2] sm:$0xff] }
0x12d6   :  { %1665 = vst.msk [vmem:[#allocation19] sm:$0xff] %vm174_vm0, %v1663_v5 }
0x12d8   :  { %1774 = vmatmul.msk.f32.vlgmr.msra.gmra.mxu1 %vm174_vm0, %v1558_v44 }
0x134d   :  { %v1472_v49 = vpop.f32.mrf.mxu1 }
0x134e   :  { %v1473_v62 = vadd.f32 %v2723_v45, %v1472_v49 }
0x1350   :  { %1476 = vst [vmem:[#allocation18 + $0x30] sm:$0xff] %v1473_v62 }
0x1353   :  { %v1553_v63 = vpop.f32.mrf.mxu3 }
0x1355   :  { %v1578_v59 = vpop.f32.mrf.mxu1 }
0x1356   :  { %v1579_v51 = vadd.f32 %v1578_v59, %v1553_v63 }
0x1358   :  { %v1581_v53 = vadd.f32 %v2675_v58, %v1579_v51 }
0x135a   :  { %1916 = vtanh.f32 %v1581_v53  ;;  %v1775_v24 = vmul.f32 -1.442695, %v1581_v53 }
0x135c   :  { %1918 = vpow2.f32 %v1775_v24 }
0x1360   :  { %v1917_v0 = vpop.eup %1916 }
0x1361   :  { %1604 = vrot.lane.b32.xlu2 %v1917_v0, %s2231_s6 }
0x1362   :  { %v1919_v7 = vpop.eup %1918 }
0x1363   :  { %v1585_v52 = vadd.f32 1.0, %v1919_v7 }
0x1365   :  { %1920 = vrcp.f32 %v1585_v52  ;;  %v1597_v11 = vand.u32 2147483648, %v1585_v52  ;;  %vm1591_vm2 = vweird.f32 %v1585_v52  ;;  %v1595_v12 = vand.u32 2147483647, %v1585_v52 }
0x1367   :  { %v1598_v13 = vor.u32 1.1754944e-38, %v1597_v11  ;;  %vm1596_vm4 = vcmp.eq.f32.partialorder %v1595_v12, 8.507059e+37 }
0x136b   :  { %v1921_v60 = vpop.eup %1920 }
0x136c   :  { %v1587_v2 = vmul.f32 %v1921_v60, %v1585_v52  ;;  %vm1592_vm1 = vweird.f32 %v1921_v60 }
0x136d   :  { %vm1593_vm3 = vmor %vm1591_vm2, %vm1592_vm1 }
0x136e   :  { %v1588_v9 = vsub.f32 1.0, %v1587_v2 }
0x1370   :  { %v1589_v55 = vmul.f32 %v1921_v60, %v1588_v9 }
0x1372   :  { %v1590_v56 = vadd.f32 %v1921_v60, %v1589_v55 }
0x1374   :  { %v1594_v58 = vsel %vm1593_vm3, %v1921_v60, %v1590_v56 }
0x1375   :  { %v1599_v14 = vsel %vm1596_vm4, %v1598_v13, %v1594_v58 }
0x1376   :  { %v1602_v15 = vmul.f32 %v1599_v14, %v1443_v4 }
0x13bb   :  { %v1605_v18 = vpop.permute.xlu2 %1604 }
0x13bc   :  { %v1607_v57 = vmul.f32 %v1605_v18, %v1599_v14 }
0x13be   :  { %1609 = vrot.lane.b32.xlu0 %v1607_v57, %s2232_s27 }
0x13c6   :  { %1649 = vrot.lane.b32.xlu0 %v1529_v50, %s2233_s10 }
0x1430   :  { %v1610_v16 = vpop.permute.xlu0 %1609 }
0x1431   :  { %v1612_v17 = vadd.f32 %v1610_v16, %v1602_v15 }
0x1433   :  { %1922 = vtanh.f32 %v1612_v17 }
0x1438   :  { %v1650_v19 = vpop.permute.xlu0 %1649 }
0x1439   :  { %v1923_v21 = vpop.eup %1922  ;;  %1652 = vst.msk [vmem:[#allocation3] sm:$0xff] %vm174_vm0, %v1650_v19 }
0x143a   :  { %1615 = vrot.lane.b32.xlu1 %v1923_v21, %s2231_s6  ;;  %s1677_s6 = sshll.u32 %s2768_s11, 4  ;;  %s1678_s6 = int_to_ptr.hbm [resolvable:$true] %s1677_s6 }
0x1440   :  { %v1667_v22 = vld [vmem:[#allocation3] sm:$0xff] }
0x1441   :  { %1669 = vst.msk [vmem:[#allocation21] sm:$0xff] %vm174_vm0, %v1667_v22 }
0x1442   :  { %1656 = vrot.lane.b32.xlu1 %v1612_v17, %s2233_s10 }
0x14ac   :  { %v1616_v25 = vpop.permute.xlu1 %1615 }
0x14ad   :  { %v1618_v26 = vmul.f32 %v1616_v25, %v1599_v14 }
0x14af   :  { %1620 = vrot.lane.b32.xlu2 %v1618_v26, %s2232_s27 }
0x14b4   :  { %v1657_v27 = vpop.permute.xlu1 %1656 }
0x14b5   :  { %1659 = vst.msk [vmem:[#allocation3 + $0x8] sm:$0xff] %vm174_vm0, %v1657_v27 }
0x14bc   :  { %v1668_v61 = vld [vmem:[#allocation3 + $0x8] sm:$0xff] }
0x14bd   :  { %1670 = vst.msk [vmem:[#allocation21 + $0x8] sm:$0xff] %vm174_vm0, %v1668_v61 }
0x1509   :  { %v1621_v28 = vpop.permute.xlu2 %1620 }
0x150a   :  { %1654 = vst.msk [vmem:[#allocation2 + $0x8] sm:$0xff] %vm174_vm0, %v1621_v28  ;;  %1776 = vmatmul.msk.f32.vlgmr.msra.gmra.mxu2 %vm174_vm0, %v1621_v28 }
0x1511   :  { %v1664_v29 = vld [vmem:[#allocation2 + $0x8] sm:$0xff] }
0x1512   :  { %1666 = vst.msk [vmem:[#allocation19 + $0x8] sm:$0xff] %vm174_vm0, %v1664_v29 }
0x1513   :  { %1696 = dma.vmem_to_hbm [thread:$0]  %s1689_s20, 256, %s1691_s4, [#allocation20], %s2222_s16, %s2222_s16, %s2223_s17  }
0x1514   :  { %1709 = dma.vmem_to_hbm [thread:$0]  %s1702_s22, 256, %s1704_s25, [#allocation20], %s2222_s16, %s2222_s16, %s2223_s17  }
0x158d   :  { %v1641_v1 = vpop.f32.mrf.mxu2 }
0x158e   :  { %v1642_v30 = vadd.f32 %v2723_v45, %v1641_v1 }
0x1590   :  { %1645 = vst [vmem:[#allocation18 + $0x38] sm:$0xff] %v1642_v30 }
0x1591   :  { %1683 = dma.vmem_to_hbm [thread:$0]  %s1676_s7, 1024, %s1678_s6, [#allocation6], %s2222_s16, %s2222_s16, %s2223_s17  }
0x1592   :  { %2217 = dma.done.wait [#allocation6], 1024  }
0x1593   :  { %2218 = vsyncadd [#allocation6], 4294966272 }
0x1594   :  { %2219 = dma.done.wait [#allocation20], 512  }
0x1595   :  { %2220 = vsyncadd [#allocation20], 4294966784 }
0x1596   :  { %1722 = vsyncpa [#allocation5], 1 }
0x1597   :  { %1723 = vsyncpa [#allocation8], 1 }
0x1598   :  { %1724 = vsyncpa [#allocation11], 1 }
0x1599   :  { %1725 = vsyncpa [#allocation14], 1 }
0x159a   :  { %1726 = vsyncpa [#allocation17], 1 }
0x159b   :  { %1727 = vsyncpa [#allocation6], 1 }
0x159c   :  { %1728 = vsyncpa [#allocation20], 1 }

// kernel: tpu_custom_call.1
= control target key start
LH: loop header
LB: loop body
LE: loop exit
PB: predicated region body
PF: predicated region fallthrough
CT: control target
= control target key end

     0   :  { %19 = vsyncpa [#allocation5], 0  ;;  %s2757_s0 = inlined_call_operand.hbm [shape: f32[8,8,128], index: 0, kind: input, shape index: {}]   ;;  %s2758_s1 = inlined_call_operand.hbm [shape: f32[2,8,32], index: 1, kind: input, shape index: {}]   ;;  %s2759_s2 = inlined_call_operand.hbm [shape: f32[2,8,32], index: 2, kind: input, shape index: {}]   ;;  %s2760_s3 = inlined_call_operand.hbm [shape: f32[128,128], index: 3, kind: input, shape index: {}]   ;;  %s2761_s4 = inlined_call_operand.hbm [shape: f32[32,128], index: 4, kind: input, shape index: {}]   ;;  %s2762_s5 = inlined_call_operand.vmem [shape: f32[1,128], index: 5, kind: input, shape index: {}]   ;;  %s2763_s6 = inlined_call_operand.hbm [shape: f32[32,128], index: 6, kind: input, shape index: {}]   ;;  %s2764_s7 = inlined_call_operand.hbm [shape: f32[32,128], index: 7, kind: input, shape index: {}]   ;;  %s2765_s8 = inlined_call_operand.vmem [shape: f32[1,128], index: 8, kind: input, shape index: {}]   ;;  %s2766_s9 = inlined_call_operand.hbm [shape: f32[32,128], index: 9, kind: input, shape index: {}]   ;;  %s2767_s10 = inlined_call_operand.vmem [shape: f32[1,128], index: 10, kind: input, shape index: {}]   ;;  %s2768_s11 = inlined_call_operand.hbm [shape: f32[8,8,128], index: 11, kind: output, shape index: {0}]   ;;  %s2769_s12 = inlined_call_operand.hbm [shape: f32[2,8,32], index: 12, kind: output, shape index: {1}]   ;;  %s2770_s13 = inlined_call_operand.hbm [shape: f32[2,8,32], index: 13, kind: output, shape index: {2}]  }
   0x1   :  { %20 = vsyncpa [#allocation8], 0 }
   0x2   :  { %21 = vsyncpa [#allocation11], 0 }
   0x3   :  { %22 = vsyncpa [#allocation14], 0 }
   0x4   :  { %23 = vsyncpa [#allocation17], 0 }
   0x5   :  { %24 = vsyncpa [#allocation6], 0 }
   0x6   :  { %25 = vsyncpa [#allocation20], 0  ;;  %s43_s27 = sshll.u32 %s2758_s1, 4  ;;  %s2221_s28 = smov [#allocation7]   ;;  %s44_s27 = int_to_ptr.hbm [resolvable:$true] %s43_s27 }
   0x7   :  { %s45_s29 = sshll.u32 %s2221_s28, 4  ;;  %s69_s15 = sshll.u32 %s2760_s3, 4  ;;  %s46_s29 = int_to_ptr.vmem [resolvable:$true] %s45_s29  ;;  %s70_s15 = int_to_ptr.hbm [resolvable:$true] %s69_s15 }
   0x8   :  { %s2222_s16 = smov 128   ;;  %s2223_s17 = smov 8  }
   0x9   :  { %51 = dma.hbm_to_vmem [thread:$0]  %s44_s27, 256, %s46_s29, [#allocation8], %s2222_s16, %s2222_s16, %s2223_s17  }
   0xa   :  { %s2224_s18 = smov [#allocation10]   ;;  %s97_s1 = sshll.u32 %s2763_s6, 4  ;;  %s98_s1 = int_to_ptr.hbm [resolvable:$true] %s97_s1 }
   0xb   :  { %s71_s19 = sshll.u32 %s2224_s18, 4  ;;  %s30_s23 = sshll.u32 %s2757_s0, 4  ;;  %s72_s19 = int_to_ptr.vmem [resolvable:$true] %s71_s19  ;;  %s31_s23 = int_to_ptr.hbm [resolvable:$true] %s30_s23 }
   0xc   :  { %77 = dma.hbm_to_vmem [thread:$0]  %s70_s15, 2048, %s72_s19, [#allocation11], %s2222_s16, %s2222_s16, %s2223_s17  }
   0xd   :  { %s2225_s24 = smov [#allocation13]   ;;  %s2226_s26 = smov [#allocation4]  }
   0xe   :  { %s99_s25 = sshll.u32 %s2225_s24, 4  ;;  %s32_s6 = sshll.u32 %s2226_s26, 4  ;;  %s100_s25 = int_to_ptr.vmem [resolvable:$true] %s99_s25  ;;  %s33_s6 = int_to_ptr.vmem [resolvable:$true] %s32_s6 }
   0xf   :  { %105 = dma.hbm_to_vmem [thread:$0]  %s98_s1, 512, %s100_s25, [#allocation14], %s2222_s16, %s2222_s16, %s2223_s17  }
  0x10   :  { %s56_s29 = sshll.u32 %s2759_s2, 4  ;;  %s82_s14 = sshll.u32 %s2761_s4, 4  ;;  %s57_s29 = int_to_ptr.hbm [resolvable:$true] %s56_s29  ;;  %s83_s14 = int_to_ptr.hbm [resolvable:$true] %s82_s14 }
  0x11   :  { %38 = dma.hbm_to_vmem [thread:$0]  %s31_s23, 1024, %s33_s6, [#allocation5], %s2222_s16, %s2222_s16, %s2223_s17  }
  0x12   :  { %s2227_s15 = smov [#allocation9]   ;;  %s2228_s19 = smov [#allocation12]  }
  0x13   :  { %s58_s18 = sshll.u32 %s2227_s15, 4  ;;  %s84_s2 = sshll.u32 %s2228_s19, 4  ;;  %s59_s18 = int_to_ptr.vmem [resolvable:$true] %s58_s18  ;;  %s85_s2 = int_to_ptr.vmem [resolvable:$true] %s84_s2 }
  0x14   :  { %64 = dma.hbm_to_vmem [thread:$0]  %s57_s29, 256, %s59_s18, [#allocation8], %s2222_s16, %s2222_s16, %s2223_s17  }
  0x15   :  { %s110_s1 = sshll.u32 %s2764_s7, 4  ;;  %s125_s22 = sshll.u32 %s2766_s9, 4  ;;  %s111_s1 = int_to_ptr.hbm [resolvable:$true] %s110_s1  ;;  %s126_s22 = int_to_ptr.hbm [resolvable:$true] %s125_s22 }
  0x16   :  { %90 = dma.hbm_to_vmem [thread:$0]  %s83_s14, 512, %s85_s2, [#allocation11], %s2222_s16, %s2222_s16, %s2223_s17  }
  0x17   :  { %s2229_s23 = smov [#allocation15]   ;;  %s2230_s25 = smov [#allocation16]  }
  0x18   :  { %s112_s24 = sshll.u32 %s2229_s23, 4  ;;  %s127_s7 = sshll.u32 %s2230_s25, 4  ;;  %s113_s24 = int_to_ptr.vmem [resolvable:$true] %s112_s24  ;;  %s128_s7 = int_to_ptr.vmem [resolvable:$true] %s127_s7 }
  0x19   :  { %118 = dma.hbm_to_vmem [thread:$0]  %s111_s1, 512, %s113_s24, [#allocation14], %s2222_s16, %s2222_s16, %s2223_s17  }
  0x1a   :  { %133 = dma.hbm_to_vmem [thread:$0]  %s126_s22, 512, %s128_s7, [#allocation17], %s2222_s16, %s2222_s16, %s2223_s17  }
  0x1b   :  { %2207 = dma.done.wait [#allocation5], 1024  }
  0x1c   :  { %2208 = vsyncadd [#allocation5], 4294966272 }
  0x1d   :  { %2209 = dma.done.wait [#allocation8], 512  }
  0x1e   :  { %2210 = vsyncadd [#allocation8], 4294966784 }
  0x1f   :  { %2211 = dma.done.wait [#allocation11], 2560  }
  0x20   :  { %2212 = vsyncadd [#allocation11], 4294964736 }
  0x21   :  { %2213 = dma.done.wait [#allocation14], 1024  }
  0x22   :  { %2214 = vsyncadd [#allocation14], 4294966272 }
  0x23   :  { %2215 = dma.done.wait [#allocation17], 512  }
  0x24   :  { %2216 = vsyncadd [#allocation17], 4294966784  ;;  %v232_v0 = vld [vmem:[#allocation10 + $0x78] sm:$0xff]  ;;  %v231_v1 = vld [vmem:[#allocation10 + $0x70] sm:$0xff]  ;;  %vm174_vm0 = vcmask 261120   ;;  %s2231_s6 = smov 64  }
  0x25   :  { %233 = vmatpush.msra.mxu0 %v232_v0  ;;  %v230_v2 = vld [vmem:[#allocation10 + $0x68] sm:$0xff]  ;;  %v229_v3 = vld [vmem:[#allocation10 + $0x60] sm:$0xff]  ;;  %v2355_v4 = vld [vmem:[#allocation12 + $0x18] sm:$0xff]  ;;  %s2232_s27 = smov 32   ;;  %s2234_s2 = smov [#allocation19]  }
  0x26   :  { %297 = vmatpush.msra.mxu1 %v2355_v4  ;;  %v2358_v5 = vld [vmem:[#allocation12 + $0x10] sm:$0xff]  ;;  %v228_v6 = vld [vmem:[#allocation10 + $0x58] sm:$0xff]  ;;  %v2360_v7 = vld [vmem:[#allocation12 + $0x8] sm:$0xff]  ;;  %s1688_s20 = sshll.u32 %s2234_s2, 4  ;;  %s1690_s4 = sshll.u32 %s2769_s12, 4  ;;  %s1689_s20 = int_to_ptr.vmem [resolvable:$true] %s1688_s20  ;;  %s1691_s4 = int_to_ptr.hbm [resolvable:$true] %s1690_s4 }
  0x27   :  { %234 = vmatpush.msra.mxu0 %v231_v1  ;;  %v227_v8 = vld [vmem:[#allocation10 + $0x50] sm:$0xff]  ;;  %v172_v9 = vld [vmem:[#allocation7] sm:$0xff]  ;;  %v226_v11 = vld [vmem:[#allocation10 + $0x48] sm:$0xff]  ;;  %s2235_s3 = smov [#allocation21]   ;;  %s1703_s25 = sshll.u32 %s2770_s13, 4  ;;  %s1704_s25 = int_to_ptr.hbm [resolvable:$true] %s1703_s25 }
  0x28   :  { %298 = vmatpush.msra.mxu1 %v2358_v5  ;;  %v2363_v10 = vld [vmem:[#allocation12] sm:$0xff]  ;;  %175 = vst.msk [vmem:[#allocation2] sm:$0xff] %vm174_vm0, %v172_v9  ;;  %v224_v13 = vld [vmem:[#allocation10 + $0x38] sm:$0xff]  ;;  %v223_v15 = vld [vmem:[#allocation10 + $0x30] sm:$0xff]  ;;  %s1701_s22 = sshll.u32 %s2235_s3, 4  ;;  %s2236_s12 = smov [#allocation18]   ;;  %s1702_s22 = int_to_ptr.vmem [resolvable:$true] %s1701_s22 }
  0x29   :  { %235 = vmatpush.msra.mxu0 %v230_v2  ;;  %v225_v12 = vld [vmem:[#allocation10 + $0x40] sm:$0xff]  ;;  %v222_v16 = vld [vmem:[#allocation10 + $0x28] sm:$0xff]  ;;  %v220_v18 = vld [vmem:[#allocation10 + $0x18] sm:$0xff]  ;;  %s1675_s7 = sshll.u32 %s2236_s12, 4  ;;  %s1676_s7 = int_to_ptr.vmem [resolvable:$true] %s1675_s7 }
  0x2a   :  { %299 = vmatpush.msra.mxu1 %v2360_v7  ;;  %v221_v17 = vld [vmem:[#allocation10 + $0x20] sm:$0xff]  ;;  %v219_v19 = vld [vmem:[#allocation10 + $0x10] sm:$0xff]  ;;  %v218_v20 = vld [vmem:[#allocation10 + $0x8] sm:$0xff] }
  0x2b   :  { %236 = vmatpush.msra.mxu0 %v229_v3  ;;  %v217_v21 = vld [vmem:[#allocation10] sm:$0xff]  ;;  %v177_v23 = vld [vmem:[#allocation9] sm:$0xff]  ;;  %v2383_v51 = vld [vmem:[#allocation15 + $0x18] sm:$0xff] }
  0x2c   :  { %300 = vmatpush.msra.mxu1 %v2363_v10  ;;  %v209_v22 = vld [vmem:[#allocation4] sm:$0xff]  ;;  %179 = vst.msk [vmem:[#allocation3] sm:$0xff] %vm174_vm0, %v177_v23  ;;  %v2385_v52 = vld [vmem:[#allocation15 + $0x10] sm:$0xff]  ;;  %362 = vmatpush.msra.mxu2 %v2383_v51  ;;  %v173_v53 = vld [vmem:[#allocation7 + $0x8] sm:$0xff] }
  0x2d   :  { %237 = vmatpush.msra.mxu0 %v228_v6  ;;  %v2373_v24 = vld [vmem:[%s2762_s5] ss:$0 sm:$0xff]  ;;  %v2388_v54 = vld [vmem:[#allocation13 + $0x18] sm:$0xff]  ;;  %v2390_v55 = vld [vmem:[#allocation15 + $0x8] sm:$0xff]  ;;  %176 = vst.msk [vmem:[#allocation2 + $0x8] sm:$0xff] %vm174_vm0, %v173_v53 }
  0x2e   :  { %387 = vmatpush.msra.mxu3 %v2388_v54  ;;  %v2394_v56 = vld [vmem:[#allocation13 + $0x10] sm:$0xff]  ;;  %363 = vmatpush.msra.mxu2 %v2385_v52  ;;  %v2397_v57 = vld [vmem:[#allocation13 + $0x8] sm:$0xff]  ;;  %v2399_v58 = vld [vmem:[#allocation15] sm:$0xff] }
  0x2f   :  { %238 = vmatpush.msra.mxu0 %v227_v8  ;;  %v274_v14 = vld [vmem:[#allocation2] sm:$0xff]  ;;  %v210_v63 = vld [vmem:[#allocation4 + $0x8] sm:$0xff]  ;;  %v178_v0 = vld [vmem:[#allocation9 + $0x8] sm:$0xff] }
  0x30   :  { %1729 = vmatmul.msk.f32.vlgmr.msra.gmra.mxu1 %vm174_vm0, %v274_v14  ;;  %388 = vmatpush.msra.mxu3 %v2394_v56  ;;  %v2403_v59 = vld [vmem:[#allocation13] sm:$0xff]  ;;  %180 = vst.msk [vmem:[#allocation3 + $0x8] sm:$0xff] %vm174_vm0, %v178_v0 }
  0x31   :  { %239 = vmatpush.msra.mxu0 %v226_v11  ;;  %364 = vmatpush.msra.mxu2 %v2390_v55  ;;  %v2430_v9 = vld [vmem:[%s2765_s8] ss:$0 sm:$0xff] }
  0x32   :  { %389 = vmatpush.msra.mxu3 %v2397_v57 }
  0x33   :  { %240 = vmatpush.msra.mxu0 %v225_v12  ;;  %v275_v30 = vld [vmem:[#allocation3] sm:$0xff]  ;;  %365 = vmatpush.msra.mxu2 %v2399_v58 }
  0x34   :  { %390 = vmatpush.msra.mxu3 %v2403_v59  ;;  %v277_v60 = vld [vmem:[#allocation2 + $0x8] sm:$0xff] }
  0x35   :  { %241 = vmatpush.msra.mxu0 %v224_v13  ;;  %476 = vmatpush.msrb.mxu2 %v2355_v4 }
  0x36   :  { %534 = vmatpush.msrb.mxu3 %v2383_v51  ;;  %1731 = vmatmul.msk.f32.vlgmr.msra.gmra.mxu2 %vm174_vm0, %v277_v60 }
  0x37   :  { %242 = vmatpush.msra.mxu0 %v223_v15  ;;  %477 = vmatpush.msrb.mxu2 %v2358_v5  ;;  %v279_v1 = vld [vmem:[#allocation3 + $0x8] sm:$0xff] }
  0x38   :  { %535 = vmatpush.msrb.mxu3 %v2385_v52 }
  0x39   :  { %243 = vmatpush.msra.mxu0 %v222_v16  ;;  %478 = vmatpush.msrb.mxu2 %v2360_v7 }
  0x3a   :  { %536 = vmatpush.msrb.mxu3 %v2390_v55 }
  0x3b   :  { %244 = vmatpush.msra.mxu0 %v221_v17  ;;  %479 = vmatpush.msrb.mxu2 %v2363_v10 }
  0x3c   :  { %537 = vmatpush.msrb.mxu3 %v2399_v58 }
  0x3d   :  { %245 = vmatpush.msra.mxu0 %v220_v18 }
  0x3f   :  { %246 = vmatpush.msra.mxu0 %v219_v19 }
  0x41   :  { %247 = vmatpush.msra.mxu0 %v218_v20 }
  0x43   :  { %248 = vmatpush.msra.mxu0 %v217_v21 }
  0x44   :  { %249 = vmatmul.f32.vlgmr.msra.gmra.mxu0 %v209_v22 }
  0x4c   :  { %252 = vmatmul.f32.gmra.mxu0 %v210_v63 }
  0xad   :  { %v302_v26 = vpop.f32.mrf.mxu1 }
  0xb9   :  { %v367_v3 = vpop.f32.mrf.mxu2 }
  0xc1   :  { %v250_v25 = vpop.f32.mrf.mxu0 }
  0xc2   :  { %v280_v27 = vadd.f32 %v2373_v24, %v250_v25 }
  0xc4   :  { %v305_v28 = vadd.f32 %v302_v26, %v280_v27 }
  0xc6   :  { %1796 = vtanh.f32 %v305_v28  ;;  %v1730_v31 = vmul.f32 -1.442695, %v305_v28 }
  0xc8   :  { %1798 = vpow2.f32 %v1730_v31 }
  0xc9   :  { %v253_v6 = vpop.f32.mrf.mxu0 }
  0xca   :  { %v463_v8 = vadd.f32 %v2373_v24, %v253_v6  ;;  %v2448_v6 = vld [vmem:[#allocation16 + $0x10] sm:$0xff] }
  0xcc   :  { %v1797_v29 = vpop.eup %1796 }
  0xcd   :  { %332 = vrot.lane.b32.xlu0 %v1797_v29, %s2231_s6 }
  0xce   :  { %v1799_v32 = vpop.eup %1798 }
  0xcf   :  { %v309_v33 = vadd.f32 1.0, %v1799_v32 }
  0xd1   :  { %1800 = vrcp.f32 %v309_v33  ;;  %v321_v39 = vand.u32 2147483648, %v309_v33  ;;  %vm315_vm2 = vweird.f32 %v309_v33  ;;  %v319_v40 = vand.u32 2147483647, %v309_v33 }
  0xd3   :  { %v322_v42 = vor.u32 1.1754944e-38, %v321_v39  ;;  %vm320_vm4 = vcmp.eq.f32.partialorder %v319_v40, 8.507059e+37 }
  0xd5   :  { %327 = vrot.lane.b32.xlu0 %v275_v30, %s2232_s27 }
  0xd7   :  { %v1801_v34 = vpop.eup %1800 }
  0xd8   :  { %v311_v35 = vmul.f32 %v1801_v34, %v309_v33  ;;  %vm316_vm1 = vweird.f32 %v1801_v34 }
  0xd9   :  { %vm317_vm3 = vmor %vm315_vm2, %vm316_vm1 }
  0xda   :  { %v312_v36 = vsub.f32 1.0, %v311_v35 }
  0xdc   :  { %v313_v37 = vmul.f32 %v1801_v34, %v312_v36 }
  0xde   :  { %v314_v38 = vadd.f32 %v1801_v34, %v313_v37 }
  0xe0   :  { %v318_v41 = vsel %vm317_vm3, %v1801_v34, %v314_v38 }
  0xe1   :  { %v323_v44 = vsel %vm320_vm4, %v322_v42, %v318_v41 }
 0x13f   :  { %v333_v43 = vpop.permute.xlu0 %332 }
 0x140   :  { %v335_v45 = vmul.f32 %v333_v43, %v323_v44 }
 0x142   :  { %337 = vrot.lane.b32.xlu1 %v335_v45, %s2232_s27 }
 0x147   :  { %v328_v46 = vpop.permute.xlu0 %327 }
 0x148   :  { %v330_v47 = vmul.f32 %v328_v46, %v323_v44 }
 0x1b4   :  { %v338_v48 = vpop.permute.xlu1 %337 }
 0x1b5   :  { %v2379_v49 = vadd.f32 %v338_v48, %v330_v47 }
 0x1b7   :  { %1802 = vtanh.f32 %v2379_v49 }
 0x1bd   :  { %v1803_v50 = vpop.eup %1802 }
 0x1be   :  { %343 = vrot.lane.b32.xlu1 %v1803_v50, %s2231_s6 }
 0x1c6   :  { %417 = vrot.lane.b32.xlu1 %v279_v1, %s2232_s27 }
 0x230   :  { %v344_v61 = vpop.permute.xlu1 %343 }
 0x231   :  { %v346_v62 = vmul.f32 %v344_v61, %v323_v44 }
 0x233   :  { %371 = vrot.lane.b32.xlu2 %v346_v62, %s2232_s27 }
 0x238   :  { %v418_v50 = vpop.permute.xlu1 %417 }
 0x28d   :  { %v372_v2 = vpop.permute.xlu2 %371 }
 0x28e   :  { %1732 = vmatmul.msk.f32.vlgmr.msra.gmra.mxu3 %vm174_vm0, %v372_v2  ;;  %1735 = vmatmul.msk.f32.vlgmr.msrb.gmra.mxu2 %vm174_vm0, %v372_v2 }
 0x28f   :  { %645 = vmatpush.msra.mxu3 %v2355_v4 }
 0x291   :  { %646 = vmatpush.msra.mxu3 %v2358_v5 }
 0x293   :  { %647 = vmatpush.msra.mxu3 %v2360_v7 }
 0x295   :  { %648 = vmatpush.msra.mxu3 %v2363_v10 }
 0x311   :  { %v392_v11 = vpop.f32.mrf.mxu3  ;;  %v481_v12 = vpop.f32.mrf.mxu2 }
 0x312   :  { %v393_v13 = vadd.f32 %v392_v11, %v367_v3  ;;  %v484_v14 = vadd.f32 %v481_v12, %v463_v8  ;;  %v2446_v3 = vld [vmem:[#allocation16 + $0x18] sm:$0xff]  ;;  %v2452_v8 = vld [vmem:[#allocation16 + $0x8] sm:$0xff] }
 0x313   :  { %454 = vmatpush.msrb.mxu1 %v2446_v3  ;;  %622 = vmatpush.msra.mxu2 %v2446_v3 }
 0x314   :  { %v395_v15 = vadd.f32 %v2430_v9, %v393_v13  ;;  %1804 = vtanh.f32 %v484_v14  ;;  %v1736_v21 = vmul.f32 -1.442695, %v484_v14 }
 0x315   :  { %455 = vmatpush.msrb.mxu1 %v2448_v6  ;;  %623 = vmatpush.msra.mxu2 %v2448_v6 }
 0x316   :  { %1806 = vtanh.f32 %v395_v15  ;;  %v1733_v18 = vmul.f32 -1.442695, %v395_v15  ;;  %v211_v15 = vld [vmem:[#allocation4 + $0x10] sm:$0xff] }
 0x317   :  { %456 = vmatpush.msrb.mxu1 %v2452_v8  ;;  %624 = vmatpush.msra.mxu2 %v2452_v8 }
 0x318   :  { %1808 = vpow2.f32 %v1733_v18  ;;  %255 = vmatmul.f32.gmra.mxu0 %v211_v15  ;;  %v2495_v18 = vld [vmem:[%s2767_s10] ss:$0 sm:$0xff] }
 0x31a   :  { %v1805_v16 = vpop.eup %1804 }
 0x31b   :  { %507 = vrot.lane.b32.xlu0 %v1805_v16, %s2231_s6 }
 0x31c   :  { %v1807_v17 = vpop.eup %1806 }
 0x31d   :  { %422 = vrot.lane.b32.xlu2 %v1807_v17, %s2231_s6 }
 0x31e   :  { %v1809_v19 = vpop.eup %1808 }
 0x31f   :  { %v399_v20 = vadd.f32 1.0, %v1809_v19 }
 0x321   :  { %1810 = vrcp.f32 %v399_v20  ;;  %v411_v30 = vand.u32 2147483648, %v399_v20  ;;  %vm405_vm6 = vweird.f32 %v399_v20  ;;  %v409_v31 = vand.u32 2147483647, %v399_v20 }
 0x322   :  { %1812 = vpow2.f32 %v1736_v21 }
 0x323   :  { %v412_v33 = vor.u32 1.1754944e-38, %v411_v30  ;;  %vm410_vm8 = vcmp.eq.f32.partialorder %v409_v31, 8.507059e+37 }
 0x327   :  { %v1811_v22 = vpop.eup %1810 }
 0x328   :  { %v401_v23 = vmul.f32 %v1811_v22, %v399_v20  ;;  %v1813_v26 = vpop.eup %1812  ;;  %vm406_vm5 = vweird.f32 %v1811_v22 }
 0x329   :  { %v488_v28 = vadd.f32 1.0, %v1813_v26  ;;  %vm407_vm7 = vmor %vm405_vm6, %vm406_vm5 }
 0x32a   :  { %v402_v25 = vsub.f32 1.0, %v401_v23 }
 0x32b   :  { %1814 = vrcp.f32 %v488_v28  ;;  %v500_v42 = vand.u32 2147483648, %v488_v28  ;;  %vm494_vm10 = vweird.f32 %v488_v28  ;;  %v498_v43 = vand.u32 2147483647, %v488_v28 }
 0x32c   :  { %v403_v27 = vmul.f32 %v1811_v22, %v402_v25 }
 0x32d   :  { %v501_v45 = vor.u32 1.1754944e-38, %v500_v42  ;;  %vm499_vm12 = vcmp.eq.f32.partialorder %v498_v43, 8.507059e+37 }
 0x32e   :  { %v404_v29 = vadd.f32 %v1811_v22, %v403_v27 }
 0x330   :  { %v408_v32 = vsel %vm407_vm7, %v1811_v22, %v404_v29 }
 0x331   :  { %v1815_v34 = vpop.eup %1814  ;;  %v413_v35 = vsel %vm410_vm8, %v412_v33, %v408_v32 }
 0x332   :  { %v490_v38 = vmul.f32 %v1815_v34, %v488_v28  ;;  %vm495_vm9 = vweird.f32 %v1815_v34  ;;  %v420_v53 = vmul.f32 %v418_v50, %v413_v35 }
 0x333   :  { %vm496_vm11 = vmor %vm494_vm10, %vm495_vm9 }
 0x334   :  { %v491_v39 = vsub.f32 1.0, %v490_v38 }
 0x336   :  { %v492_v40 = vmul.f32 %v1815_v34, %v491_v39 }
 0x338   :  { %v493_v41 = vadd.f32 %v1815_v34, %v492_v40 }
 0x33a   :  { %v497_v44 = vsel %vm496_vm11, %v1815_v34, %v493_v41 }
 0x33b   :  { %v502_v47 = vsel %vm499_vm12, %v501_v45, %v497_v44 }
 0x33c   :  { %v505_v63 = vmul.f32 %v502_v47, %v2379_v49  ;;  %v2456_v49 = vld [vmem:[#allocation16] sm:$0xff] }
 0x33d   :  { %457 = vmatpush.msrb.mxu1 %v2456_v49  ;;  %625 = vmatpush.msra.mxu2 %v2456_v49 }
 0x33f   :  { %559 = vmatpush.msra.mxu1 %v2388_v54  ;;  %728 = vmatpush.msrb.mxu2 %v2388_v54 }
 0x341   :  { %560 = vmatpush.msra.mxu1 %v2394_v56  ;;  %729 = vmatpush.msrb.mxu2 %v2394_v56 }
 0x343   :  { %561 = vmatpush.msra.mxu1 %v2397_v57  ;;  %730 = vmatpush.msrb.mxu2 %v2397_v57 }
 0x345   :  { %562 = vmatpush.msra.mxu1 %v2403_v59  ;;  %731 = vmatpush.msrb.mxu2 %v2403_v59 }
 0x377   :  { %v423_v36 = vpop.permute.xlu2 %422 }
 0x378   :  { %v425_v37 = vmul.f32 %v423_v36, %v413_v35 }
 0x37a   :  { %427 = vrot.lane.b32.xlu2 %v425_v37, %s2232_s27 }
 0x38d   :  { %v508_v46 = vpop.permute.xlu0 %507 }
 0x38e   :  { %v510_v48 = vmul.f32 %v508_v46, %v502_v47 }
 0x390   :  { %512 = vrot.lane.b32.xlu0 %v510_v48, %s2232_s27 }
 0x395   :  { %v256_v23 = vpop.f32.mrf.mxu0 }
 0x396   :  { %v632_v27 = vadd.f32 %v2373_v24, %v256_v23 }
 0x3d4   :  { %v428_v60 = vpop.permute.xlu2 %427 }
 0x3d5   :  { %v2437_v61 = vadd.f32 %v428_v60, %v420_v53 }
 0x3d7   :  { %1816 = vtanh.f32 %v2437_v61 }
 0x3dd   :  { %v1817_v62 = vpop.eup %1816 }
 0x3de   :  { %433 = vrot.lane.b32.xlu1 %v1817_v62, %s2231_s6 }
 0x402   :  { %v513_v0 = vpop.permute.xlu0 %512 }
 0x403   :  { %v2442_v1 = vadd.f32 %v513_v0, %v505_v63 }
 0x405   :  { %1818 = vtanh.f32 %v2442_v1 }
 0x40b   :  { %v1819_v2 = vpop.eup %1818 }
 0x40c   :  { %518 = vrot.lane.b32.xlu2 %v1819_v2, %s2231_s6 }
 0x450   :  { %v434_v11 = vpop.permute.xlu1 %433 }
 0x451   :  { %v436_v12 = vmul.f32 %v434_v11, %v413_v35 }
 0x453   :  { %438 = vrot.lane.b32.xlu0 %v436_v12, %s2232_s27 }
 0x466   :  { %v519_v13 = vpop.permute.xlu2 %518 }
 0x467   :  { %v521_v14 = vmul.f32 %v519_v13, %v502_v47 }
 0x469   :  { %543 = vrot.lane.b32.xlu1 %v521_v14, %s2232_s27 }
 0x4c5   :  { %v439_v16 = vpop.permute.xlu0 %438 }
 0x4c6   :  { %1734 = vmatmul.msk.f32.vlgmr.msrb.gmra.mxu1 %vm174_vm0, %v439_v16  ;;  %1737 = vmatmul.msk.f32.vlgmr.msrb.gmra.mxu3 %vm174_vm0, %v439_v16 }
 0x4c7   :  { %703 = vmatpush.msrb.mxu1 %v2383_v51  ;;  %791 = vmatpush.msrb.mxu3 %v2446_v3 }
 0x4c9   :  { %704 = vmatpush.msrb.mxu1 %v2385_v52  ;;  %792 = vmatpush.msrb.mxu3 %v2448_v6 }
 0x4cb   :  { %705 = vmatpush.msrb.mxu1 %v2390_v55  ;;  %793 = vmatpush.msrb.mxu3 %v2452_v8 }
 0x4cd   :  { %706 = vmatpush.msrb.mxu1 %v2399_v58  ;;  %794 = vmatpush.msrb.mxu3 %v2456_v49 }
 0x4db   :  { %v544_v17 = vpop.permute.xlu1 %543 }
 0x4dc   :  { %1738 = vmatmul.msk.f32.vlgmr.msra.gmra.mxu1 %vm174_vm0, %v544_v17  ;;  %1741 = vmatmul.msk.f32.vlgmr.msra.gmra.mxu3 %vm174_vm0, %v544_v17 }
 0x4dd   :  { %814 = vmatpush.msra.mxu1 %v2355_v4  ;;  %897 = vmatpush.msra.mxu3 %v2388_v54 }
 0x4df   :  { %815 = vmatpush.msra.mxu1 %v2358_v5  ;;  %898 = vmatpush.msra.mxu3 %v2394_v56 }
 0x4e1   :  { %816 = vmatpush.msra.mxu1 %v2360_v7  ;;  %899 = vmatpush.msra.mxu3 %v2397_v57 }
 0x4e3   :  { %817 = vmatpush.msra.mxu1 %v2363_v10  ;;  %900 = vmatpush.msra.mxu3 %v2403_v59 }
 0x543   :  { %v459_v19 = vpop.f32.mrf.mxu1 }
 0x544   :  { %v460_v20 = vadd.f32 %v2495_v18, %v459_v19 }
 0x546   :  { %462 = vst [vmem:[#allocation18] sm:$0xff] %v460_v20 }
 0x549   :  { %v539_v21 = vpop.f32.mrf.mxu3 }
 0x559   :  { %v564_v22 = vpop.f32.mrf.mxu1 }
 0x55a   :  { %v565_v25 = vadd.f32 %v564_v22, %v539_v21 }
 0x55c   :  { %v567_v26 = vadd.f32 %v2430_v9, %v565_v25 }
 0x55e   :  { %1820 = vtanh.f32 %v567_v26  ;;  %v1739_v32 = vmul.f32 -1.442695, %v567_v26 }
 0x55f   :  { %v650_v28 = vpop.f32.mrf.mxu3 }
 0x560   :  { %v653_v29 = vadd.f32 %v650_v28, %v632_v27 }
 0x562   :  { %1822 = vtanh.f32 %v653_v29  ;;  %v1742_v37 = vmul.f32 -1.442695, %v653_v29 }
 0x563   :  { %1824 = vpow2.f32 %v1739_v32 }
 0x564   :  { %v1821_v30 = vpop.eup %1820 }
 0x565   :  { %590 = vrot.lane.b32.xlu2 %v1821_v30, %s2231_s6 }
 0x568   :  { %v1823_v31 = vpop.eup %1822 }
 0x569   :  { %676 = vrot.lane.b32.xlu0 %v1823_v31, %s2231_s6  ;;  %v1825_v33 = vpop.eup %1824 }
 0x56a   :  { %v571_v34 = vadd.f32 1.0, %v1825_v33 }
 0x56c   :  { %1826 = vrcp.f32 %v571_v34  ;;  %v583_v42 = vand.u32 2147483648, %v571_v34  ;;  %vm577_vm14 = vweird.f32 %v571_v34  ;;  %v581_v43 = vand.u32 2147483647, %v571_v34 }
 0x56d   :  { %1828 = vpow2.f32 %v1742_v37 }
 0x56e   :  { %v584_v46 = vor.u32 1.1754944e-38, %v583_v42  ;;  %vm582_vm1 = vcmp.eq.f32.partialorder %v581_v43, 8.507059e+37 }
 0x572   :  { %v1827_v35 = vpop.eup %1826 }
 0x573   :  { %v573_v36 = vmul.f32 %v1827_v35, %v571_v34  ;;  %v1829_v40 = vpop.eup %1828  ;;  %vm578_vm13 = vweird.f32 %v1827_v35 }
 0x574   :  { %v657_v44 = vadd.f32 1.0, %v1829_v40  ;;  %vm579_vm15 = vmor %vm577_vm14, %vm578_vm13 }
 0x575   :  { %v574_v38 = vsub.f32 1.0, %v573_v36 }
 0x576   :  { %1830 = vrcp.f32 %v657_v44  ;;  %v669_v2 = vand.u32 2147483648, %v657_v44  ;;  %vm663_vm3 = vweird.f32 %v657_v44  ;;  %v667_v11 = vand.u32 2147483647, %v657_v44 }
 0x577   :  { %v575_v39 = vmul.f32 %v1827_v35, %v574_v38 }
 0x578   :  { %v670_v13 = vor.u32 1.1754944e-38, %v669_v2  ;;  %vm668_vm5 = vcmp.eq.f32.partialorder %v667_v11, 8.507059e+37 }
 0x579   :  { %v576_v41 = vadd.f32 %v1827_v35, %v575_v39 }
 0x57b   :  { %v580_v45 = vsel %vm579_vm15, %v1827_v35, %v576_v41 }
 0x57c   :  { %v585_v48 = vsel %vm582_vm1, %v584_v46, %v580_v45  ;;  %v1831_v53 = vpop.eup %1830 }
 0x57d   :  { %v659_v60 = vmul.f32 %v1831_v53, %v657_v44  ;;  %vm664_vm2 = vweird.f32 %v1831_v53  ;;  %v588_v17 = vmul.f32 %v585_v48, %v2437_v61 }
 0x57e   :  { %vm665_vm4 = vmor %vm663_vm3, %vm664_vm2 }
 0x57f   :  { %v660_v62 = vsub.f32 1.0, %v659_v60 }
 0x581   :  { %v661_v63 = vmul.f32 %v1831_v53, %v660_v62 }
 0x583   :  { %v662_v0 = vadd.f32 %v1831_v53, %v661_v63 }
 0x585   :  { %v666_v12 = vsel %vm665_vm4, %v1831_v53, %v662_v0 }
 0x586   :  { %v671_v15 = vsel %vm668_vm5, %v670_v13, %v666_v12 }
 0x587   :  { %v674_v21 = vmul.f32 %v671_v15, %v2442_v1  ;;  %v212_v1 = vld [vmem:[#allocation4 + $0x18] sm:$0xff] }
 0x588   :  { %258 = vmatmul.f32.gmra.mxu0 %v212_v1 }
 0x5bf   :  { %v591_v47 = vpop.permute.xlu2 %590 }
 0x5c0   :  { %v593_v50 = vmul.f32 %v591_v47, %v585_v48 }
 0x5c2   :  { %595 = vrot.lane.b32.xlu1 %v593_v50, %s2232_s27 }
 0x5db   :  { %v677_v14 = vpop.permute.xlu0 %676 }
 0x5dc   :  { %v679_v16 = vmul.f32 %v677_v14, %v671_v15 }
 0x5de   :  { %681 = vrot.lane.b32.xlu2 %v679_v16, %s2232_s27 }
 0x605   :  { %v259_v35 = vpop.f32.mrf.mxu0 }
 0x606   :  { %v801_v36 = vadd.f32 %v2373_v24, %v259_v35 }
 0x634   :  { %v596_v19 = vpop.permute.xlu1 %595 }
 0x635   :  { %v2505_v20 = vadd.f32 %v596_v19, %v588_v17 }
 0x637   :  { %1832 = vtanh.f32 %v2505_v20 }
 0x638   :  { %v682_v22 = vpop.permute.xlu2 %681 }
 0x639   :  { %v2509_v23 = vadd.f32 %v682_v22, %v674_v21 }
 0x63b   :  { %1834 = vtanh.f32 %v2509_v23 }
 0x63d   :  { %v1833_v25 = vpop.eup %1832 }
 0x63e   :  { %601 = vrot.lane.b32.xlu0 %v1833_v25, %s2231_s6 }
 0x641   :  { %v1835_v26 = vpop.eup %1834 }
 0x642   :  { %687 = vrot.lane.b32.xlu1 %v1835_v26, %s2231_s6 }
 0x6b0   :  { %v602_v27 = vpop.permute.xlu0 %601 }
 0x6b1   :  { %v604_v61 = vmul.f32 %v602_v27, %v585_v48 }
 0x6b3   :  { %606 = vrot.lane.b32.xlu2 %v604_v61, %s2232_s27 }
 0x6b4   :  { %v688_v28 = vpop.permute.xlu1 %687 }
 0x6b5   :  { %v690_v29 = vmul.f32 %v688_v28, %v671_v15 }
 0x6b7   :  { %712 = vrot.lane.b32.xlu0 %v690_v29, %s2232_s27 }
 0x70d   :  { %v607_v30 = vpop.permute.xlu2 %606 }
 0x70e   :  { %1740 = vmatmul.msk.f32.vlgmr.msra.gmra.mxu2 %vm174_vm0, %v607_v30  ;;  %1743 = vmatmul.msk.f32.vlgmr.msrb.gmra.mxu1 %vm174_vm0, %v607_v30 }
 0x70f   :  { %872 = vmatpush.msra.mxu2 %v2383_v51  ;;  %960 = vmatpush.msrb.mxu1 %v2446_v3 }
 0x711   :  { %873 = vmatpush.msra.mxu2 %v2385_v52  ;;  %961 = vmatpush.msrb.mxu1 %v2448_v6 }
 0x713   :  { %874 = vmatpush.msra.mxu2 %v2390_v55  ;;  %962 = vmatpush.msrb.mxu1 %v2452_v8 }
 0x715   :  { %875 = vmatpush.msra.mxu2 %v2399_v58  ;;  %963 = vmatpush.msrb.mxu1 %v2456_v49 }
 0x729   :  { %v713_v31 = vpop.permute.xlu0 %712 }
 0x72a   :  { %1744 = vmatmul.msk.f32.vlgmr.msrb.gmra.mxu2 %vm174_vm0, %v713_v31  ;;  %1747 = vmatmul.msk.f32.vlgmr.msra.gmra.mxu1 %vm174_vm0, %v713_v31 }
 0x72b   :  { %983 = vmatpush.msrb.mxu2 %v2355_v4  ;;  %1066 = vmatpush.msra.mxu1 %v2388_v54 }
 0x72d   :  { %984 = vmatpush.msrb.mxu2 %v2358_v5  ;;  %1067 = vmatpush.msra.mxu1 %v2394_v56 }
 0x72f   :  { %985 = vmatpush.msrb.mxu2 %v2360_v7  ;;  %1068 = vmatpush.msra.mxu1 %v2397_v57 }
 0x731   :  { %986 = vmatpush.msrb.mxu2 %v2363_v10  ;;  %1069 = vmatpush.msra.mxu1 %v2403_v59 }
 0x78b   :  { %v708_v34 = vpop.f32.mrf.mxu1 }
 0x791   :  { %v627_v32 = vpop.f32.mrf.mxu2 }
 0x792   :  { %v628_v33 = vadd.f32 %v2495_v18, %v627_v32 }
 0x794   :  { %631 = vst [vmem:[#allocation18 + $0x8] sm:$0xff] %v628_v33 }
 0x7a7   :  { %v819_v37 = vpop.f32.mrf.mxu1 }
 0x7a8   :  { %v822_v38 = vadd.f32 %v819_v37, %v801_v36 }
 0x7aa   :  { %1836 = vtanh.f32 %v822_v38  ;;  %v1748_v44 = vmul.f32 -1.442695, %v822_v38 }
 0x7ad   :  { %v733_v39 = vpop.f32.mrf.mxu2 }
 0x7ae   :  { %v734_v40 = vadd.f32 %v733_v39, %v708_v34 }
 0x7b0   :  { %v1837_v41 = vpop.eup %1836  ;;  %v736_v42 = vadd.f32 %v2430_v9, %v734_v40 }
 0x7b1   :  { %845 = vrot.lane.b32.xlu2 %v1837_v41, %s2231_s6 }
 0x7b2   :  { %1838 = vtanh.f32 %v736_v42  ;;  %v1745_v53 = vmul.f32 -1.442695, %v736_v42  ;;  %v213_v42 = vld [vmem:[#allocation4 + $0x20] sm:$0xff] }
 0x7b3   :  { %1840 = vpow2.f32 %v1748_v44  ;;  %261 = vmatmul.f32.gmra.mxu0 %v213_v42 }
 0x7b8   :  { %v1839_v43 = vpop.eup %1838 }
 0x7b9   :  { %759 = vrot.lane.b32.xlu1 %v1839_v43, %s2231_s6  ;;  %v1841_v45 = vpop.eup %1840 }
 0x7ba   :  { %v826_v46 = vadd.f32 1.0, %v1841_v45 }
 0x7bc   :  { %1842 = vrcp.f32 %v826_v46  ;;  %v838_v63 = vand.u32 2147483648, %v826_v46  ;;  %vm832_vm7 = vweird.f32 %v826_v46  ;;  %v836_v0 = vand.u32 2147483647, %v826_v46 }
 0x7bd   :  { %1844 = vpow2.f32 %v1745_v53 }
 0x7be   :  { %v839_v12 = vor.u32 1.1754944e-38, %v838_v63  ;;  %vm837_vm9 = vcmp.eq.f32.partialorder %v836_v0, 8.507059e+37 }
 0x7c2   :  { %v1843_v47 = vpop.eup %1842 }
 0x7c3   :  { %v828_v48 = vmul.f32 %v1843_v47, %v826_v46  ;;  %vm833_vm6 = vweird.f32 %v1843_v47  ;;  %v1845_v2 = vpop.eup %1844 }
 0x7c4   :  { %vm834_vm8 = vmor %vm832_vm7, %vm833_vm6  ;;  %v740_v13 = vadd.f32 1.0, %v1845_v2 }
 0x7c5   :  { %v829_v50 = vsub.f32 1.0, %v828_v48 }
 0x7c6   :  { %1846 = vrcp.f32 %v740_v13  ;;  %v752_v26 = vand.u32 2147483648, %v740_v13  ;;  %vm746_vm11 = vweird.f32 %v740_v13  ;;  %v750_v27 = vand.u32 2147483647, %v740_v13 }
 0x7c7   :  { %v830_v60 = vmul.f32 %v1843_v47, %v829_v50 }
 0x7c8   :  { %v753_v28 = vor.u32 1.1754944e-38, %v752_v26  ;;  %vm751_vm13 = vcmp.eq.f32.partialorder %v750_v27, 8.507059e+37 }
 0x7c9   :  { %v831_v62 = vadd.f32 %v1843_v47, %v830_v60 }
 0x7cb   :  { %v835_v11 = vsel %vm834_vm8, %v1843_v47, %v831_v62 }
 0x7cc   :  { %v840_v15 = vsel %vm837_vm9, %v839_v12, %v835_v11  ;;  %v1847_v17 = vpop.eup %1846 }
 0x7cd   :  { %v742_v19 = vmul.f32 %v1847_v17, %v740_v13  ;;  %vm747_vm10 = vweird.f32 %v1847_v17  ;;  %v843_v31 = vmul.f32 %v840_v15, %v2509_v23 }
 0x7ce   :  { %vm748_vm12 = vmor %vm746_vm11, %vm747_vm10 }
 0x7cf   :  { %v743_v21 = vsub.f32 1.0, %v742_v19 }
 0x7d1   :  { %v744_v22 = vmul.f32 %v1847_v17, %v743_v21 }
 0x7d3   :  { %v745_v25 = vadd.f32 %v1847_v17, %v744_v22 }
 0x7d5   :  { %v749_v61 = vsel %vm748_vm12, %v1847_v17, %v745_v25 }
 0x7d6   :  { %v754_v1 = vsel %vm751_vm13, %v753_v28, %v749_v61 }
 0x7d7   :  { %v757_v35 = vmul.f32 %v754_v1, %v2505_v20 }
 0x80b   :  { %v846_v14 = vpop.permute.xlu2 %845 }
 0x80c   :  { %v848_v16 = vmul.f32 %v846_v14, %v840_v15 }
 0x80e   :  { %850 = vrot.lane.b32.xlu1 %v848_v16, %s2232_s27 }
 0x82b   :  { %v760_v29 = vpop.permute.xlu1 %759 }
 0x82c   :  { %v762_v30 = vmul.f32 %v760_v29, %v754_v1 }
 0x82e   :  { %764 = vrot.lane.b32.xlu0 %v762_v30, %s2232_s27 }
 0x830   :  { %v262_v47 = vpop.f32.mrf.mxu0 }
 0x880   :  { %v851_v32 = vpop.permute.xlu1 %850 }
 0x881   :  { %v2544_v33 = vadd.f32 %v851_v32, %v843_v31 }
 0x883   :  { %1848 = vtanh.f32 %v2544_v33 }
 0x889   :  { %v1849_v34 = vpop.eup %1848 }
 0x88a   :  { %856 = vrot.lane.b32.xlu0 %v1849_v34, %s2231_s6 }
 0x8a0   :  { %v765_v36 = vpop.permute.xlu0 %764 }
 0x8a1   :  { %v2549_v37 = vadd.f32 %v765_v36, %v757_v35 }
 0x8a3   :  { %1850 = vtanh.f32 %v2549_v37 }
 0x8a9   :  { %v1851_v38 = vpop.eup %1850 }
 0x8aa   :  { %770 = vrot.lane.b32.xlu2 %v1851_v38, %s2231_s6 }
 0x8fc   :  { %v857_v39 = vpop.permute.xlu0 %856 }
 0x8fd   :  { %v859_v23 = vmul.f32 %v857_v39, %v840_v15 }
 0x8ff   :  { %881 = vrot.lane.b32.xlu2 %v859_v23, %s2232_s27 }
 0x904   :  { %v771_v40 = vpop.permute.xlu2 %770 }
 0x905   :  { %v773_v41 = vmul.f32 %v771_v40, %v754_v1 }
 0x907   :  { %775 = vrot.lane.b32.xlu1 %v773_v41, %s2232_s27 }
 0x959   :  { %v882_v20 = vpop.permute.xlu2 %881 }
 0x979   :  { %v776_v43 = vpop.permute.xlu1 %775 }
 0x97a   :  { %1746 = vmatmul.msk.f32.vlgmr.msrb.gmra.mxu3 %vm174_vm0, %v776_v43  ;;  %1749 = vmatmul.msk.f32.vlgmr.msra.gmra.mxu2 %vm174_vm0, %v776_v43 }
 0x97b   :  { %1041 = vmatpush.msrb.mxu3 %v2383_v51  ;;  %1129 = vmatpush.msra.mxu2 %v2446_v3 }
 0x97d   :  { %1042 = vmatpush.msrb.mxu3 %v2385_v52  ;;  %1130 = vmatpush.msra.mxu2 %v2448_v6 }
 0x97f   :  { %1043 = vmatpush.msrb.mxu3 %v2390_v55  ;;  %1131 = vmatpush.msra.mxu2 %v2452_v8 }
 0x981   :  { %1044 = vmatpush.msrb.mxu3 %v2399_v58  ;;  %1132 = vmatpush.msra.mxu2 %v2456_v49 }
 0x982   :  { %1750 = vmatmul.msk.f32.vlgmr.msra.gmra.mxu3 %vm174_vm0, %v882_v20  ;;  %1753 = vmatmul.msk.f32.vlgmr.msrb.gmra.mxu2 %vm174_vm0, %v882_v20 }
 0x983   :  { %1152 = vmatpush.msra.mxu3 %v2355_v4  ;;  %1235 = vmatpush.msrb.mxu2 %v2388_v54  ;;  %v970_v4 = vadd.f32 %v2373_v24, %v262_v47 }
 0x985   :  { %1153 = vmatpush.msra.mxu3 %v2358_v5  ;;  %1236 = vmatpush.msrb.mxu2 %v2394_v56 }
 0x987   :  { %1154 = vmatpush.msra.mxu3 %v2360_v7  ;;  %1237 = vmatpush.msrb.mxu2 %v2397_v57 }
 0x989   :  { %1155 = vmatpush.msra.mxu3 %v2363_v10  ;;  %1238 = vmatpush.msrb.mxu2 %v2403_v59 }
 0x9fd   :  { %v796_v44 = vpop.f32.mrf.mxu3  ;;  %v877_v45 = vpop.f32.mrf.mxu2 }
 0x9fe   :  { %v797_v46 = vadd.f32 %v2495_v18, %v796_v44 }
 0xa00   :  { %800 = vst [vmem:[#allocation18 + $0x10] sm:$0xff] %v797_v46 }
 0xa05   :  { %v902_v48 = vpop.f32.mrf.mxu3  ;;  %v988_v5 = vpop.f32.mrf.mxu2 }
 0xa06   :  { %v903_v50 = vadd.f32 %v902_v48, %v877_v45  ;;  %v991_v53 = vadd.f32 %v988_v5, %v970_v4  ;;  %v214_v48 = vld [vmem:[#allocation4 + $0x28] sm:$0xff] }
 0xa07   :  { %264 = vmatmul.f32.gmra.mxu0 %v214_v48 }
 0xa08   :  { %v905_v7 = vadd.f32 %v2430_v9, %v903_v50  ;;  %1852 = vtanh.f32 %v991_v53  ;;  %v1754_v62 = vmul.f32 -1.442695, %v991_v53 }
 0xa0a   :  { %1854 = vtanh.f32 %v905_v7  ;;  %v1751_v63 = vmul.f32 -1.442695, %v905_v7 }
 0xa0b   :  { %1856 = vpow2.f32 %v1754_v62 }
 0xa0c   :  { %1858 = vpow2.f32 %v1751_v63 }
 0xa0e   :  { %v1853_v60 = vpop.eup %1852 }
 0xa0f   :  { %1014 = vrot.lane.b32.xlu1 %v1853_v60, %s2231_s6 }
 0xa10   :  { %v1855_v10 = vpop.eup %1854 }
 0xa11   :  { %928 = vrot.lane.b32.xlu0 %v1855_v10, %s2231_s6  ;;  %v1857_v0 = vpop.eup %1856 }
 0xa12   :  { %v1859_v24 = vpop.eup %1858  ;;  %v995_v2 = vadd.f32 1.0, %v1857_v0 }
 0xa13   :  { %v909_v11 = vadd.f32 1.0, %v1859_v24 }
 0xa14   :  { %1860 = vrcp.f32 %v995_v2  ;;  %v1007_v25 = vand.u32 2147483648, %v995_v2  ;;  %vm1001_vm15 = vweird.f32 %v995_v2  ;;  %v1005_v26 = vand.u32 2147483647, %v995_v2 }
 0xa15   :  { %1862 = vrcp.f32 %v909_v11  ;;  %v921_v61 = vand.u32 2147483648, %v909_v11  ;;  %vm915_vm3 = vweird.f32 %v909_v11  ;;  %v919_v29 = vand.u32 2147483647, %v909_v11 }
 0xa16   :  { %v1008_v1 = vor.u32 1.1754944e-38, %v1007_v25  ;;  %vm1006_vm5 = vcmp.eq.f32.partialorder %v1005_v26, 8.507059e+37 }
 0xa17   :  { %v922_v34 = vor.u32 1.1754944e-38, %v921_v61  ;;  %vm920_vm6 = vcmp.eq.f32.partialorder %v919_v29, 8.507059e+37 }
 0xa1a   :  { %v1861_v12 = vpop.eup %1860 }
 0xa1b   :  { %v1863_v13 = vpop.eup %1862  ;;  %v997_v14 = vmul.f32 %v1861_v12, %v995_v2  ;;  %vm1002_vm14 = vweird.f32 %v1861_v12 }
 0xa1c   :  { %v911_v15 = vmul.f32 %v1863_v13, %v909_v11  ;;  %vm916_vm1 = vweird.f32 %v1863_v13  ;;  %vm1003_vm2 = vmor %vm1001_vm15, %vm1002_vm14 }
 0xa1d   :  { %v998_v16 = vsub.f32 1.0, %v997_v14  ;;  %vm917_vm4 = vmor %vm915_vm3, %vm916_vm1 }
 0xa1e   :  { %v912_v17 = vsub.f32 1.0, %v911_v15 }
 0xa1f   :  { %v999_v19 = vmul.f32 %v1861_v12, %v998_v16 }
 0xa20   :  { %v913_v21 = vmul.f32 %v1863_v13, %v912_v17 }
 0xa21   :  { %v1000_v22 = vadd.f32 %v1861_v12, %v999_v19 }
 0xa22   :  { %v914_v27 = vadd.f32 %v1863_v13, %v913_v21 }
 0xa23   :  { %v1004_v28 = vsel %vm1003_vm2, %v1861_v12, %v1000_v22 }
 0xa24   :  { %v918_v30 = vsel %vm917_vm4, %v1863_v13, %v914_v27  ;;  %v1009_v32 = vsel %vm1006_vm5, %v1008_v1, %v1004_v28 }
 0xa25   :  { %v923_v38 = vsel %vm920_vm6, %v922_v34, %v918_v30  ;;  %v1012_v43 = vmul.f32 %v1009_v32, %v2544_v33 }
 0xa26   :  { %v926_v23 = vmul.f32 %v923_v38, %v2549_v37 }
 0xa81   :  { %v1015_v31 = vpop.permute.xlu1 %1014 }
 0xa82   :  { %v1017_v35 = vmul.f32 %v1015_v31, %v1009_v32 }
 0xa83   :  { %v929_v36 = vpop.permute.xlu0 %928 }
 0xa84   :  { %v931_v39 = vmul.f32 %v929_v36, %v923_v38  ;;  %1019 = vrot.lane.b32.xlu0 %v1017_v35, %s2232_s27  ;;  %v265_v60 = vpop.f32.mrf.mxu0 }
 0xa86   :  { %933 = vrot.lane.b32.xlu2 %v931_v39, %s2232_s27 }
 0xae0   :  { %v934_v40 = vpop.permute.xlu2 %933 }
 0xae1   :  { %v2583_v41 = vadd.f32 %v934_v40, %v926_v23 }
 0xae3   :  { %1864 = vtanh.f32 %v2583_v41 }
 0xae9   :  { %v1865_v42 = vpop.eup %1864 }
 0xaea   :  { %939 = vrot.lane.b32.xlu1 %v1865_v42, %s2231_s6 }
 0xaf6   :  { %v1020_v20 = vpop.permute.xlu0 %1019 }
 0xaf7   :  { %v2588_v44 = vadd.f32 %v1020_v20, %v1012_v43 }
 0xaf9   :  { %1866 = vtanh.f32 %v2588_v44 }
 0xaff   :  { %v1867_v45 = vpop.eup %1866 }
 0xb00   :  { %1025 = vrot.lane.b32.xlu2 %v1867_v45, %s2231_s6 }
 0xb5a   :  { %v1026_v46 = vpop.permute.xlu2 %1025 }
 0xb5b   :  { %v1028_v37 = vmul.f32 %v1026_v46, %v1009_v32 }
 0xb5c   :  { %v940_v47 = vpop.permute.xlu1 %939 }
 0xb5d   :  { %v942_v4 = vmul.f32 %v940_v47, %v923_v38  ;;  %1050 = vrot.lane.b32.xlu1 %v1028_v37, %s2232_s27 }
 0xb5f   :  { %944 = vrot.lane.b32.xlu0 %v942_v4, %s2232_s27 }
 0xbcf   :  { %v1051_v33 = vpop.permute.xlu1 %1050 }
 0xbd1   :  { %v945_v5 = vpop.permute.xlu0 %944 }
 0xbd2   :  { %1752 = vmatmul.msk.f32.vlgmr.msrb.gmra.mxu1 %vm174_vm0, %v945_v5  ;;  %1755 = vmatmul.msk.f32.vlgmr.msrb.gmra.mxu3 %vm174_vm0, %v945_v5 }
 0xbd3   :  { %1210 = vmatpush.msrb.mxu1 %v2383_v51  ;;  %1298 = vmatpush.msrb.mxu3 %v2446_v3  ;;  %v2606_v51 = vld [vmem:[#allocation12 + $0x18] sm:$0xff] }
 0xbd5   :  { %1211 = vmatpush.msrb.mxu1 %v2385_v52  ;;  %1299 = vmatpush.msrb.mxu3 %v2448_v6  ;;  %v2610_v52 = vld [vmem:[#allocation12 + $0x10] sm:$0xff] }
 0xbd7   :  { %1212 = vmatpush.msrb.mxu1 %v2390_v55  ;;  %1300 = vmatpush.msrb.mxu3 %v2452_v8  ;;  %v2614_v55 = vld [vmem:[#allocation12 + $0x8] sm:$0xff] }
 0xbd9   :  { %1213 = vmatpush.msrb.mxu1 %v2399_v58  ;;  %1301 = vmatpush.msrb.mxu3 %v2456_v49  ;;  %v2618_v58 = vld [vmem:[#allocation12] sm:$0xff] }
 0xbda   :  { %1756 = vmatmul.msk.f32.vlgmr.msra.gmra.mxu1 %vm174_vm0, %v1051_v33  ;;  %1759 = vmatmul.msk.f32.vlgmr.msra.gmra.mxu3 %vm174_vm0, %v1051_v33 }
 0xbdb   :  { %1321 = vmatpush.msra.mxu1 %v2606_v51  ;;  %1404 = vmatpush.msra.mxu3 %v2388_v54 }
 0xbdd   :  { %1322 = vmatpush.msra.mxu1 %v2610_v52  ;;  %1405 = vmatpush.msra.mxu3 %v2394_v56 }
 0xbdf   :  { %1323 = vmatpush.msra.mxu1 %v2614_v55  ;;  %1406 = vmatpush.msra.mxu3 %v2397_v57  ;;  %v2627_v57 = vld [vmem:[%s2762_s5] ss:$0 sm:$0xff] }
 0xbe0   :  { %v1139_v62 = vadd.f32 %v2627_v57, %v265_v60  ;;  %v2656_v60 = vld [vmem:[#allocation15 + $0x8] sm:$0xff] }
 0xbe1   :  { %1324 = vmatpush.msra.mxu1 %v2618_v58  ;;  %1407 = vmatpush.msra.mxu3 %v2403_v59 }
 0xc4f   :  { %v965_v50 = vpop.f32.mrf.mxu1 }
 0xc50   :  { %v966_v54 = vadd.f32 %v2495_v18, %v965_v50 }
 0xc52   :  { %969 = vst [vmem:[#allocation18 + $0x18] sm:$0xff] %v966_v54 }
 0xc55   :  { %v1046_v53 = vpop.f32.mrf.mxu3 }
 0xc57   :  { %v1071_v7 = vpop.f32.mrf.mxu1 }
 0xc58   :  { %v1072_v56 = vadd.f32 %v1071_v7, %v1046_v53  ;;  %v2648_v53 = vld [vmem:[#allocation15 + $0x18] sm:$0xff]  ;;  %v2652_v7 = vld [vmem:[#allocation15 + $0x10] sm:$0xff] }
 0xc5a   :  { %v1074_v10 = vadd.f32 %v2430_v9, %v1072_v56  ;;  %v2660_v56 = vld [vmem:[#allocation15] sm:$0xff] }
 0xc5c   :  { %1868 = vtanh.f32 %v1074_v10  ;;  %v1757_v2 = vmul.f32 -1.442695, %v1074_v10 }
 0xc5d   :  { %v1157_v63 = vpop.f32.mrf.mxu3 }
 0xc5e   :  { %v1160_v59 = vadd.f32 %v1157_v63, %v1139_v62 }
 0xc60   :  { %1870 = vtanh.f32 %v1160_v59  ;;  %v1760_v14 = vmul.f32 -1.442695, %v1160_v59 }
 0xc61   :  { %1872 = vpow2.f32 %v1757_v2 }
 0xc62   :  { %v1869_v0 = vpop.eup %1868 }
 0xc63   :  { %1097 = vrot.lane.b32.xlu2 %v1869_v0, %s2231_s6 }
 0xc66   :  { %v1871_v24 = vpop.eup %1870 }
 0xc67   :  { %1183 = vrot.lane.b32.xlu0 %v1871_v24, %s2231_s6  ;;  %v1873_v9 = vpop.eup %1872 }
 0xc68   :  { %v1078_v11 = vadd.f32 1.0, %v1873_v9 }
 0xc6a   :  { %1874 = vrcp.f32 %v1078_v11  ;;  %v1090_v21 = vand.u32 2147483648, %v1078_v11  ;;  %vm1084_vm8 = vweird.f32 %v1078_v11  ;;  %v1088_v22 = vand.u32 2147483647, %v1078_v11 }
 0xc6b   :  { %1876 = vpow2.f32 %v1760_v14 }
 0xc6c   :  { %v1091_v27 = vor.u32 1.1754944e-38, %v1090_v21  ;;  %vm1089_vm10 = vcmp.eq.f32.partialorder %v1088_v22, 8.507059e+37 }
 0xc70   :  { %v1875_v12 = vpop.eup %1874 }
 0xc71   :  { %v1080_v13 = vmul.f32 %v1875_v12, %v1078_v11  ;;  %v1877_v17 = vpop.eup %1876  ;;  %vm1085_vm7 = vweird.f32 %v1875_v12 }
 0xc72   :  { %v1164_v25 = vadd.f32 1.0, %v1877_v17  ;;  %vm1086_vm9 = vmor %vm1084_vm8, %vm1085_vm7 }
 0xc73   :  { %v1081_v15 = vsub.f32 1.0, %v1080_v13 }
 0xc74   :  { %1878 = vrcp.f32 %v1164_v25  ;;  %v1176_v35 = vand.u32 2147483648, %v1164_v25  ;;  %vm1170_vm12 = vweird.f32 %v1164_v25  ;;  %v1174_v36 = vand.u32 2147483647, %v1164_v25 }
 0xc75   :  { %v1082_v16 = vmul.f32 %v1875_v12, %v1081_v15 }
 0xc76   :  { %v1177_v39 = vor.u32 1.1754944e-38, %v1176_v35  ;;  %vm1175_vm14 = vcmp.eq.f32.partialorder %v1174_v36, 8.507059e+37 }
 0xc77   :  { %v1083_v19 = vadd.f32 %v1875_v12, %v1082_v16 }
 0xc79   :  { %v1087_v26 = vsel %vm1086_vm9, %v1875_v12, %v1083_v19 }
 0xc7a   :  { %v1092_v28 = vsel %vm1089_vm10, %v1091_v27, %v1087_v26  ;;  %v1879_v1 = vpop.eup %1878 }
 0xc7b   :  { %v1166_v30 = vmul.f32 %v1879_v1, %v1164_v25  ;;  %vm1171_vm11 = vweird.f32 %v1879_v1  ;;  %v1095_v43 = vmul.f32 %v1092_v28, %v2583_v41 }
 0xc7c   :  { %vm1172_vm13 = vmor %vm1170_vm12, %vm1171_vm11 }
 0xc7d   :  { %v1167_v31 = vsub.f32 1.0, %v1166_v30 }
 0xc7f   :  { %v1168_v32 = vmul.f32 %v1879_v1, %v1167_v31 }
 0xc81   :  { %v1169_v34 = vadd.f32 %v1879_v1, %v1168_v32 }
 0xc83   :  { %v1173_v38 = vsel %vm1172_vm13, %v1879_v1, %v1169_v34 }
 0xc84   :  { %v1178_v40 = vsel %vm1175_vm14, %v1177_v39, %v1173_v38 }
 0xc85   :  { %v1181_v46 = vmul.f32 %v1178_v40, %v2588_v44  ;;  %v215_v44 = vld [vmem:[#allocation4 + $0x30] sm:$0xff] }
 0xc86   :  { %267 = vmatmul.f32.gmra.mxu0 %v215_v44 }
 0xcbd   :  { %v1098_v61 = vpop.permute.xlu2 %1097 }
 0xcbe   :  { %v1100_v29 = vmul.f32 %v1098_v61, %v1092_v28 }
 0xcc0   :  { %1102 = vrot.lane.b32.xlu1 %v1100_v29, %s2232_s27 }
 0xcd9   :  { %v1184_v23 = vpop.permute.xlu0 %1183 }
 0xcda   :  { %v1186_v42 = vmul.f32 %v1184_v23, %v1178_v40 }
 0xcdc   :  { %1188 = vrot.lane.b32.xlu2 %v1186_v42, %s2232_s27 }
 0xd32   :  { %v1103_v20 = vpop.permute.xlu1 %1102 }
 0xd33   :  { %v2635_v45 = vadd.f32 %v1103_v20, %v1095_v43 }
 0xd35   :  { %1880 = vtanh.f32 %v2635_v45 }
 0xd36   :  { %v1189_v37 = vpop.permute.xlu2 %1188 }
 0xd37   :  { %v2639_v47 = vadd.f32 %v1189_v37, %v1181_v46 }
 0xd39   :  { %1882 = vtanh.f32 %v2639_v47 }
 0xd3b   :  { %v1881_v4 = vpop.eup %1880 }
 0xd3c   :  { %1108 = vrot.lane.b32.xlu0 %v1881_v4, %s2231_s6 }
 0xd3f   :  { %v1883_v48 = vpop.eup %1882 }
 0xd40   :  { %1194 = vrot.lane.b32.xlu1 %v1883_v48, %s2231_s6 }
 0xdae   :  { %v1109_v5 = vpop.permute.xlu0 %1108 }
 0xdaf   :  { %v1111_v41 = vmul.f32 %v1109_v5, %v1092_v28 }
 0xdb1   :  { %1113 = vrot.lane.b32.xlu2 %v1111_v41, %s2232_s27 }
 0xdb2   :  { %v1195_v33 = vpop.permute.xlu1 %1194 }
 0xdb3   :  { %v1197_v50 = vmul.f32 %v1195_v33, %v1178_v40 }
 0xdb5   :  { %1219 = vrot.lane.b32.xlu0 %v1197_v50, %s2232_s27 }
 0xe0b   :  { %v1114_v54 = vpop.permute.xlu2 %1113 }
 0xe0c   :  { %1758 = vmatmul.msk.f32.vlgmr.msra.gmra.mxu2 %vm174_vm0, %v1114_v54  ;;  %1761 = vmatmul.msk.f32.vlgmr.msrb.gmra.mxu1 %vm174_vm0, %v1114_v54 }
 0xe0d   :  { %1379 = vmatpush.msra.mxu2 %v2648_v53  ;;  %1467 = vmatpush.msrb.mxu1 %v2446_v3  ;;  %v1933_v3 = vld [vmem:[#allocation13 + $0x18] sm:$0xff] }
 0xe0f   :  { %1380 = vmatpush.msra.mxu2 %v2652_v7  ;;  %1468 = vmatpush.msrb.mxu1 %v2448_v6  ;;  %v1934_v6 = vld [vmem:[#allocation13 + $0x10] sm:$0xff] }
 0xe11   :  { %1381 = vmatpush.msra.mxu2 %v2656_v60  ;;  %1469 = vmatpush.msrb.mxu1 %v2452_v8  ;;  %v1935_v8 = vld [vmem:[#allocation13 + $0x8] sm:$0xff] }
 0xe13   :  { %1382 = vmatpush.msra.mxu2 %v2660_v56  ;;  %1470 = vmatpush.msrb.mxu1 %v2456_v49  ;;  %v1936_v49 = vld [vmem:[#allocation13] sm:$0xff] }
 0xe27   :  { %v1220_v10 = vpop.permute.xlu0 %1219 }
 0xe28   :  { %1762 = vmatmul.msk.f32.vlgmr.msrb.gmra.mxu2 %vm174_vm0, %v1220_v10  ;;  %1765 = vmatmul.msk.f32.vlgmr.msra.gmra.mxu1 %vm174_vm0, %v1220_v10 }
 0xe29   :  { %1490 = vmatpush.msrb.mxu2 %v2606_v51  ;;  %1573 = vmatpush.msra.mxu1 %v1933_v3  ;;  %v268_v51 = vpop.f32.mrf.mxu0 }
 0xe2a   :  { %v1308_v0 = vadd.f32 %v2627_v57, %v268_v51  ;;  %v1941_v51 = vld [vmem:[#allocation16] sm:$0xff] }
 0xe2b   :  { %1491 = vmatpush.msrb.mxu2 %v2610_v52  ;;  %1574 = vmatpush.msra.mxu1 %v1934_v6 }
 0xe2d   :  { %1492 = vmatpush.msrb.mxu2 %v2614_v55  ;;  %1575 = vmatpush.msra.mxu1 %v1935_v8  ;;  %v216_v8 = vld [vmem:[#allocation4 + $0x38] sm:$0xff] }
 0xe2e   :  { %270 = vmatmul.f32.gmra.mxu0 %v216_v8 }
 0xe2f   :  { %1493 = vmatpush.msrb.mxu2 %v2618_v58  ;;  %1576 = vmatpush.msra.mxu1 %v1936_v49  ;;  %v2675_v58 = vld [vmem:[%s2765_s8] ss:$0 sm:$0xff] }
 0xe89   :  { %v1215_v59 = vpop.f32.mrf.mxu1 }
 0xe8f   :  { %v1134_v62 = vpop.f32.mrf.mxu2 }
 0xe90   :  { %v1135_v63 = vadd.f32 %v2495_v18, %v1134_v62  ;;  %v1939_v62 = vld [vmem:[#allocation16 + $0x10] sm:$0xff] }
 0xe92   :  { %1138 = vst [vmem:[#allocation18 + $0x20] sm:$0xff] %v1135_v63  ;;  %v1940_v63 = vld [vmem:[#allocation16 + $0x8] sm:$0xff] }
 0xea5   :  { %v1326_v24 = vpop.f32.mrf.mxu1 }
 0xea6   :  { %v1329_v52 = vadd.f32 %v1326_v24, %v1308_v0 }
 0xea8   :  { %1884 = vtanh.f32 %v1329_v52  ;;  %v1766_v13 = vmul.f32 -1.442695, %v1329_v52 }
 0xeab   :  { %v1240_v2 = vpop.f32.mrf.mxu2 }
 0xeac   :  { %v1241_v9 = vadd.f32 %v1240_v2, %v1215_v59 }
 0xeae   :  { %v1885_v55 = vpop.eup %1884  ;;  %v1243_v11 = vadd.f32 %v2675_v58, %v1241_v9 }
 0xeaf   :  { %1352 = vrot.lane.b32.xlu2 %v1885_v55, %s2231_s6 }
 0xeb0   :  { %1886 = vtanh.f32 %v1243_v11  ;;  %v1763_v21 = vmul.f32 -1.442695, %v1243_v11 }
 0xeb1   :  { %1888 = vpow2.f32 %v1766_v13 }
 0xeb6   :  { %v1887_v12 = vpop.eup %1886 }
 0xeb7   :  { %1266 = vrot.lane.b32.xlu1 %v1887_v12, %s2231_s6  ;;  %v1889_v14 = vpop.eup %1888 }
 0xeb8   :  { %v1333_v15 = vadd.f32 1.0, %v1889_v14 }
 0xeba   :  { %1890 = vrcp.f32 %v1333_v15  ;;  %v1345_v26 = vand.u32 2147483648, %v1333_v15  ;;  %vm1339_vm1 = vweird.f32 %v1333_v15  ;;  %v1343_v27 = vand.u32 2147483647, %v1333_v15 }
 0xebb   :  { %1892 = vpow2.f32 %v1763_v21 }
 0xebc   :  { %v1346_v29 = vor.u32 1.1754944e-38, %v1345_v26  ;;  %vm1344_vm3 = vcmp.eq.f32.partialorder %v1343_v27, 8.507059e+37 }
 0xec0   :  { %v1891_v16 = vpop.eup %1890 }
 0xec1   :  { %v1335_v17 = vmul.f32 %v1891_v16, %v1333_v15  ;;  %vm1340_vm15 = vweird.f32 %v1891_v16  ;;  %v1893_v61 = vpop.eup %1892 }
 0xec2   :  { %vm1341_vm2 = vmor %vm1339_vm1, %vm1340_vm15  ;;  %v1247_v1 = vadd.f32 1.0, %v1893_v61 }
 0xec3   :  { %v1336_v19 = vsub.f32 1.0, %v1335_v17 }
 0xec4   :  { %1894 = vrcp.f32 %v1247_v1  ;;  %v1259_v23 = vand.u32 2147483648, %v1247_v1  ;;  %vm1253_vm5 = vweird.f32 %v1247_v1  ;;  %v1257_v40 = vand.u32 2147483647, %v1247_v1 }
 0xec5   :  { %v1337_v22 = vmul.f32 %v1891_v16, %v1336_v19 }
 0xec6   :  { %v1260_v43 = vor.u32 1.1754944e-38, %v1259_v23  ;;  %vm1258_vm7 = vcmp.eq.f32.partialorder %v1257_v40, 8.507059e+37 }
 0xec7   :  { %v1338_v25 = vadd.f32 %v1891_v16, %v1337_v22 }
 0xec9   :  { %v1342_v28 = vsel %vm1341_vm2, %v1891_v16, %v1338_v25 }
 0xeca   :  { %v1347_v31 = vsel %vm1344_vm3, %v1346_v29, %v1342_v28  ;;  %v1895_v34 = vpop.eup %1894 }
 0xecb   :  { %v1249_v35 = vmul.f32 %v1895_v34, %v1247_v1  ;;  %vm1254_vm4 = vweird.f32 %v1895_v34  ;;  %v1350_v4 = vmul.f32 %v1347_v31, %v2639_v47 }
 0xecc   :  { %vm1255_vm6 = vmor %vm1253_vm5, %vm1254_vm4 }
 0xecd   :  { %v1250_v36 = vsub.f32 1.0, %v1249_v35 }
 0xecf   :  { %v1251_v38 = vmul.f32 %v1895_v34, %v1250_v36 }
 0xed1   :  { %v1252_v39 = vadd.f32 %v1895_v34, %v1251_v38 }
 0xed3   :  { %v1256_v42 = vsel %vm1255_vm6, %v1895_v34, %v1252_v39 }
 0xed4   :  { %v1261_v46 = vsel %vm1258_vm7, %v1260_v43, %v1256_v42 }
 0xed5   :  { %v1264_v33 = vmul.f32 %v1261_v46, %v2635_v45  ;;  %v1938_v45 = vld [vmem:[#allocation16 + $0x18] sm:$0xff] }
 0xf09   :  { %v1353_v30 = vpop.permute.xlu2 %1352 }
 0xf0a   :  { %v1355_v32 = vmul.f32 %v1353_v30, %v1347_v31 }
 0xf0c   :  { %1357 = vrot.lane.b32.xlu1 %v1355_v32, %s2232_s27 }
 0xf29   :  { %v1267_v20 = vpop.permute.xlu1 %1266 }
 0xf2a   :  { %v1269_v37 = vmul.f32 %v1267_v20, %v1261_v46 }
 0xf2c   :  { %1271 = vrot.lane.b32.xlu0 %v1269_v37, %s2232_s27 }
 0xf7e   :  { %v1358_v48 = vpop.permute.xlu1 %1357 }
 0xf7f   :  { %v2683_v5 = vadd.f32 %v1358_v48, %v1350_v4 }
 0xf81   :  { %1896 = vtanh.f32 %v2683_v5 }
 0xf87   :  { %v1897_v41 = vpop.eup %1896 }
 0xf88   :  { %1363 = vrot.lane.b32.xlu0 %v1897_v41, %s2231_s6 }
 0xf9e   :  { %v1272_v50 = vpop.permute.xlu0 %1271 }
 0xf9f   :  { %v2688_v44 = vadd.f32 %v1272_v50, %v1264_v33 }
 0xfa1   :  { %1898 = vtanh.f32 %v2688_v44 }
 0xfa7   :  { %v1899_v54 = vpop.eup %1898 }
 0xfa8   :  { %1277 = vrot.lane.b32.xlu2 %v1899_v54, %s2231_s6 }
 0xffa   :  { %v1364_v10 = vpop.permute.xlu0 %1363 }
 0xffb   :  { %v1366_v47 = vmul.f32 %v1364_v10, %v1347_v31 }
 0xffd   :  { %1388 = vrot.lane.b32.xlu2 %v1366_v47, %s2232_s27 }
0x1002   :  { %v1278_v3 = vpop.permute.xlu2 %1277 }
0x1003   :  { %v1280_v6 = vmul.f32 %v1278_v3, %v1261_v46 }
0x1005   :  { %1282 = vrot.lane.b32.xlu1 %v1280_v6, %s2232_s27 }
0x1057   :  { %v1389_v59 = vpop.permute.xlu2 %1388 }
0x1077   :  { %v1283_v49 = vpop.permute.xlu1 %1282 }
0x1078   :  { %1764 = vmatmul.msk.f32.vlgmr.msrb.gmra.mxu3 %vm174_vm0, %v1283_v49  ;;  %1767 = vmatmul.msk.f32.vlgmr.msra.gmra.mxu2 %vm174_vm0, %v1283_v49 }
0x1079   :  { %1548 = vmatpush.msrb.mxu3 %v2648_v53  ;;  %1636 = vmatpush.msra.mxu2 %v1938_v45  ;;  %v2723_v45 = vld [vmem:[%s2767_s10] ss:$0 sm:$0xff]  ;;  %s2233_s10 = smov 96  }
0x107b   :  { %1549 = vmatpush.msrb.mxu3 %v2652_v7  ;;  %1637 = vmatpush.msra.mxu2 %v1939_v62  ;;  %v271_v7 = vpop.f32.mrf.mxu0 }
0x107c   :  { %v1477_v52 = vadd.f32 %v2627_v57, %v271_v7 }
0x107d   :  { %1550 = vmatpush.msrb.mxu3 %v2656_v60  ;;  %1638 = vmatpush.msra.mxu2 %v1940_v63 }
0x107f   :  { %1551 = vmatpush.msrb.mxu3 %v2660_v56  ;;  %1639 = vmatpush.msra.mxu2 %v1941_v51 }
0x1080   :  { %1768 = vmatmul.msk.f32.vlgmr.msra.gmra.mxu3 %vm174_vm0, %v1389_v59  ;;  %1771 = vmatmul.msk.f32.vlgmr.msrb.gmra.mxu2 %vm174_vm0, %v1389_v59 }
0x10fb   :  { %v1303_v53 = vpop.f32.mrf.mxu3  ;;  %v1384_v0 = vpop.f32.mrf.mxu2 }
0x10fc   :  { %v1304_v24 = vadd.f32 %v2495_v18, %v1303_v53 }
0x10fe   :  { %1307 = vst [vmem:[#allocation18 + $0x28] sm:$0xff] %v1304_v24 }
0x1103   :  { %v1409_v60 = vpop.f32.mrf.mxu3  ;;  %v1495_v2 = vpop.f32.mrf.mxu2 }
0x1104   :  { %v1410_v9 = vadd.f32 %v1409_v60, %v1384_v0  ;;  %v1498_v55 = vadd.f32 %v1495_v2, %v1477_v52 }
0x1106   :  { %v1412_v56 = vadd.f32 %v2675_v58, %v1410_v9  ;;  %1900 = vtanh.f32 %v1498_v55  ;;  %v1772_v13 = vmul.f32 -1.442695, %v1498_v55 }
0x1108   :  { %1902 = vtanh.f32 %v1412_v56  ;;  %v1769_v18 = vmul.f32 -1.442695, %v1412_v56 }
0x1109   :  { %1904 = vpow2.f32 %v1772_v13 }
0x110a   :  { %1906 = vpow2.f32 %v1769_v18 }
0x110c   :  { %v1901_v11 = vpop.eup %1900 }
0x110d   :  { %1521 = vrot.lane.b32.xlu1 %v1901_v11, %s2231_s6 }
0x110e   :  { %v1903_v12 = vpop.eup %1902 }
0x110f   :  { %1435 = vrot.lane.b32.xlu0 %v1903_v12, %s2231_s6  ;;  %v1905_v14 = vpop.eup %1904 }
0x1110   :  { %v1907_v57 = vpop.eup %1906  ;;  %v1502_v15 = vadd.f32 1.0, %v1905_v14 }
0x1111   :  { %v1416_v16 = vadd.f32 1.0, %v1907_v57 }
0x1112   :  { %1908 = vrcp.f32 %v1502_v15  ;;  %v1514_v29 = vand.u32 2147483648, %v1502_v15  ;;  %vm1508_vm9 = vweird.f32 %v1502_v15  ;;  %v1512_v1 = vand.u32 2147483647, %v1502_v15 }
0x1113   :  { %1910 = vrcp.f32 %v1416_v16  ;;  %v1428_v31 = vand.u32 2147483648, %v1416_v16  ;;  %vm1422_vm12 = vweird.f32 %v1416_v16  ;;  %v1426_v34 = vand.u32 2147483647, %v1416_v16 }
0x1114   :  { %v1515_v35 = vor.u32 1.1754944e-38, %v1514_v29  ;;  %vm1513_vm14 = vcmp.eq.f32.partialorder %v1512_v1, 8.507059e+37 }
0x1115   :  { %v1429_v23 = vor.u32 1.1754944e-38, %v1428_v31  ;;  %vm1427_vm15 = vcmp.eq.f32.partialorder %v1426_v34, 8.507059e+37 }
0x1118   :  { %v1909_v17 = vpop.eup %1908 }
0x1119   :  { %v1911_v19 = vpop.eup %1910  ;;  %v1504_v21 = vmul.f32 %v1909_v17, %v1502_v15  ;;  %vm1509_vm8 = vweird.f32 %v1909_v17 }
0x111a   :  { %v1418_v22 = vmul.f32 %v1911_v19, %v1416_v16  ;;  %vm1423_vm10 = vweird.f32 %v1911_v19  ;;  %vm1510_vm11 = vmor %vm1508_vm9, %vm1509_vm8 }
0x111b   :  { %v1505_v25 = vsub.f32 1.0, %v1504_v21  ;;  %vm1424_vm13 = vmor %vm1422_vm12, %vm1423_vm10 }
0x111c   :  { %v1419_v26 = vsub.f32 1.0, %v1418_v22 }
0x111d   :  { %v1506_v27 = vmul.f32 %v1909_v17, %v1505_v25 }
0x111e   :  { %v1420_v61 = vmul.f32 %v1911_v19, %v1419_v26 }
0x111f   :  { %v1507_v28 = vadd.f32 %v1909_v17, %v1506_v27 }
0x1120   :  { %v1421_v30 = vadd.f32 %v1911_v19, %v1420_v61 }
0x1121   :  { %v1511_v32 = vsel %vm1510_vm11, %v1909_v17, %v1507_v28 }
0x1122   :  { %v1425_v36 = vsel %vm1424_vm13, %v1911_v19, %v1421_v30  ;;  %v1516_v39 = vsel %vm1513_vm14, %v1515_v35, %v1511_v32 }
0x1123   :  { %v1430_v43 = vsel %vm1427_vm15, %v1429_v23, %v1425_v36  ;;  %v1519_v41 = vmul.f32 %v1516_v39, %v2683_v5 }
0x1124   :  { %v1433_v46 = vmul.f32 %v1430_v43, %v2688_v44 }
0x117f   :  { %v1522_v38 = vpop.permute.xlu1 %1521 }
0x1180   :  { %v1524_v40 = vmul.f32 %v1522_v38, %v1516_v39 }
0x1181   :  { %v1436_v42 = vpop.permute.xlu0 %1435 }
0x1182   :  { %v1438_v20 = vmul.f32 %v1436_v42, %v1430_v43  ;;  %1526 = vrot.lane.b32.xlu0 %v1524_v40, %s2232_s27 }
0x1184   :  { %1440 = vrot.lane.b32.xlu2 %v1438_v20, %s2232_s27 }
0x11de   :  { %v1441_v37 = vpop.permute.xlu2 %1440 }
0x11df   :  { %v1443_v4 = vadd.f32 %v1441_v37, %v1433_v46 }
0x11e1   :  { %1912 = vtanh.f32 %v1443_v4 }
0x11e7   :  { %v1913_v48 = vpop.eup %1912 }
0x11e8   :  { %1446 = vrot.lane.b32.xlu1 %v1913_v48, %s2231_s6 }
0x11f4   :  { %v1527_v33 = vpop.permute.xlu0 %1526 }
0x11f5   :  { %v1529_v50 = vadd.f32 %v1527_v33, %v1519_v41 }
0x11f7   :  { %1914 = vtanh.f32 %v1529_v50 }
0x11fd   :  { %v1915_v54 = vpop.eup %1914 }
0x11fe   :  { %1532 = vrot.lane.b32.xlu2 %v1915_v54, %s2231_s6 }
0x1258   :  { %v1533_v10 = vpop.permute.xlu2 %1532 }
0x1259   :  { %v1535_v47 = vmul.f32 %v1533_v10, %v1516_v39 }
0x125a   :  { %v1447_v3 = vpop.permute.xlu1 %1446 }
0x125b   :  { %v1449_v6 = vmul.f32 %v1447_v3, %v1430_v43  ;;  %1557 = vrot.lane.b32.xlu1 %v1535_v47, %s2232_s27 }
0x125d   :  { %1451 = vrot.lane.b32.xlu0 %v1449_v6, %s2232_s27 }
0x12cd   :  { %v1558_v44 = vpop.permute.xlu1 %1557 }
0x12ce   :  { %1647 = vst.msk [vmem:[#allocation2] sm:$0xff] %vm174_vm0, %v1558_v44 }
0x12cf   :  { %v1452_v8 = vpop.permute.xlu0 %1451 }
0x12d0   :  { %1770 = vmatmul.msk.f32.vlgmr.msrb.gmra.mxu1 %vm174_vm0, %v1452_v8  ;;  %1773 = vmatmul.msk.f32.vlgmr.msrb.gmra.mxu3 %vm174_vm0, %v1452_v8 }
0x12d5   :  { %v1663_v5 = vld [vmem:[#allocation2] sm:$0xff] }
0x12d6   :  { %1665 = vst.msk [vmem:[#allocation19] sm:$0xff] %vm174_vm0, %v1663_v5 }
0x12d8   :  { %1774 = vmatmul.msk.f32.vlgmr.msra.gmra.mxu1 %vm174_vm0, %v1558_v44 }
0x134d   :  { %v1472_v49 = vpop.f32.mrf.mxu1 }
0x134e   :  { %v1473_v62 = vadd.f32 %v2723_v45, %v1472_v49 }
0x1350   :  { %1476 = vst [vmem:[#allocation18 + $0x30] sm:$0xff] %v1473_v62 }
0x1353   :  { %v1553_v63 = vpop.f32.mrf.mxu3 }
0x1355   :  { %v1578_v59 = vpop.f32.mrf.mxu1 }
0x1356   :  { %v1579_v51 = vadd.f32 %v1578_v59, %v1553_v63 }
0x1358   :  { %v1581_v53 = vadd.f32 %v2675_v58, %v1579_v51 }
0x135a   :  { %1916 = vtanh.f32 %v1581_v53  ;;  %v1775_v24 = vmul.f32 -1.442695, %v1581_v53 }
0x135c   :  { %1918 = vpow2.f32 %v1775_v24 }
0x1360   :  { %v1917_v0 = vpop.eup %1916 }
0x1361   :  { %1604 = vrot.lane.b32.xlu2 %v1917_v0, %s2231_s6 }
0x1362   :  { %v1919_v7 = vpop.eup %1918 }
0x1363   :  { %v1585_v52 = vadd.f32 1.0, %v1919_v7 }
0x1365   :  { %1920 = vrcp.f32 %v1585_v52  ;;  %v1597_v11 = vand.u32 2147483648, %v1585_v52  ;;  %vm1591_vm2 = vweird.f32 %v1585_v52  ;;  %v1595_v12 = vand.u32 2147483647, %v1585_v52 }
0x1367   :  { %v1598_v13 = vor.u32 1.1754944e-38, %v1597_v11  ;;  %vm1596_vm4 = vcmp.eq.f32.partialorder %v1595_v12, 8.507059e+37 }
0x136b   :  { %v1921_v60 = vpop.eup %1920 }
0x136c   :  { %v1587_v2 = vmul.f32 %v1921_v60, %v1585_v52  ;;  %vm1592_vm1 = vweird.f32 %v1921_v60 }
0x136d   :  { %vm1593_vm3 = vmor %vm1591_vm2, %vm1592_vm1 }
0x136e   :  { %v1588_v9 = vsub.f32 1.0, %v1587_v2 }
0x1370   :  { %v1589_v55 = vmul.f32 %v1921_v60, %v1588_v9 }
0x1372   :  { %v1590_v56 = vadd.f32 %v1921_v60, %v1589_v55 }
0x1374   :  { %v1594_v58 = vsel %vm1593_vm3, %v1921_v60, %v1590_v56 }
0x1375   :  { %v1599_v14 = vsel %vm1596_vm4, %v1598_v13, %v1594_v58 }
0x1376   :  { %v1602_v15 = vmul.f32 %v1599_v14, %v1443_v4 }
0x13bb   :  { %v1605_v18 = vpop.permute.xlu2 %1604 }
0x13bc   :  { %v1607_v57 = vmul.f32 %v1605_v18, %v1599_v14 }
0x13be   :  { %1609 = vrot.lane.b32.xlu0 %v1607_v57, %s2232_s27 }
0x13c6   :  { %1649 = vrot.lane.b32.xlu0 %v1529_v50, %s2233_s10 }
0x1430   :  { %v1610_v16 = vpop.permute.xlu0 %1609 }
0x1431   :  { %v1612_v17 = vadd.f32 %v1610_v16, %v1602_v15 }
0x1433   :  { %1922 = vtanh.f32 %v1612_v17 }
0x1438   :  { %v1650_v19 = vpop.permute.xlu0 %1649 }
0x1439   :  { %v1923_v21 = vpop.eup %1922  ;;  %1652 = vst.msk [vmem:[#allocation3] sm:$0xff] %vm174_vm0, %v1650_v19 }
0x143a   :  { %1615 = vrot.lane.b32.xlu1 %v1923_v21, %s2231_s6  ;;  %s1677_s6 = sshll.u32 %s2768_s11, 4  ;;  %s1678_s6 = int_to_ptr.hbm [resolvable:$true] %s1677_s6 }
0x1440   :  { %v1667_v22 = vld [vmem:[#allocation3] sm:$0xff] }
0x1441   :  { %1669 = vst.msk [vmem:[#allocation21] sm:$0xff] %vm174_vm0, %v1667_v22 }
0x1442   :  { %1656 = vrot.lane.b32.xlu1 %v1612_v17, %s2233_s10 }
0x14ac   :  { %v1616_v25 = vpop.permute.xlu1 %1615 }
0x14ad   :  { %v1618_v26 = vmul.f32 %v1616_v25, %v1599_v14 }
0x14af   :  { %1620 = vrot.lane.b32.xlu2 %v1618_v26, %s2232_s27 }
0x14b4   :  { %v1657_v27 = vpop.permute.xlu1 %1656 }
0x14b5   :  { %1659 = vst.msk [vmem:[#allocation3 + $0x8] sm:$0xff] %vm174_vm0, %v1657_v27 }
0x14bc   :  { %v1668_v61 = vld [vmem:[#allocation3 + $0x8] sm:$0xff] }
0x14bd   :  { %1670 = vst.msk [vmem:[#allocation21 + $0x8] sm:$0xff] %vm174_vm0, %v1668_v61 }
0x1509   :  { %v1621_v28 = vpop.permute.xlu2 %1620 }
0x150a   :  { %1654 = vst.msk [vmem:[#allocation2 + $0x8] sm:$0xff] %vm174_vm0, %v1621_v28  ;;  %1776 = vmatmul.msk.f32.vlgmr.msra.gmra.mxu2 %vm174_vm0, %v1621_v28 }
0x1511   :  { %v1664_v29 = vld [vmem:[#allocation2 + $0x8] sm:$0xff] }
0x1512   :  { %1666 = vst.msk [vmem:[#allocation19 + $0x8] sm:$0xff] %vm174_vm0, %v1664_v29 }
0x1513   :  { %1696 = dma.vmem_to_hbm [thread:$0]  %s1689_s20, 256, %s1691_s4, [#allocation20], %s2222_s16, %s2222_s16, %s2223_s17  }
0x1514   :  { %1709 = dma.vmem_to_hbm [thread:$0]  %s1702_s22, 256, %s1704_s25, [#allocation20], %s2222_s16, %s2222_s16, %s2223_s17  }
0x158d   :  { %v1641_v1 = vpop.f32.mrf.mxu2 }
0x158e   :  { %v1642_v30 = vadd.f32 %v2723_v45, %v1641_v1 }
0x1590   :  { %1645 = vst [vmem:[#allocation18 + $0x38] sm:$0xff] %v1642_v30 }
0x1591   :  { %1683 = dma.vmem_to_hbm [thread:$0]  %s1676_s7, 1024, %s1678_s6, [#allocation6], %s2222_s16, %s2222_s16, %s2223_s17  }
0x1592   :  { %2217 = dma.done.wait [#allocation6], 1024  }
0x1593   :  { %2218 = vsyncadd [#allocation6], 4294966272 }
0x1594   :  { %2219 = dma.done.wait [#allocation20], 512  }
0x1595   :  { %2220 = vsyncadd [#allocation20], 4294966784 }
0x1596   :  { %1722 = vsyncpa [#allocation5], 1 }
0x1597   :  { %1723 = vsyncpa [#allocation8], 1 }
0x1598   :  { %1724 = vsyncpa [#allocation11], 1 }
0x1599   :  { %1725 = vsyncpa [#allocation14], 1 }
0x159a   :  { %1726 = vsyncpa [#allocation17], 1 }
0x159b   :  { %1727 = vsyncpa [#allocation6], 1 }
0x159c   :  { %1728 = vsyncpa [#allocation20], 1 }

</bundles_post_ra>
